<compile_context>
chip_gen: v7x
topology: tpu7x:2x2x1
jax: 0.10.0
libtpu: 0.0.40
codegen_flags: <defaults>
</compile_context>

<pallas_src>
import jax
import jax.numpy as jnp
import numpy as np
from jax.experimental import pallas as pl
from jax.experimental.pallas import tpu as pltpu


def _round_up(x, m):
    return (x + m - 1) // m * m


def _make_branch_kernel(H, W, CF):
    """Kernel for one batch sample, all three branches fused on CF lanes."""
    WP = W + 2                        # width incl. 2 junk columns (kept zero)
    R_OUT = H * WP                    # rows enumerate (y, xp), xp in [0, WP)
    TAPS = tuple(dy * WP + dx for dy in range(3) for dx in range(3))
    BASE = (-(WP + 1)) % 8            # sublane-align the big interior store
    TOP = BASE + WP + 1               # first interior row (multiple of 8)
    PAD_ROWS = _round_up(BASE + max(TAPS) + R_OUT, 8)
    BOT = PAD_ROWS - TOP - R_OUT      # trailing halo rows

    def kernel(xin_ref, w1_ref, wa_ref, wb_ref, out_ref, pad_ref):
        # Zero only the halo border rows once per grid step; the interior is
        # fully rewritten by every conv3x3() call below, so the border stays
        # zero for the whole step.  (Each TensorCore owns a private scratch
        # under 'parallel' semantics, so this must run every step.)
        pad_ref[:TOP, :] = jnp.zeros((TOP, CF), jnp.float32)
        pad_ref[TOP + R_OUT:, :] = jnp.zeros((BOT, CF), jnp.float32)

        # Row r corresponds to (y = r // WP, xp = r % WP); xp >= W are junk
        # columns that must be forced to zero before entering the halo slab.
        xp = jax.lax.broadcasted_iota(jnp.int32, (R_OUT, 1), 0) % WP
        valid = (xp < W).astype(jnp.float32)

        # Fused 1x1 conv (bias=False): one pointwise matmul, K = 3*Cin (f32).
        x = xin_ref[0]                                     # (R_OUT, 3*Cin)
        y0 = jnp.dot(x, w1_ref[...], preferred_element_type=jnp.float32)

        def conv3x3(a, w_ref):
            # Masked interior write keeps the zero halo / junk columns intact.
            pad_ref[TOP:TOP + R_OUT, :] = a * valid
            # 9 accumulating bf16 MXU dots (K = CF each) on row-shifted tap
            # views of the halo slab; no materialized im2col buffer.
            acc = jnp.zeros((R_OUT, CF), jnp.float32)
            for k, off in enumerate(TAPS):
                tap = pad_ref[BASE + off:BASE + off + R_OUT, :]
                acc = acc + jnp.dot(tap.astype(jnp.bfloat16), w_ref[k],
                                    preferred_element_type=jnp.float32)
            return acc

        # TODO(synk): ResBlock source is not in the provided spec; assumed
        # conv3x3 -> ReLU -> conv3x3 with identity skip from the 1x1-conv
        # output, final ReLU, bias=False, no normalization.
        h = jnp.maximum(conv3x3(y0, wa_ref), 0.0)
        h = conv3x3(h, wb_ref)
        out_ref[0] = jnp.maximum(y0 + h, 0.0)

    return kernel, R_OUT, PAD_ROWS


def _fused_branches(xin, w1f, waf, wbf, *, H, W):
    N, r_in, cin_f = xin.shape
    CF = w1f.shape[1]
    kernel, R_OUT, PAD_ROWS = _make_branch_kernel(H, W, CF)
    assert r_in == R_OUT

    flops = N * (2 * R_OUT * cin_f * CF            # 1x1 conv
                 + 2 * (2 * R_OUT * 9 * CF * CF))  # two 3x3 convs
    bytes_accessed = (xin.size * 4 + w1f.size * 4
                      + waf.size * 2 + wbf.size * 2
                      + N * R_OUT * CF * 4)

    return pl.pallas_call(
        kernel,
        out_shape=jax.ShapeDtypeStruct((N, R_OUT, CF), jnp.float32),
        grid_spec=pltpu.PrefetchScalarGridSpec(
            num_scalar_prefetch=0,
            grid=(N,),
            in_specs=[
                pl.BlockSpec((1, R_OUT, cin_f), lambda n: (n, 0, 0)),
                pl.BlockSpec((cin_f, CF), lambda n: (0, 0)),
                pl.BlockSpec((9, CF, CF), lambda n: (0, 0, 0)),
                pl.BlockSpec((9, CF, CF), lambda n: (0, 0, 0)),
            ],
            out_specs=pl.BlockSpec((1, R_OUT, CF), lambda n: (n, 0, 0)),
            scratch_shapes=[
                pltpu.VMEM((PAD_ROWS, CF), jnp.float32),     # zero-halo slab
            ],
        ),
        compiler_params=pltpu.CompilerParams(
            dimension_semantics=("parallel",)),              # megacore on v7x
        cost_estimate=pl.CostEstimate(
            flops=flops, transcendentals=0, bytes_accessed=bytes_accessed),
    )(xin, w1f, waf, wbf)


def init_tri_feat_input_params(key, n_channels, chals):
    """Deterministic synthetic init (Kaiming-style scaling), JAX-native layout:
       1x1 conv weight as (Cin, Cout), 3x3 conv weights as HWIO (3,3,Cin,Cout)."""
    def branch(k):
        k1, k2, k3 = jax.random.split(k, 3)
        w1 = jax.random.normal(k1, (n_channels, chals), jnp.float32) / jnp.sqrt(
            float(n_channels))
        wa = jax.random.normal(k2, (3, 3, chals, chals), jnp.float32) / jnp.sqrt(
            9.0 * chals)
        wb = jax.random.normal(k3, (3, 3, chals, chals), jnp.float32) / jnp.sqrt(
            9.0 * chals)
        return (w1, wa, wb)

    kv, kw, kx = jax.random.split(key, 3)
    return {"seqv": branch(kv), "seqw": branch(kw), "seqx": branch(kx)}


@jax.jit
def tri_feat_input(params, v, w, x):
    """Forward of triFeatInput: NCHW inputs, three NCHW (N, chals, H, W) outputs."""
    N, cin, H, Wsp = v.shape
    chals = params["seqv"][0].shape[1]
    nb = 3
    CF = _round_up(nb * chals, 128)      # lane-dense fused channel width
    WP = Wsp + 2

    # ---- block-diagonal fused weights (branch b owns channel block b) ----
    w1f = jnp.zeros((nb * cin, CF), jnp.float32)
    waf = jnp.zeros((9, CF, CF), jnp.float32)
    wbf = jnp.zeros((9, CF, CF), jnp.float32)
    for b, name in enumerate(("seqv", "seqw", "seqx")):
        w1, wa, wb = params[name]
        ci = slice(b * cin, (b + 1) * cin)
        co = slice(b * chals, (b + 1) * chals)
        w1f = w1f.at[ci, co].set(w1)
        waf = waf.at[:, co, co].set(wa.reshape(9, chals, chals))
        wbf = wbf.at[:, co, co].set(wb.reshape(9, chals, chals))
    # bf16 MXU operands for the 3x3 convs (f32 accumulation in-kernel).
    waf = waf.astype(jnp.bfloat16)
    wbf = wbf.astype(jnp.bfloat16)

    # ---- pack the three NCHW inputs into one lane-major slab ----
    a = jnp.concatenate([v, w, x], axis=1)               # (N, 3*cin, H, W)
    a = jnp.transpose(a, (0, 2, 3, 1))                   # (N, H, W, 3*cin)
    a = jnp.pad(a, ((0, 0), (0, 0), (0, 2), (0, 0)))     # zero junk columns
    xin = a.reshape(N, H * WP, nb * cin)

    out = _fused_branches(xin, w1f, waf, wbf, H=H, W=Wsp)   # (N, H*WP, CF)

    out = out.reshape(N, H, WP, CF)[:, :, :Wsp, :nb * chals]
    out = jnp.transpose(out, (0, 3, 1, 2))                # (N, 3*chals, H, W)
    return (out[:, :chals], out[:, chals:2 * chals], out[:, 2 * chals:])


def _reference_forward(params, v, w, x):
    """Pure-JAX reference (same assumed ResBlock structure), f32 HIGHEST."""
    def conv3(t, wt):
        return jax.lax.conv_general_dilated(
            t, wt, window_strides=(1, 1), padding=((1, 1), (1, 1)),
            dimension_numbers=("NHWC", "HWIO", "NHWC"),
            precision=jax.lax.Precision.HIGHEST)

    def branch(p, a):
        w1, wa, wb = p
        t = jnp.transpose(a, (0, 2, 3, 1))
        y0 = jnp.einsum("nhwc,cd->nhwd", t, w1,
                        precision=jax.lax.Precision.HIGHEST)
        h = jax.nn.relu(conv3(y0, wa))
        h = conv3(h, wb)
        return jnp.transpose(jax.nn.relu(y0 + h), (0, 3, 1, 2))

    return (branch(params["seqv"], v), branch(params["seqw"], w),
            branch(params["seqx"], x))


if __name__ == "__main__":
    # small shapes consistent with the module: batch=2, n_channels=4,
    # spatial=16x16, chals=32
    N, C_IN, H, W_SP = 2, 4, 16, 16
    CHALS = 32

    key = jax.random.PRNGKey(0)
    kp, kv, kw, kx = jax.random.split(key, 4)

    params = init_tri_feat_input_params(kp, C_IN, CHALS)
    v = jax.random.normal(kv, (N, C_IN, H, W_SP), jnp.float32)
    w = jax.random.normal(kw, (N, C_IN, H, W_SP), jnp.float32)
    x = jax.random.normal(kx, (N, C_IN, H, W_SP), jnp.float32)

    outs = tri_feat_input(params, v, w, x)
    jax.block_until_ready(outs)

    ov, ow, ox = outs
    assert ov.shape == (N, CHALS, H, W_SP)
    assert ow.shape == (N, CHALS, H, W_SP)
    assert ox.shape == (N, CHALS, H, W_SP)

    # correctness check against a pure-JAX reference (tolerance absorbs the
    # bf16-operand / f32-accumulate MXU path)
    refs = _reference_forward(params, v, w, x)
    for got, ref in zip(outs, refs):
        np.testing.assert_allclose(np.asarray(got), np.asarray(ref),
                                   rtol=2e-2, atol=2e-2)

    print("KERNEL_OK")
</pallas_src>

<mosaic_0001>
module attributes {stable_mosaic.version = 11 : i64} {
  func.func @kernel(%arg0: i32, %arg1: memref<1x288x12xf32, #tpu.memory_space<vmem>>, %arg2: memref<12x128xf32, #tpu.memory_space<vmem>>, %arg3: memref<9x128x128xbf16, #tpu.memory_space<vmem>>, %arg4: memref<9x128x128xbf16, #tpu.memory_space<vmem>>, %arg5: memref<1x288x128xf32, #tpu.memory_space<vmem>>, %arg6: memref<336x128xf32, #tpu.memory_space<vmem>>) attributes {dimension_semantics = [#tpu.dimension_semantics<parallel>], iteration_bounds = array<i64: 2>, scalar_prefetch = 0 : i64, scratch_operands = 1 : i64, tpu.core_type = #tpu.core_type<tc>, window_params = [{transform_indices = @transform_0, window_bounds = array<i64: 1, 288, 12>}, {pipeline_mode = #tpu.pipeline_mode<synchronous>, transform_indices = @transform_1, window_bounds = array<i64: 12, 128>}, {pipeline_mode = #tpu.pipeline_mode<synchronous>, transform_indices = @transform_2, window_bounds = array<i64: 9, 128, 128>}, {pipeline_mode = #tpu.pipeline_mode<synchronous>, transform_indices = @transform_3, window_bounds = array<i64: 9, 128, 128>}, {transform_indices = @transform_4, window_bounds = array<i64: 1, 288, 128>}]} {
    %cst = arith.constant 0.000000e+00 : f32
    %0 = vector.broadcast %cst : f32 to vector<24x128xf32>
    %c0 = arith.constant 0 : index
    %c0_0 = arith.constant 0 : index
    %1 = vector.load %arg6[%c0, %c0_0] : memref<336x128xf32, #tpu.memory_space<vmem>>, vector<24x128xf32>
    tpu.vector_store %arg6[%c0, %c0_0], %0 {strides = array<i32>} : memref<336x128xf32, #tpu.memory_space<vmem>>, vector<24x128xf32>,
    %cst_1 = arith.constant 0.000000e+00 : f32
    %2 = vector.broadcast %cst_1 : f32 to vector<24x128xf32>
    %c312 = arith.constant 312 : index
    %c0_2 = arith.constant 0 : index
    %3 = vector.load %arg6[%c312, %c0_2] : memref<336x128xf32, #tpu.memory_space<vmem>>, vector<24x128xf32>
    tpu.vector_store %arg6[%c312, %c0_2], %2 {strides = array<i32>} : memref<336x128xf32, #tpu.memory_space<vmem>>, vector<24x128xf32>,
    %4 = tpu.iota {dimensions = array<i32: 0>} : vector<288x1xi32>
    %c18_i32 = arith.constant 18 : i32
    %c0_i32 = arith.constant 0 : i32
    %5 = arith.cmpi eq, %c18_i32, %c0_i32 : i32
    %c1_i32 = arith.constant 1 : i32
    %6 = arith.select %5, %c1_i32, %c18_i32 : i32
    %7 = vector.broadcast %6 : i32 to vector<288x1xi32>
    %8 = arith.remsi %4, %7 : vector<288x1xi32>
    %c0_i32_3 = arith.constant 0 : i32
    %9 = vector.broadcast %c0_i32_3 : i32 to vector<288x1xi32>
    %10 = arith.cmpi ne, %8, %9 : vector<288x1xi32>
    %c0_i32_4 = arith.constant 0 : i32
    %11 = vector.broadcast %c0_i32_4 : i32 to vector<288x1xi32>
    %12 = arith.cmpi slt, %8, %11 : vector<288x1xi32>
    %c0_i32_5 = arith.constant 0 : i32
    %13 = arith.cmpi slt, %6, %c0_i32_5 : i32
    %14 = vector.broadcast %13 : i1 to vector<288x1xi1>
    %15 = vector.broadcast %14 : vector<288x1xi1> to vector<288x1xi1>
    %16 = arith.xori %12, %15 : vector<288x1xi1>
    %17 = arith.andi %16, %10 : vector<288x1xi1>
    %18 = vector.broadcast %6 : i32 to vector<288x1xi32>
    %19 = arith.addi %8, %18 : vector<288x1xi32>
    %20 = arith.select %17, %19, %8 : vector<288x1xi1>, vector<288x1xi32>
    %c16_i32 = arith.constant 16 : i32
    %21 = vector.broadcast %c16_i32 : i32 to vector<288x1xi32>
    %22 = arith.cmpi slt, %20, %21 : vector<288x1xi32>
    %23 = arith.extui %22 : vector<288x1xi1> to vector<288x1xi32>
    %24 = arith.sitofp %23 : vector<288x1xi32> to vector<288x1xf32>
    %c0_6 = arith.constant 0 : index
    %c0_7 = arith.constant 0 : index
    %c0_8 = arith.constant 0 : index
    %25 = vector.load %arg1[%c0_6, %c0_7, %c0_8] : memref<1x288x12xf32, #tpu.memory_space<vmem>>, vector<1x288x12xf32>
    %26 = vector.shape_cast %25 : vector<1x288x12xf32> to vector<288x12xf32>
    %c0_9 = arith.constant 0 : index
    %c0_10 = arith.constant 0 : index
    %27 = vector.load %arg2[%c0_9, %c0_10] : memref<12x128xf32, #tpu.memory_space<vmem>>, vector<12x128xf32>
    %cst_11 = arith.constant dense<0.000000e+00> : vector<288x128xf32>
    %28 = tpu.matmul %26, %27, %cst_11 {dimension_numbers = #tpu.dot_dimension_numbers<[1], [0], [0], [1], [0, 0, 1, 1], [], []>} : vector<288x12xf32>, vector<12x128xf32>, vector<288x128xf32> -> vector<288x128xf32>
    %29 = vector.broadcast %24 : vector<288x1xf32> to vector<288x128xf32>
    %30 = arith.mulf %28, %29 : vector<288x128xf32>
    %c24 = arith.constant 24 : index
    %c0_12 = arith.constant 0 : index
    %31 = vector.load %arg6[%c24, %c0_12] : memref<336x128xf32, #tpu.memory_space<vmem>>, vector<288x128xf32>
    tpu.vector_store %arg6[%c24, %c0_12], %30 {strides = array<i32>} : memref<336x128xf32, #tpu.memory_space<vmem>>, vector<288x128xf32>,
    %cst_13 = arith.constant 0.000000e+00 : f32
    %32 = vector.broadcast %cst_13 : f32 to vector<288x128xf32>
    %c5 = arith.constant 5 : index
    %c0_14 = arith.constant 0 : index
    %33 = vector.load %arg6[%c5, %c0_14] : memref<336x128xf32, #tpu.memory_space<vmem>>, vector<288x128xf32>
    %34 = arith.truncf %33 : vector<288x128xf32> to vector<288x128xbf16>
    %c0_15 = arith.constant 0 : index
    %c0_16 = arith.constant 0 : index
    %c0_17 = arith.constant 0 : index
    %35 = vector.load %arg3[%c0_15, %c0_16, %c0_17] : memref<9x128x128xbf16, #tpu.memory_space<vmem>>, vector<1x128x128xbf16>
    %36 = vector.shape_cast %35 : vector<1x128x128xbf16> to vector<128x128xbf16>
    %cst_18 = arith.constant dense<0.000000e+00> : vector<288x128xf32>
    %37 = tpu.matmul %34, %36, %cst_18 {dimension_numbers = #tpu.dot_dimension_numbers<[1], [0], [0], [1], [0, 0, 1, 1], [], []>} : vector<288x128xbf16>, vector<128x128xbf16>, vector<288x128xf32> -> vector<288x128xf32>
    %38 = arith.addf %32, %37 : vector<288x128xf32>
    %c6 = arith.constant 6 : index
    %c0_19 = arith.constant 0 : index
    %39 = vector.load %arg6[%c6, %c0_19] : memref<336x128xf32, #tpu.memory_space<vmem>>, vector<288x128xf32>
    %40 = arith.truncf %39 : vector<288x128xf32> to vector<288x128xbf16>
    %c1 = arith.constant 1 : index
    %c0_20 = arith.constant 0 : index
    %c0_21 = arith.constant 0 : index
    %41 = vector.load %arg3[%c1, %c0_20, %c0_21] : memref<9x128x128xbf16, #tpu.memory_space<vmem>>, vector<1x128x128xbf16>
    %42 = vector.shape_cast %41 : vector<1x128x128xbf16> to vector<128x128xbf16>
    %cst_22 = arith.constant dense<0.000000e+00> : vector<288x128xf32>
    %43 = tpu.matmul %40, %42, %cst_22 {dimension_numbers = #tpu.dot_dimension_numbers<[1], [0], [0], [1], [0, 0, 1, 1], [], []>} : vector<288x128xbf16>, vector<128x128xbf16>, vector<288x128xf32> -> vector<288x128xf32>
    %44 = arith.addf %38, %43 : vector<288x128xf32>
    %c7 = arith.constant 7 : index
    %c0_23 = arith.constant 0 : index
    %45 = vector.load %arg6[%c7, %c0_23] : memref<336x128xf32, #tpu.memory_space<vmem>>, vector<288x128xf32>
    %46 = arith.truncf %45 : vector<288x128xf32> to vector<288x128xbf16>
    %c2 = arith.constant 2 : index
    %c0_24 = arith.constant 0 : index
    %c0_25 = arith.constant 0 : index
    %47 = vector.load %arg3[%c2, %c0_24, %c0_25] : memref<9x128x128xbf16, #tpu.memory_space<vmem>>, vector<1x128x128xbf16>
    %48 = vector.shape_cast %47 : vector<1x128x128xbf16> to vector<128x128xbf16>
    %cst_26 = arith.constant dense<0.000000e+00> : vector<288x128xf32>
    %49 = tpu.matmul %46, %48, %cst_26 {dimension_numbers = #tpu.dot_dimension_numbers<[1], [0], [0], [1], [0, 0, 1, 1], [], []>} : vector<288x128xbf16>, vector<128x128xbf16>, vector<288x128xf32> -> vector<288x128xf32>
    %50 = arith.addf %44, %49 : vector<288x128xf32>
    %c23 = arith.constant 23 : index
    %c0_27 = arith.constant 0 : index
    %51 = vector.load %arg6[%c23, %c0_27] : memref<336x128xf32, #tpu.memory_space<vmem>>, vector<288x128xf32>
    %52 = arith.truncf %51 : vector<288x128xf32> to vector<288x128xbf16>
    %c3 = arith.constant 3 : index
    %c0_28 = arith.constant 0 : index
    %c0_29 = arith.constant 0 : index
    %53 = vector.load %arg3[%c3, %c0_28, %c0_29] : memref<9x128x128xbf16, #tpu.memory_space<vmem>>, vector<1x128x128xbf16>
    %54 = vector.shape_cast %53 : vector<1x128x128xbf16> to vector<128x128xbf16>
    %cst_30 = arith.constant dense<0.000000e+00> : vector<288x128xf32>
    %55 = tpu.matmul %52, %54, %cst_30 {dimension_numbers = #tpu.dot_dimension_numbers<[1], [0], [0], [1], [0, 0, 1, 1], [], []>} : vector<288x128xbf16>, vector<128x128xbf16>, vector<288x128xf32> -> vector<288x128xf32>
    %56 = arith.addf %50, %55 : vector<288x128xf32>
    %c24_31 = arith.constant 24 : index
    %c0_32 = arith.constant 0 : index
    %57 = vector.load %arg6[%c24_31, %c0_32] : memref<336x128xf32, #tpu.memory_space<vmem>>, vector<288x128xf32>
    %58 = arith.truncf %57 : vector<288x128xf32> to vector<288x128xbf16>
    %c4 = arith.constant 4 : index
    %c0_33 = arith.constant 0 : index
    %c0_34 = arith.constant 0 : index
    %59 = vector.load %arg3[%c4, %c0_33, %c0_34] : memref<9x128x128xbf16, #tpu.memory_space<vmem>>, vector<1x128x128xbf16>
    %60 = vector.shape_cast %59 : vector<1x128x128xbf16> to vector<128x128xbf16>
    %cst_35 = arith.constant dense<0.000000e+00> : vector<288x128xf32>
    %61 = tpu.matmul %58, %60, %cst_35 {dimension_numbers = #tpu.dot_dimension_numbers<[1], [0], [0], [1], [0, 0, 1, 1], [], []>} : vector<288x128xbf16>, vector<128x128xbf16>, vector<288x128xf32> -> vector<288x128xf32>
    %62 = arith.addf %56, %61 : vector<288x128xf32>
    %c25 = arith.constant 25 : index
    %c0_36 = arith.constant 0 : index
    %63 = vector.load %arg6[%c25, %c0_36] : memref<336x128xf32, #tpu.memory_space<vmem>>, vector<288x128xf32>
    %64 = arith.truncf %63 : vector<288x128xf32> to vector<288x128xbf16>
    %c5_37 = arith.constant 5 : index
    %c0_38 = arith.constant 0 : index
    %c0_39 = arith.constant 0 : index
    %65 = vector.load %arg3[%c5_37, %c0_38, %c0_39] : memref<9x128x128xbf16, #tpu.memory_space<vmem>>, vector<1x128x128xbf16>
    %66 = vector.shape_cast %65 : vector<1x128x128xbf16> to vector<128x128xbf16>
    %cst_40 = arith.constant dense<0.000000e+00> : vector<288x128xf32>
    %67 = tpu.matmul %64, %66, %cst_40 {dimension_numbers = #tpu.dot_dimension_numbers<[1], [0], [0], [1], [0, 0, 1, 1], [], []>} : vector<288x128xbf16>, vector<128x128xbf16>, vector<288x128xf32> -> vector<288x128xf32>
    %68 = arith.addf %62, %67 : vector<288x128xf32>
    %c41 = arith.constant 41 : index
    %c0_41 = arith.constant 0 : index
    %69 = vector.load %arg6[%c41, %c0_41] : memref<336x128xf32, #tpu.memory_space<vmem>>, vector<288x128xf32>
    %70 = arith.truncf %69 : vector<288x128xf32> to vector<288x128xbf16>
    %c6_42 = arith.constant 6 : index
    %c0_43 = arith.constant 0 : index
    %c0_44 = arith.constant 0 : index
    %71 = vector.load %arg3[%c6_42, %c0_43, %c0_44] : memref<9x128x128xbf16, #tpu.memory_space<vmem>>, vector<1x128x128xbf16>
    %72 = vector.shape_cast %71 : vector<1x128x128xbf16> to vector<128x128xbf16>
    %cst_45 = arith.constant dense<0.000000e+00> : vector<288x128xf32>
    %73 = tpu.matmul %70, %72, %cst_45 {dimension_numbers = #tpu.dot_dimension_numbers<[1], [0], [0], [1], [0, 0, 1, 1], [], []>} : vector<288x128xbf16>, vector<128x128xbf16>, vector<288x128xf32> -> vector<288x128xf32>
    %74 = arith.addf %68, %73 : vector<288x128xf32>
    %c42 = arith.constant 42 : index
    %c0_46 = arith.constant 0 : index
    %75 = vector.load %arg6[%c42, %c0_46] : memref<336x128xf32, #tpu.memory_space<vmem>>, vector<288x128xf32>
    %76 = arith.truncf %75 : vector<288x128xf32> to vector<288x128xbf16>
    %c7_47 = arith.constant 7 : index
    %c0_48 = arith.constant 0 : index
    %c0_49 = arith.constant 0 : index
    %77 = vector.load %arg3[%c7_47, %c0_48, %c0_49] : memref<9x128x128xbf16, #tpu.memory_space<vmem>>, vector<1x128x128xbf16>
    %78 = vector.shape_cast %77 : vector<1x128x128xbf16> to vector<128x128xbf16>
    %cst_50 = arith.constant dense<0.000000e+00> : vector<288x128xf32>
    %79 = tpu.matmul %76, %78, %cst_50 {dimension_numbers = #tpu.dot_dimension_numbers<[1], [0], [0], [1], [0, 0, 1, 1], [], []>} : vector<288x128xbf16>, vector<128x128xbf16>, vector<288x128xf32> -> vector<288x128xf32>
    %80 = arith.addf %74, %79 : vector<288x128xf32>
    %c43 = arith.constant 43 : index
    %c0_51 = arith.constant 0 : index
    %81 = vector.load %arg6[%c43, %c0_51] : memref<336x128xf32, #tpu.memory_space<vmem>>, vector<288x128xf32>
    %82 = arith.truncf %81 : vector<288x128xf32> to vector<288x128xbf16>
    %c8 = arith.constant 8 : index
    %c0_52 = arith.constant 0 : index
    %c0_53 = arith.constant 0 : index
    %83 = vector.load %arg3[%c8, %c0_52, %c0_53] : memref<9x128x128xbf16, #tpu.memory_space<vmem>>, vector<1x128x128xbf16>
    %84 = vector.shape_cast %83 : vector<1x128x128xbf16> to vector<128x128xbf16>
    %cst_54 = arith.constant dense<0.000000e+00> : vector<288x128xf32>
    %85 = tpu.matmul %82, %84, %cst_54 {dimension_numbers = #tpu.dot_dimension_numbers<[1], [0], [0], [1], [0, 0, 1, 1], [], []>} : vector<288x128xbf16>, vector<128x128xbf16>, vector<288x128xf32> -> vector<288x128xf32>
    %86 = arith.addf %80, %85 : vector<288x128xf32>
    %cst_55 = arith.constant 0.000000e+00 : f32
    %87 = vector.broadcast %cst_55 : f32 to vector<288x128xf32>
    %88 = arith.maximumf %86, %87 : vector<288x128xf32>
    %89 = vector.broadcast %24 : vector<288x1xf32> to vector<288x128xf32>
    %90 = arith.mulf %88, %89 : vector<288x128xf32>
    %c24_56 = arith.constant 24 : index
    %c0_57 = arith.constant 0 : index
    %91 = vector.load %arg6[%c24_56, %c0_57] : memref<336x128xf32, #tpu.memory_space<vmem>>, vector<288x128xf32>
    tpu.vector_store %arg6[%c24_56, %c0_57], %90 {strides = array<i32>} : memref<336x128xf32, #tpu.memory_space<vmem>>, vector<288x128xf32>,
    %cst_58 = arith.constant 0.000000e+00 : f32
    %92 = vector.broadcast %cst_58 : f32 to vector<288x128xf32>
    %c5_59 = arith.constant 5 : index
    %c0_60 = arith.constant 0 : index
    %93 = vector.load %arg6[%c5_59, %c0_60] : memref<336x128xf32, #tpu.memory_space<vmem>>, vector<288x128xf32>
    %94 = arith.truncf %93 : vector<288x128xf32> to vector<288x128xbf16>
    %c0_61 = arith.constant 0 : index
    %c0_62 = arith.constant 0 : index
    %c0_63 = arith.constant 0 : index
    %95 = vector.load %arg4[%c0_61, %c0_62, %c0_63] : memref<9x128x128xbf16, #tpu.memory_space<vmem>>, vector<1x128x128xbf16>
    %96 = vector.shape_cast %95 : vector<1x128x128xbf16> to vector<128x128xbf16>
    %cst_64 = arith.constant dense<0.000000e+00> : vector<288x128xf32>
    %97 = tpu.matmul %94, %96, %cst_64 {dimension_numbers = #tpu.dot_dimension_numbers<[1], [0], [0], [1], [0, 0, 1, 1], [], []>} : vector<288x128xbf16>, vector<128x128xbf16>, vector<288x128xf32> -> vector<288x128xf32>
    %98 = arith.addf %92, %97 : vector<288x128xf32>
    %c6_65 = arith.constant 6 : index
    %c0_66 = arith.constant 0 : index
    %99 = vector.load %arg6[%c6_65, %c0_66] : memref<336x128xf32, #tpu.memory_space<vmem>>, vector<288x128xf32>
    %100 = arith.truncf %99 : vector<288x128xf32> to vector<288x128xbf16>
    %c1_67 = arith.constant 1 : index
    %c0_68 = arith.constant 0 : index
    %c0_69 = arith.constant 0 : index
    %101 = vector.load %arg4[%c1_67, %c0_68, %c0_69] : memref<9x128x128xbf16, #tpu.memory_space<vmem>>, vector<1x128x128xbf16>
    %102 = vector.shape_cast %101 : vector<1x128x128xbf16> to vector<128x128xbf16>
    %cst_70 = arith.constant dense<0.000000e+00> : vector<288x128xf32>
    %103 = tpu.matmul %100, %102, %cst_70 {dimension_numbers = #tpu.dot_dimension_numbers<[1], [0], [0], [1], [0, 0, 1, 1], [], []>} : vector<288x128xbf16>, vector<128x128xbf16>, vector<288x128xf32> -> vector<288x128xf32>
    %104 = arith.addf %98, %103 : vector<288x128xf32>
    %c7_71 = arith.constant 7 : index
    %c0_72 = arith.constant 0 : index
    %105 = vector.load %arg6[%c7_71, %c0_72] : memref<336x128xf32, #tpu.memory_space<vmem>>, vector<288x128xf32>
    %106 = arith.truncf %105 : vector<288x128xf32> to vector<288x128xbf16>
    %c2_73 = arith.constant 2 : index
    %c0_74 = arith.constant 0 : index
    %c0_75 = arith.constant 0 : index
    %107 = vector.load %arg4[%c2_73, %c0_74, %c0_75] : memref<9x128x128xbf16, #tpu.memory_space<vmem>>, vector<1x128x128xbf16>
    %108 = vector.shape_cast %107 : vector<1x128x128xbf16> to vector<128x128xbf16>
    %cst_76 = arith.constant dense<0.000000e+00> : vector<288x128xf32>
    %109 = tpu.matmul %106, %108, %cst_76 {dimension_numbers = #tpu.dot_dimension_numbers<[1], [0], [0], [1], [0, 0, 1, 1], [], []>} : vector<288x128xbf16>, vector<128x128xbf16>, vector<288x128xf32> -> vector<288x128xf32>
    %110 = arith.addf %104, %109 : vector<288x128xf32>
    %c23_77 = arith.constant 23 : index
    %c0_78 = arith.constant 0 : index
    %111 = vector.load %arg6[%c23_77, %c0_78] : memref<336x128xf32, #tpu.memory_space<vmem>>, vector<288x128xf32>
    %112 = arith.truncf %111 : vector<288x128xf32> to vector<288x128xbf16>
    %c3_79 = arith.constant 3 : index
    %c0_80 = arith.constant 0 : index
    %c0_81 = arith.constant 0 : index
    %113 = vector.load %arg4[%c3_79, %c0_80, %c0_81] : memref<9x128x128xbf16, #tpu.memory_space<vmem>>, vector<1x128x128xbf16>
    %114 = vector.shape_cast %113 : vector<1x128x128xbf16> to vector<128x128xbf16>
    %cst_82 = arith.constant dense<0.000000e+00> : vector<288x128xf32>
    %115 = tpu.matmul %112, %114, %cst_82 {dimension_numbers = #tpu.dot_dimension_numbers<[1], [0], [0], [1], [0, 0, 1, 1], [], []>} : vector<288x128xbf16>, vector<128x128xbf16>, vector<288x128xf32> -> vector<288x128xf32>
    %116 = arith.addf %110, %115 : vector<288x128xf32>
    %c24_83 = arith.constant 24 : index
    %c0_84 = arith.constant 0 : index
    %117 = vector.load %arg6[%c24_83, %c0_84] : memref<336x128xf32, #tpu.memory_space<vmem>>, vector<288x128xf32>
    %118 = arith.truncf %117 : vector<288x128xf32> to vector<288x128xbf16>
    %c4_85 = arith.constant 4 : index
    %c0_86 = arith.constant 0 : index
    %c0_87 = arith.constant 0 : index
    %119 = vector.load %arg4[%c4_85, %c0_86, %c0_87] : memref<9x128x128xbf16, #tpu.memory_space<vmem>>, vector<1x128x128xbf16>
    %120 = vector.shape_cast %119 : vector<1x128x128xbf16> to vector<128x128xbf16>
    %cst_88 = arith.constant dense<0.000000e+00> : vector<288x128xf32>
    %121 = tpu.matmul %118, %120, %cst_88 {dimension_numbers = #tpu.dot_dimension_numbers<[1], [0], [0], [1], [0, 0, 1, 1], [], []>} : vector<288x128xbf16>, vector<128x128xbf16>, vector<288x128xf32> -> vector<288x128xf32>
    %122 = arith.addf %116, %121 : vector<288x128xf32>
    %c25_89 = arith.constant 25 : index
    %c0_90 = arith.constant 0 : index
    %123 = vector.load %arg6[%c25_89, %c0_90] : memref<336x128xf32, #tpu.memory_space<vmem>>, vector<288x128xf32>
    %124 = arith.truncf %123 : vector<288x128xf32> to vector<288x128xbf16>
    %c5_91 = arith.constant 5 : index
    %c0_92 = arith.constant 0 : index
    %c0_93 = arith.constant 0 : index
    %125 = vector.load %arg4[%c5_91, %c0_92, %c0_93] : memref<9x128x128xbf16, #tpu.memory_space<vmem>>, vector<1x128x128xbf16>
    %126 = vector.shape_cast %125 : vector<1x128x128xbf16> to vector<128x128xbf16>
    %cst_94 = arith.constant dense<0.000000e+00> : vector<288x128xf32>
    %127 = tpu.matmul %124, %126, %cst_94 {dimension_numbers = #tpu.dot_dimension_numbers<[1], [0], [0], [1], [0, 0, 1, 1], [], []>} : vector<288x128xbf16>, vector<128x128xbf16>, vector<288x128xf32> -> vector<288x128xf32>
    %128 = arith.addf %122, %127 : vector<288x128xf32>
    %c41_95 = arith.constant 41 : index
    %c0_96 = arith.constant 0 : index
    %129 = vector.load %arg6[%c41_95, %c0_96] : memref<336x128xf32, #tpu.memory_space<vmem>>, vector<288x128xf32>
    %130 = arith.truncf %129 : vector<288x128xf32> to vector<288x128xbf16>
    %c6_97 = arith.constant 6 : index
    %c0_98 = arith.constant 0 : index
    %c0_99 = arith.constant 0 : index
    %131 = vector.load %arg4[%c6_97, %c0_98, %c0_99] : memref<9x128x128xbf16, #tpu.memory_space<vmem>>, vector<1x128x128xbf16>
    %132 = vector.shape_cast %131 : vector<1x128x128xbf16> to vector<128x128xbf16>
    %cst_100 = arith.constant dense<0.000000e+00> : vector<288x128xf32>
    %133 = tpu.matmul %130, %132, %cst_100 {dimension_numbers = #tpu.dot_dimension_numbers<[1], [0], [0], [1], [0, 0, 1, 1], [], []>} : vector<288x128xbf16>, vector<128x128xbf16>, vector<288x128xf32> -> vector<288x128xf32>
    %134 = arith.addf %128, %133 : vector<288x128xf32>
    %c42_101 = arith.constant 42 : index
    %c0_102 = arith.constant 0 : index
    %135 = vector.load %arg6[%c42_101, %c0_102] : memref<336x128xf32, #tpu.memory_space<vmem>>, vector<288x128xf32>
    %136 = arith.truncf %135 : vector<288x128xf32> to vector<288x128xbf16>
    %c7_103 = arith.constant 7 : index
    %c0_104 = arith.constant 0 : index
    %c0_105 = arith.constant 0 : index
    %137 = vector.load %arg4[%c7_103, %c0_104, %c0_105] : memref<9x128x128xbf16, #tpu.memory_space<vmem>>, vector<1x128x128xbf16>
    %138 = vector.shape_cast %137 : vector<1x128x128xbf16> to vector<128x128xbf16>
    %cst_106 = arith.constant dense<0.000000e+00> : vector<288x128xf32>
    %139 = tpu.matmul %136, %138, %cst_106 {dimension_numbers = #tpu.dot_dimension_numbers<[1], [0], [0], [1], [0, 0, 1, 1], [], []>} : vector<288x128xbf16>, vector<128x128xbf16>, vector<288x128xf32> -> vector<288x128xf32>
    %140 = arith.addf %134, %139 : vector<288x128xf32>
    %c43_107 = arith.constant 43 : index
    %c0_108 = arith.constant 0 : index
    %141 = vector.load %arg6[%c43_107, %c0_108] : memref<336x128xf32, #tpu.memory_space<vmem>>, vector<288x128xf32>
    %142 = arith.truncf %141 : vector<288x128xf32> to vector<288x128xbf16>
    %c8_109 = arith.constant 8 : index
    %c0_110 = arith.constant 0 : index
    %c0_111 = arith.constant 0 : index
    %143 = vector.load %arg4[%c8_109, %c0_110, %c0_111] : memref<9x128x128xbf16, #tpu.memory_space<vmem>>, vector<1x128x128xbf16>
    %144 = vector.shape_cast %143 : vector<1x128x128xbf16> to vector<128x128xbf16>
    %cst_112 = arith.constant dense<0.000000e+00> : vector<288x128xf32>
    %145 = tpu.matmul %142, %144, %cst_112 {dimension_numbers = #tpu.dot_dimension_numbers<[1], [0], [0], [1], [0, 0, 1, 1], [], []>} : vector<288x128xbf16>, vector<128x128xbf16>, vector<288x128xf32> -> vector<288x128xf32>
    %146 = arith.addf %140, %145 : vector<288x128xf32>
    %147 = arith.addf %28, %146 : vector<288x128xf32>
    %cst_113 = arith.constant 0.000000e+00 : f32
    %148 = vector.broadcast %cst_113 : f32 to vector<288x128xf32>
    %149 = arith.maximumf %147, %148 : vector<288x128xf32>
    %c0_114 = arith.constant 0 : index
    %c0_115 = arith.constant 0 : index
    %c0_116 = arith.constant 0 : index
    %150 = vector.load %arg5[%c0_114, %c0_115, %c0_116] : memref<1x288x128xf32, #tpu.memory_space<vmem>>, vector<1x288x128xf32>
    %151 = vector.shape_cast %150 : vector<1x288x128xf32> to vector<288x128xf32>
    %152 = vector.shape_cast %149 : vector<288x128xf32> to vector<1x288x128xf32>
    tpu.vector_store %arg5[%c0_114, %c0_115, %c0_116], %152 {strides = array<i32>} : memref<1x288x128xf32, #tpu.memory_space<vmem>>, vector<1x288x128xf32>,
    return
  }
  func.func @transform_0(%arg0: i32) -> (i32, i32, i32) {
    %c0_i32 = arith.constant 0 : i32
    %c0_i32_0 = arith.constant 0 : i32
    %c0_i32_1 = arith.constant 0 : i32
    return %arg0, %c0_i32, %c0_i32_0 : i32, i32, i32
  }
  func.func @transform_1(%arg0: i32) -> (i32, i32) {
    %c0_i32 = arith.constant 0 : i32
    %c0_i32_0 = arith.constant 0 : i32
    %c0_i32_1 = arith.constant 0 : i32
    return %c0_i32, %c0_i32_0 : i32, i32
  }
  func.func @transform_2(%arg0: i32) -> (i32, i32, i32) {
    %c0_i32 = arith.constant 0 : i32
    %c0_i32_0 = arith.constant 0 : i32
    %c0_i32_1 = arith.constant 0 : i32
    %c0_i32_2 = arith.constant 0 : i32
    return %c0_i32, %c0_i32_0, %c0_i32_1 : i32, i32, i32
  }
  func.func @transform_3(%arg0: i32) -> (i32, i32, i32) {
    %c0_i32 = arith.constant 0 : i32
    %c0_i32_0 = arith.constant 0 : i32
    %c0_i32_1 = arith.constant 0 : i32
    %c0_i32_2 = arith.constant 0 : i32
    return %c0_i32, %c0_i32_0, %c0_i32_1 : i32, i32, i32
  }
  func.func @transform_4(%arg0: i32) -> (i32, i32, i32) {
    %c0_i32 = arith.constant 0 : i32
    %c0_i32_0 = arith.constant 0 : i32
    %c0_i32_1 = arith.constant 0 : i32
    return %arg0, %c0_i32, %c0_i32_0 : i32, i32, i32
  }
}

</mosaic_0001>

<bundles_post_ra>
// kernel: tri_feat_input.1
= control target key start
LH: loop header
LB: loop body
LE: loop exit
PB: predicated region body
PF: predicated region fallthrough
CT: control target
= control target key end

     0   :  { %s10325_s15 = smov 0   ;;  %s12411_s0 = inlined_call_operand.vmem [shape: f32[2,288,12], index: 0, kind: input, shape index: {}]   ;;  %s12412_s1 = inlined_call_operand.vmem [shape: f32[12,128], index: 1, kind: input, shape index: {}]   ;;  %s12413_s2 = inlined_call_operand.vmem [shape: bf16[9,128,128], index: 2, kind: input, shape index: {}]   ;;  %s12414_s3 = inlined_call_operand.vmem [shape: bf16[9,128,128], index: 3, kind: input, shape index: {}]   ;;  %s12415_s4 = inlined_call_operand.vmem [shape: f32[2,288,128], index: 4, kind: output, shape index: {}]  }
   0x1 LB: > { %s7495_s16 = sadd.s32 4294967295, %s10296_s15   ;;  %p7499_p0 = scmp.ge.s32.totalorder %s10296_s15, 1  ;;  %s10296_s15 = sphi %s10325_s15, %s14_s15  }
   0x2   : > { %p162_p1 = scmp.lt.s32.totalorder %s10296_s15, 3 }
   0x4   : > { %p163_p2 = pnand %p7499_p0, %p162_p1 }
   0x6   : > { %166 = sbr.rel (%p163_p2) target bundleno = 1913 (0x779), region = 36 }
   0xd   : > { %v962_v0 = vld [vmem:[%s12412_s1] sm:$0xff]  ;;  %v963_v1 = vld [vmem:[%s12412_s1 + $0x8] sm:$0xf]  ;;  %vm1073_vm0 = vcmask 1043456   ;;  %p188_p3 = scmp.lt.s32.totalorder %s7495_s16, 1  ;;  %vm10298_vm1 = vmmov 1   ;;  %v205_v52 = vlaneseq }
   0xe   : > { %v9477_v2 = vpack.c.bf16 %v963_v1, %v962_v0  ;;  %vm9478_vm2 = vmpackc.low %vm1073_vm0, %vm10298_vm1  ;;  %v10144_v3 = vld [vmem:[%s12413_s2 + $0x40] sm:$0xff]   ;;  %v10299_v4 = vmov 0.0   ;;  %vm964_vm3 = vcmask 97280   ;;  %v10145_v11 = vld [vmem:[%s12413_s2 + $0x48] sm:$0xff]  }
   0xf   : > { %s12678_s16 = smov (!%p188_p3, %s7495_s16), 1  ;;  %199 = vst [vmem:[#allocation2] sm:$0xff] %v10299_v4  ;;  %200 = vst [vmem:[#allocation2 + $0x8] sm:$0xff] %v10299_v4  ;;  %v10146_v18 = vld [vmem:[%s12413_s2 + $0x50] sm:$0xff]   ;;  %v10147_v22 = vld [vmem:[%s12413_s2 + $0x58] sm:$0xff]   ;;  %v10454_v53 = vshrl.u32 %v205_v52, 7 }
  0x10   : > { %201 = vst [vmem:[#allocation2 + $0x10] sm:$0xff] %v10299_v4  ;;  %202 = vst [vmem:[#allocation2 + $0x138] sm:$0xff] %v10299_v4  ;;  %9479 = vmatprep.subr.msk.bf16.mxu0 %vm9478_vm2, %v9477_v2  ;;  %9483 = vmatprep.subr.msk.bf16.mxu1 %vm9478_vm2, %v9477_v2  ;;  %s10061_s23 = smul.u32 288, %s12678_s16  ;;  %v10148_v28 = vld [vmem:[%s12413_s2 + $0x60] sm:$0xff]   ;;  %v10149_v45 = vld [vmem:[%s12413_s2 + $0x68] sm:$0xff]  }
  0x11   : > { %203 = vst [vmem:[#allocation2 + $0x140] sm:$0xff] %v10299_v4  ;;  %204 = vst [vmem:[#allocation2 + $0x148] sm:$0xff] %v10299_v4  ;;  %9482 = vmatpush3.bf16.msk.msra.mxu0 %vm9478_vm2, %v9477_v2  ;;  %9484 = vmatpush3.bf16.msk.msra.mxu1 %vm9478_vm2, %v9477_v2  ;;  %v10150_v46 = vld [vmem:[%s12413_s2 + $0x70] sm:$0xff]   ;;  %v10151_v47 = vld [vmem:[%s12413_s2 + $0x78] sm:$0xff]   ;;  %v207_v54 = vadd.s32 8, %v10454_v53  ;;  %v209_v59 = vadd.s32 24, %v10454_v53 }
  0x12   : > { %8541 = vmatprep.subr.bf16.mxu1 %v10144_v3  ;;  %s10356_s26 = scalar_lea.vmem %s12411_s0, %s10061_s23  ;;  %v10152_v51 = vld [vmem:[%s12413_s2] sm:$0xff]   ;;  %v10461_v57 = vmul.u32.u64.low 3817748708, %v10454_v53  ;;  %v10462_v58 = vmul.u32.u64.high 3817748708, %v10454_v53, %v10461_v57  ;;  %v208_v60 = vadd.s32 16, %v10454_v53  ;;  %v211_v62 = vadd.s32 40, %v10454_v53  ;;  %s12335_s17 = scalar_lea.vmem %s12415_s4, %s10061_s23 }
  0x13   : > { %v926_v5 = vld [vmem:[%s10356_s26] sm:$0xff]  ;;  %v927_v6 = vld [vmem:[%s10356_s26 + $0x8] sm:$0xff]  ;;  %v928_v7 = vld [vmem:[%s10356_s26 + $0x10] sm:$0xff]  ;;  %v10457_v55 = vmul.u32.u64.low 3817748708, %v207_v54  ;;  %v10458_v56 = vmul.u32.u64.high 3817748708, %v207_v54, %v10457_v55  ;;  %v10552_v57 = vadd.s32 104, %v10454_v53 }
  0x14   : > { %8487 = vmatprep.mubr.msk.f32.mxu0 %vm964_vm3, %v926_v5  ;;  %v929_v8 = vld [vmem:[%s10356_s26 + $0x18] sm:$0xff]  ;;  %v930_v9 = vld [vmem:[%s10356_s26 + $0x20] sm:$0xff]  ;;  %v944_v10 = vld [vmem:[%s10356_s26 + $0x90] sm:$0xff]  ;;  %v248_v63 = vshrl.u32 %v10462_v58, 4  ;;  %v10469_v0 = vmul.u32.u64.low 3817748708, %v209_v59  ;;  %v10470_v1 = vmul.u32.u64.high 3817748708, %v209_v59, %v10469_v0 }
  0x15   : > { %8488 = vmatmul.mubr.msk.f32.vlgmr.msra.gmra.mrb[0].mxu0 %vm964_vm3, %v927_v6  ;;  %8514 = vmatprep.mubr.msk.f32.mxu1 %vm964_vm3, %v944_v10  ;;  %v945_v12 = vld [vmem:[%s10356_s26 + $0x98] sm:$0xff]  ;;  %v946_v13 = vld [vmem:[%s10356_s26 + $0xa0] sm:$0xff]  ;;  %v931_v14 = vld [vmem:[%s10356_s26 + $0x28] sm:$0xff]  ;;  %v259_v61 = vshrl.u32 %v10458_v56, 4  ;;  %v210_v5 = vadd.s32 32, %v10454_v53 }
  0x16   : > { %8490 = vmatprep.mubr.msk.f32.mxu0 %vm964_vm3, %v928_v7  ;;  %8515 = vmatmul.mubr.msk.f32.vlgmr.msra.gmra.mrb[0].mxu1 %vm964_vm3, %v945_v12  ;;  %v932_v15 = vld [vmem:[%s10356_s26 + $0x30] sm:$0xff]  ;;  %v947_v16 = vld [vmem:[%s10356_s26 + $0xa8] sm:$0xff]  ;;  %v933_v19 = vld [vmem:[%s10356_s26 + $0x38] sm:$0xff]  ;;  %v249_v10 = vmul.u32 18, %v248_v63 }
  0x17   : > { %8517 = vmatprep.mubr.msk.f32.mxu1 %vm964_vm3, %v946_v13  ;;  %8542 = vmatpush3.bf16.msra.mxu1 %v10144_v3  ;;  %v948_v17 = vld [vmem:[%s10356_s26 + $0xb0] sm:$0xff]  ;;  %v934_v20 = vld [vmem:[%s10356_s26 + $0x40] sm:$0xff]  ;;  %v949_v21 = vld [vmem:[%s10356_s26 + $0xb8] sm:$0xff]  ;;  %v10472_v2 = vmul.u32.u64.low 3817748708, %v208_v60  ;;  %v10473_v3 = vmul.u32.u64.high 3817748708, %v208_v60, %v10472_v2  ;;  %v260_v6 = vmul.u32 18, %v259_v61 }
  0x18   : > { %8543 = vmatprep.subr.bf16.mxu1 %v10145_v11  ;;  %v950_v23 = vld [vmem:[%s10356_s26 + $0xc0] sm:$0xff]  ;;  %v935_v24 = vld [vmem:[%s10356_s26 + $0x48] sm:$0xff]  ;;  %v936_v25 = vld [vmem:[%s10356_s26 + $0x50] sm:$0xff] }
  0x19   : > { %8491 = vmatmul.mubr.msk.f32.gmra.mrb[2].mxu0 %vm964_vm3, %v929_v8  ;;  %v951_v26 = vld [vmem:[%s10356_s26 + $0xc8] sm:$0xff]  ;;  %v952_v27 = vld [vmem:[%s10356_s26 + $0xd0] sm:$0xff]  ;;  %v937_v29 = vld [vmem:[%s10356_s26 + $0x58] sm:$0xff]  ;;  %v10476_v7 = vmul.u32.u64.low 3817748708, %v211_v62  ;;  %v10477_v8 = vmul.u32.u64.high 3817748708, %v211_v62, %v10476_v7  ;;  %v261_v13 = vsub.s32 %v207_v54, %v260_v6 }
  0x1a   : > { %8493 = vmatprep.mubr.msk.f32.mxu0 %vm964_vm3, %v930_v9  ;;  %8518 = vmatmul.mubr.msk.f32.gmra.mrb[2].mxu1 %vm964_vm3, %v947_v16  ;;  %v938_v30 = vld [vmem:[%s10356_s26 + $0x60] sm:$0xff]  ;;  %v953_v31 = vld [vmem:[%s10356_s26 + $0xd8] sm:$0xff]  ;;  %v939_v33 = vld [vmem:[%s10356_s26 + $0x68] sm:$0xff]  ;;  %v213_v9 = vadd.s32 56, %v10454_v53  ;;  %v250_v16 = vsub.s32 %v10454_v53, %v249_v10 }
  0x1b   : > { %8520 = vmatprep.mubr.msk.f32.mxu1 %vm964_vm3, %v948_v17  ;;  %8544 = vmatpush3.bf16.msra.mxu1 %v10145_v11  ;;  %v954_v32 = vld [vmem:[%s10356_s26 + $0xe0] sm:$0xff]  ;;  %v940_v34 = vld [vmem:[%s10356_s26 + $0x70] sm:$0xff]  ;;  %v955_v35 = vld [vmem:[%s10356_s26 + $0xe8] sm:$0xff]  ;;  %v10480_v11 = vmul.u32.u64.low 3817748708, %v210_v5  ;;  %v10481_v12 = vmul.u32.u64.high 3817748708, %v210_v5, %v10480_v11  ;;  %v281_v17 = vshrl.u32 %v10470_v1, 4 }
  0x1c   : > { %8545 = vmatprep.subr.bf16.mxu1 %v10146_v18  ;;  %v956_v36 = vld [vmem:[%s10356_s26 + $0xf0] sm:$0xff]  ;;  %v941_v37 = vld [vmem:[%s10356_s26 + $0x78] sm:$0xff]  ;;  %v942_v38 = vld [vmem:[%s10356_s26 + $0x80] sm:$0xff]  ;;  %vm639_vm4 = vcmp.ne.s32.totalorder %v261_v13, 0  ;;  %vm675_vm5 = vcmp.lt.s32.totalorder %v261_v13, 0  ;;  %vm638_vm6 = vcmp.ne.s32.totalorder %v250_v16, 0 }
  0x1d   : > { %8494 = vmatmul.mubr.msk.f32.gmra.mrb[4].mxu0 %vm964_vm3, %v931_v14  ;;  %v957_v39 = vld [vmem:[%s10356_s26 + $0xf8] sm:$0xff]  ;;  %v958_v40 = vld [vmem:[%s10356_s26 + $0x100] sm:$0xff]  ;;  %v943_v41 = vld [vmem:[%s10356_s26 + $0x88] sm:$0xff]  ;;  %vm674_vm7 = vcmp.lt.s32.totalorder %v250_v16, 0 }
  0x1e   : > { %8496 = vmatprep.mubr.msk.f32.mxu0 %vm964_vm3, %v932_v15  ;;  %8521 = vmatmul.mubr.msk.f32.gmra.mrb[4].mxu1 %vm964_vm3, %v949_v21  ;;  %v959_v42 = vld [vmem:[%s10356_s26 + $0x108] sm:$0xff]  ;;  %v960_v43 = vld [vmem:[%s10356_s26 + $0x110] sm:$0xff]  ;;  %v961_v44 = vld [vmem:[%s10356_s26 + $0x118] sm:$0xff]  ;;  %v10483_v14 = vmul.u32.u64.low 3817748708, %v213_v9  ;;  %v10484_v15 = vmul.u32.u64.high 3817748708, %v213_v9, %v10483_v14  ;;  %v303_v21 = vshrl.u32 %v10477_v8, 4 }
  0x1f   : > { %8523 = vmatprep.mubr.msk.f32.mxu1 %vm964_vm3, %v950_v23  ;;  %8546 = vmatpush3.bf16.msra.mxu1 %v10146_v18  ;;  %v1464_v48 = vld [vmem:[#allocation2 + $0x6] sm:$0xff]  ;;  %v1465_v49 = vld [vmem:[#allocation2 + $0xe] sm:$0xff]  ;;  %v10489_v18 = vadd.s32 48, %v10454_v53  ;;  %v747_v23 = vadd.s32 18, %v261_v13  ;;  %vm10503_vm8 = vmand %vm675_vm5, %vm639_vm4 }
  0x20   : > { %8547 = vmatprep.subr.bf16.mxu1 %v10147_v22  ;;  %v1500_v50 = vpack.c.bf16 %v1465_v49, %v1464_v48  ;;  %vm10512_vm9 = vmand %vm674_vm7, %vm638_vm6  ;;  %v10542_v49 = vadd.s32 80, %v10454_v53 }
  0x21   : > { %8497 = vmatmul.mubr.msk.f32.gmra.mrb[6].mxu0 %vm964_vm3, %v933_v19  ;;  %v10492_v19 = vadd.s32 72, %v10454_v53 }
  0x22   : > { %8499 = vmatprep.mubr.msk.f32.mxu0 %vm964_vm3, %v934_v20  ;;  %8524 = vmatmul.mubr.msk.f32.gmra.mrb[6].mxu1 %vm964_vm3, %v951_v26  ;;  %v270_v20 = vshrl.u32 %v10473_v3, 4  ;;  %v10575_v2 = vmul.u32.u64.low 3817748708, %v10552_v57  ;;  %v10576_v3 = vmul.u32.u64.high 3817748708, %v10552_v57, %v10575_v2 }
  0x23   : > { %8526 = vmatprep.mubr.msk.f32.mxu1 %vm964_vm3, %v952_v27  ;;  %8548 = vmatpush3.bf16.msra.mxu1 %v10147_v22  ;;  %v10497_v22 = vadd.s32 64, %v10454_v53 }
  0x24   : > { %8549 = vmatprep.subr.bf16.mxu1 %v10148_v28 }
  0x25   : > { %8500 = vmatmul.mubr.msk.f32.gmra.mrb[8].mxu0 %vm964_vm3, %v935_v24  ;;  %v282_v24 = vmul.u32 18, %v281_v17  ;;  %v10613_v17 = vadd.s32 120, %v10454_v53 }
  0x26   : > { %8502 = vmatprep.mubr.msk.f32.mxu0 %vm964_vm3, %v936_v25  ;;  %8527 = vmatmul.mubr.msk.f32.gmra.mrb[8].mxu1 %vm964_vm3, %v953_v31  ;;  %v10500_v25 = vmul.u32.u64.low 3817748708, %v10489_v18  ;;  %v10501_v26 = vmul.u32.u64.high 3817748708, %v10489_v18, %v10500_v25 }
  0x27   : > { %8529 = vmatprep.mubr.msk.f32.mxu1 %vm964_vm3, %v954_v32  ;;  %8550 = vmatpush3.bf16.msra.mxu1 %v10148_v28  ;;  %v746_v28 = vadd.s32 18, %v250_v16  ;;  %v10654_v32 = vadd.s32 152, %v10454_v53 }
  0x28   : > { %8551 = vmatprep.subr.bf16.mxu1 %v10149_v45  ;;  %v314_v48 = vshrl.u32 %v10501_v26, 4 }
  0x29   : > { %8503 = vmatmul.mubr.msk.f32.gmra.mrb[10].mxu0 %vm964_vm3, %v937_v29  ;;  %v292_v29 = vshrl.u32 %v10481_v12, 4 }
  0x2a   : > { %8505 = vmatprep.mubr.msk.f32.mxu0 %vm964_vm3, %v938_v30  ;;  %8530 = vmatmul.mubr.msk.f32.gmra.mrb[10].mxu1 %vm964_vm3, %v955_v35  ;;  %v10509_v30 = vmul.u32.u64.low 3817748708, %v10492_v19  ;;  %v10510_v31 = vmul.u32.u64.high 3817748708, %v10492_v19, %v10509_v30  ;;  %v325_v35 = vshrl.u32 %v10484_v15, 4  ;;  %v10774_v15 = vadd.s32 160, %v10454_v53 }
  0x2b   : > { %8532 = vmatprep.mubr.msk.f32.mxu1 %vm964_vm3, %v956_v36  ;;  %8552 = vmatpush3.bf16.msra.mxu1 %v10149_v45 }
  0x2c   : > { %8553 = vmatprep.subr.bf16.mxu1 %v10150_v46  ;;  %v347_v52 = vshrl.u32 %v10510_v31, 4  ;;  %v391_v31 = vshrl.u32 %v10576_v3, 4 }
  0x2d   : > { %8506 = vmatmul.mubr.msk.f32.gmra.mrb[12].mxu0 %vm964_vm3, %v939_v33  ;;  %v271_v33 = vmul.u32 18, %v270_v20 }
  0x2e   : > { %8508 = vmatprep.mubr.msk.f32.mxu0 %vm964_vm3, %v940_v34  ;;  %8533 = vmatmul.mubr.msk.f32.gmra.mrb[12].mxu1 %vm964_vm3, %v957_v39  ;;  %v304_v34 = vmul.u32 18, %v303_v21  ;;  %v283_v39 = vsub.s32 %v209_v59, %v282_v24  ;;  %v348_v0 = vmul.u32 18, %v347_v52 }
  0x2f   : > { %8535 = vmatprep.mubr.msk.f32.mxu1 %vm964_vm3, %v958_v40  ;;  %8554 = vmatpush3.bf16.msra.mxu1 %v10150_v46  ;;  %v782_v40 = vsel %vm10512_vm9, %v746_v28, %v250_v16  ;;  %v10532_v45 = vsub.s32 %v208_v60, %v271_v33  ;;  %v315_v60 = vmul.u32 18, %v314_v48  ;;  %v10656_v33 = vld [vmem:[#allocation2] sm:$0xff]  ;;  %v392_v48 = vmul.u32 18, %v391_v31 }
  0x30   : > { %8555 = vmatprep.subr.bf16.mxu1 %v10151_v47  ;;  %v10534_v46 = vsub.s32 %v211_v62, %v304_v34  ;;  %vm10536_vm11 = vcmp.lt.s32.totalorder %v782_v40, 16  ;;  %vm641_vm12 = vcmp.ne.s32.totalorder %v283_v39, 0  ;;  %vm677_vm13 = vcmp.lt.s32.totalorder %v283_v39, 0 }
  0x31   : > { %8509 = vmatmul.mubr.msk.f32.gmra.mrb[14].mxu0 %vm964_vm3, %v941_v37  ;;  %v10518_v36 = vmul.u32.u64.low 3817748708, %v10497_v22  ;;  %v10519_v37 = vmul.u32.u64.high 3817748708, %v10497_v22, %v10518_v36  ;;  %vm640_vm14 = vcmp.ne.s32.totalorder %v10532_v45, 0  ;;  %vm676_vm15 = vcmp.lt.s32.totalorder %v10532_v45, 0  ;;  %vm10558_vm1 = vmand %vm677_vm13, %vm641_vm12 }
  0x32   : > { %8511 = vmatprep.mubr.msk.f32.mxu0 %vm964_vm3, %v942_v38  ;;  %8536 = vmatmul.mubr.msk.f32.gmra.mrb[14].mxu1 %vm964_vm3, %v959_v42  ;;  %v783_v38 = vsel %vm10503_vm8, %v747_v23, %v261_v13  ;;  %v326_v42 = vmul.u32 18, %v325_v35  ;;  %vm643_vm0 = vcmp.ne.s32.totalorder %v10534_v46, 0  ;;  %vm679_vm2 = vcmp.lt.s32.totalorder %v10534_v46, 0  ;;  %vm10568_vm5 = vmand %vm676_vm15, %vm640_vm14 }
  0x33   : > { %8538 = vmatprep.mubr.msk.f32.mxu1 %vm964_vm3, %v960_v43  ;;  %8556 = vmatpush3.bf16.msra.mxu1 %v10151_v47  ;;  %v10526_v43 = vadd.s32 88, %v10454_v53  ;;  %vm10528_vm10 = vcmp.lt.s32.totalorder %v783_v38, 16  ;;  %v336_v58 = vshrl.u32 %v10519_v37, 4  ;;  %v748_v63 = vadd.s32 18, %v10532_v45  ;;  %vm10582_vm8 = vmand %vm679_vm2, %vm643_vm0 }
  0x34   : > { %8593 = vmatprep.subr.bf16.mxu1 %v10152_v51  ;;  %v10545_v54 = vsub.s32 %v213_v9, %v326_v42  ;;  %v10564_v61 = vmul.u32.u64.low 3817748708, %v10542_v49  ;;  %v10565_v62 = vmul.u32.u64.high 3817748708, %v10542_v49, %v10564_v61  ;;  %v751_v7 = vadd.s32 18, %v10534_v46 }
  0x35   : > { %8512 = vmatmul.mubr.msk.f32.gmra.mrb[16].mxu0 %vm964_vm3, %v943_v41  ;;  %v293_v41 = vmul.u32 18, %v292_v29  ;;  %v10548_v55 = vmul.u32.u64.low 3817748708, %v10526_v43  ;;  %v10549_v56 = vmul.u32.u64.high 3817748708, %v10526_v43, %v10548_v55  ;;  %v10588_v9 = vadd.s32 96, %v10454_v53 }
  0x36   : > { %8539 = vmatmul.mubr.msk.f32.gmra.mrb[16].mxu1 %vm964_vm3, %v961_v44  ;;  %vm645_vm6 = vcmp.ne.s32.totalorder %v10545_v54, 0  ;;  %vm681_vm7 = vcmp.lt.s32.totalorder %v10545_v54, 0  ;;  %v337_v8 = vmul.u32 18, %v336_v58  ;;  %v753_v12 = vadd.s32 18, %v10545_v54 }
  0x37   : > { %8557 = vmatprep.mubr.bf16.mxu1 %v1500_v50  ;;  %v749_v50 = vadd.s32 18, %v283_v39  ;;  %v294_v51 = vsub.s32 %v210_v5, %v293_v41  ;;  %v10596_v13 = vsub.s32 %v10489_v18, %v315_v60  ;;  %v10601_v14 = vsel %vm10528_vm10, 1.0, %v10299_v4  ;;  %vm10605_vm12 = vmand %vm681_vm7, %vm645_vm6 }
  0x38   : > { %v10610_v16 = vsub.s32 %v10492_v19, %v348_v0  ;;  %v10618_v18 = vsel %vm10536_vm11, 1.0, %v10299_v4  ;;  %v784_v21 = vsel %vm10568_vm5, %v748_v63, %v10532_v45  ;;  %v369_v23 = vshrl.u32 %v10549_v56, 4 }
  0x39   : > { %vm642_vm3 = vcmp.ne.s32.totalorder %v294_v51, 0  ;;  %vm678_vm4 = vcmp.lt.s32.totalorder %v294_v51, 0  ;;  %v785_v5 = vsel %vm10558_vm1, %v749_v50, %v283_v39  ;;  %v750_v11 = vadd.s32 18, %v294_v51 }
  0x3a   : > { %vm10590_vm9 = vmand %vm678_vm4, %vm642_vm3  ;;  %vm10620_vm13 = vcmp.lt.s32.totalorder %v785_v5, 16  ;;  %v787_v19 = vsel %vm10582_vm8, %v751_v7, %v10534_v46  ;;  %v10632_v24 = vsub.s32 %v10497_v22, %v337_v8  ;;  %v789_v27 = vsel %vm10605_vm12, %v753_v12, %v10545_v54 }
  0x3b   : > { %v10635_v4 = vmul.u32.u64.low 3817748708, %v10588_v9  ;;  %v10636_v25 = vmul.u32.u64.high 3817748708, %v10588_v9, %v10635_v4  ;;  %v786_v26 = vsel %vm10590_vm9, %v750_v11, %v294_v51  ;;  %vm644_vm10 = vcmp.ne.s32.totalorder %v10596_v13, 0 }
  0x3c   : > { %v358_v28 = vshrl.u32 %v10565_v62, 4  ;;  %vm680_vm11 = vcmp.lt.s32.totalorder %v10596_v13, 0  ;;  %vm647_vm14 = vcmp.ne.s32.totalorder %v10610_v16, 0  ;;  %vm683_vm15 = vcmp.lt.s32.totalorder %v10610_v16, 0 }
  0x3d   : > { %v10648_v22 = vmul.u32.u64.low 3817748708, %v10613_v17  ;;  %v10649_v29 = vmul.u32.u64.high 3817748708, %v10613_v17, %v10648_v22  ;;  %v370_v30 = vmul.u32 18, %v369_v23  ;;  %v10661_v34 = vsel %vm10620_vm13, 1.0, %v10656_v33  ;;  %vm10681_vm5 = vmand %vm680_vm11, %vm644_vm10 }
  0x3e   : > { %vm10663_vm0 = vcmp.lt.s32.totalorder %v784_v21, 16  ;;  %vm646_vm1 = vcmp.ne.s32.totalorder %v10632_v24, 0  ;;  %vm682_vm2 = vcmp.lt.s32.totalorder %v10632_v24, 0  ;;  %vm10669_vm3 = vcmp.lt.s32.totalorder %v787_v19, 16  ;;  %vm10690_vm7 = vmand %vm683_vm15, %vm647_vm14 }
  0x3f   : > { %vm10673_vm4 = vcmp.lt.s32.totalorder %v786_v26, 16  ;;  %v752_v39 = vadd.s32 18, %v10596_v13  ;;  %v359_v40 = vmul.u32 18, %v358_v28  ;;  %vm825_vm6 = vcmp.lt.s32.totalorder %v789_v27, 16  ;;  %vm10699_vm8 = vmand %vm682_vm2, %vm646_vm1 }
  0x40   : > { %v755_v42 = vadd.s32 18, %v10610_v16  ;;  %v754_v44 = vadd.s32 18, %v10632_v24  ;;  %v10697_v45 = vadd.s32 112, %v10454_v53  ;;  %v10704_v47 = vsub.s32 %v10526_v43, %v370_v30 }
  0x41   : > { %v10707_v50 = vmul.u32.u64.low 3817748708, %v10654_v32  ;;  %v10708_v51 = vmul.u32.u64.high 3817748708, %v10654_v32, %v10707_v50  ;;  %v10713_v52 = vsel %vm10663_vm0, 1.0, %v10656_v33  ;;  %v10718_v54 = vsel %vm10669_vm3, 1.0, %v10656_v33 }
  0x42   : > { %v380_v55 = vshrl.u32 %v10636_v25, 4  ;;  %v10722_v43 = vadd.s32 136, %v10454_v53  ;;  %v10727_v56 = vsel %vm10673_vm4, 1.0, %v10656_v33  ;;  %v10730_v58 = vsel %vm825_vm6, 1.0, %v10656_v33 }
  0x43   : > { %v788_v59 = vsel %vm10681_vm5, %v752_v39, %v10596_v13  ;;  %v10736_v60 = vsub.s32 %v10542_v49, %v359_v40  ;;  %v791_v61 = vsel %vm10690_vm7, %v755_v42, %v10610_v16  ;;  %v790_v62 = vsel %vm10699_vm8, %v754_v44, %v10632_v24 }
  0x44   : > { %v413_v63 = vshrl.u32 %v10649_v29, 4  ;;  %v10746_v0 = vadd.s32 144, %v10454_v53  ;;  %vm649_vm9 = vcmp.ne.s32.totalorder %v10704_v47, 0  ;;  %v393_v1 = vsub.s32 %v10552_v57, %v392_v48 }
  0x45   : > { %v10751_v49 = vmul.u32.u64.low 3817748708, %v10697_v45  ;;  %v10752_v2 = vmul.u32.u64.high 3817748708, %v10697_v45, %v10751_v49  ;;  %v381_v3 = vmul.u32 18, %v380_v55  ;;  %v10759_v7 = vadd.s32 128, %v10454_v53 }
  0x46   : > { %v10755_v5 = vmul.u32.u64.low 3817748708, %v10722_v43  ;;  %v10756_v6 = vmul.u32.u64.high 3817748708, %v10722_v43, %v10755_v5  ;;  %vm685_vm12 = vcmp.lt.s32.totalorder %v10704_v47, 0  ;;  %v757_v8 = vadd.s32 18, %v10704_v47 }
  0x47   : > { %vm648_vm13 = vcmp.ne.s32.totalorder %v10736_v60, 0  ;;  %vm684_vm10 = vcmp.lt.s32.totalorder %v10736_v60, 0  ;;  %v414_v57 = vmul.u32 18, %v413_v63  ;;  %v10770_v12 = vadd.s32 168, %v10454_v53  ;;  %vm10782_vm0 = vmand %vm685_vm12, %vm649_vm9 }
  0x48   : > { %v10766_v10 = vmul.u32.u64.low 3817748708, %v10746_v0  ;;  %v10767_v11 = vmul.u32.u64.high 3817748708, %v10746_v0, %v10766_v10  ;;  %vm651_vm11 = vcmp.ne.s32.totalorder %v393_v1, 0  ;;  %vm687_vm14 = vcmp.lt.s32.totalorder %v393_v1, 0  ;;  %vm10801_vm2 = vmand %vm684_vm10, %vm648_vm13 }
  0x49   : > { %v457_v13 = vshrl.u32 %v10708_v51, 4  ;;  %vm10776_vm15 = vcmp.lt.s32.totalorder %v788_v59, 16  ;;  %v10787_v21 = vsub.s32 %v10588_v9, %v381_v3  ;;  %vm10793_vm1 = vcmp.lt.s32.totalorder %v791_v61, 16  ;;  %vm10815_vm4 = vmand %vm687_vm14, %vm651_vm11 }
  0x4a   : > { %v10790_v23 = vmul.u32.u64.low 3817748708, %v10759_v7  ;;  %v10791_v19 = vmul.u32.u64.high 3817748708, %v10759_v7, %v10790_v23  ;;  %v756_v25 = vadd.s32 18, %v10736_v60  ;;  %v759_v9 = vadd.s32 18, %v393_v1 }
  0x4b   : > { %v10807_v26 = vadd.s32 184, %v10454_v53  ;;  %vm10809_vm3 = vcmp.lt.s32.totalorder %v790_v62, 16  ;;  %v415_v22 = vsub.s32 %v10613_v17, %v414_v57  ;;  %v793_v31 = vsel %vm10782_vm0, %v757_v8, %v10704_v47 }
  0x4c   : > { %v10821_v29 = vmul.u32.u64.low 3817748708, %v10770_v12  ;;  %v10822_v30 = vmul.u32.u64.high 3817748708, %v10770_v12, %v10821_v29  ;;  %v458_v35 = vmul.u32 18, %v457_v13  ;;  %vm650_vm5 = vcmp.ne.s32.totalorder %v10787_v21, 0 }
  0x4d   : > { %v10828_v36 = vmul.u32.u64.low 3817748708, %v10774_v15  ;;  %v10829_v37 = vmul.u32.u64.high 3817748708, %v10774_v15, %v10828_v36  ;;  %vm686_vm6 = vcmp.lt.s32.totalorder %v10787_v21, 0  ;;  %v402_v38 = vshrl.u32 %v10752_v2, 4 }
  0x4e   : > { %v435_v17 = vshrl.u32 %v10756_v6, 4  ;;  %v792_v39 = vsel %vm10801_vm2, %v756_v25, %v10736_v60  ;;  %v795_v40 = vsel %vm10815_vm4, %v759_v9, %v393_v1  ;;  %v758_v44 = vadd.s32 18, %v10787_v21  ;;  %vm10865_vm9 = vmand %vm686_vm6, %vm650_vm5 }
  0x4f   : > { %v10841_v41 = vmul.u32.u64.low 3817748708, %v10807_v26  ;;  %v10842_v42 = vmul.u32.u64.high 3817748708, %v10807_v26, %v10841_v41  ;;  %vm653_vm7 = vcmp.ne.s32.totalorder %v415_v22, 0  ;;  %vm689_vm8 = vcmp.lt.s32.totalorder %v415_v22, 0 }
  0x50   : > { %v446_v46 = vshrl.u32 %v10767_v11, 4  ;;  %v10849_v47 = vsel %vm10776_vm15, 1.0, %v10656_v33  ;;  %v10854_v48 = vsel %vm10793_vm1, 1.0, %v10656_v33  ;;  %v10859_v50 = vsel %vm10809_vm3, 1.0, %v10656_v33  ;;  %vm10885_vm11 = vmand %vm689_vm8, %vm653_vm7 }
  0x51   : > { %v459_v55 = vsub.s32 %v10654_v32, %v458_v35  ;;  %v761_v59 = vadd.s32 18, %v415_v22  ;;  %v403_v60 = vmul.u32 18, %v402_v38  ;;  %v436_v61 = vmul.u32 18, %v435_v17 }
  0x52   : > { %v424_v62 = vshrl.u32 %v10791_v19, 4  ;;  %vm10871_vm12 = vcmp.lt.s32.totalorder %v793_v31, 16  ;;  %vm10875_vm13 = vcmp.lt.s32.totalorder %v792_v39, 16  ;;  %vm10879_vm10 = vcmp.lt.s32.totalorder %v795_v40, 16 }
  0x53   : > { %v10890_v2 = vadd.s32 176, %v10454_v53  ;;  %v794_v3 = vsel %vm10865_vm9, %v758_v44, %v10787_v21  ;;  %v447_v5 = vmul.u32 18, %v446_v46  ;;  %v479_v6 = vshrl.u32 %v10822_v30, 4 }
  0x54   : > { %v10897_v8 = vadd.s32 200, %v10454_v53  ;;  %vm657_vm14 = vcmp.ne.s32.totalorder %v459_v55, 0  ;;  %vm693_vm15 = vcmp.lt.s32.totalorder %v459_v55, 0  ;;  %v468_v57 = vshrl.u32 %v10829_v37, 4 }
  0x55   : > { %v10901_v10 = vadd.s32 192, %v10454_v53  ;;  %v797_v11 = vsel %vm10885_vm11, %v761_v59, %v415_v22  ;;  %v10906_v13 = vsub.s32 %v10697_v45, %v403_v60  ;;  %v10909_v16 = vsub.s32 %v10722_v43, %v436_v61  ;;  %vm10916_vm0 = vmand %vm693_vm15, %vm657_vm14 }
  0x56   : > { %v425_v20 = vmul.u32 18, %v424_v62  ;;  %v765_v21 = vadd.s32 18, %v459_v55  ;;  %v501_v23 = vshrl.u32 %v10842_v42, 4  ;;  %v10921_v25 = vsub.s32 %v10746_v0, %v447_v5 }
  0x57   : > { %v10913_v19 = vmul.u32.u64.low 3817748708, %v10890_v2  ;;  %v10914_v24 = vmul.u32.u64.high 3817748708, %v10890_v2, %v10913_v19  ;;  %v480_v45 = vmul.u32 18, %v479_v6  ;;  %v10932_v29 = vadd.s32 216, %v10454_v53 }
  0x58   : > { %v10924_v9 = vmul.u32.u64.low 3817748708, %v10897_v8  ;;  %v10925_v43 = vmul.u32.u64.high 3817748708, %v10897_v8, %v10924_v9  ;;  %v469_v27 = vmul.u32 18, %v468_v57  ;;  %v10937_v30 = vsel %vm10871_vm12, 1.0, %v10656_v33 }
  0x59   : > { %v10928_v28 = vmul.u32.u64.low 3817748708, %v10901_v10  ;;  %v10929_v22 = vmul.u32.u64.high 3817748708, %v10901_v10, %v10928_v28  ;;  %v10942_v0 = vsel %vm10875_vm13, 1.0, %v10656_v33  ;;  %v10947_v31 = vsel %vm10879_vm10, 1.0, %v10656_v33 }
  0x5a   : > { %vm652_vm1 = vcmp.ne.s32.totalorder %v10906_v13, 0  ;;  %vm10950_vm2 = vcmp.lt.s32.totalorder %v794_v3, 16  ;;  %vm10954_vm3 = vcmp.lt.s32.totalorder %v797_v11, 16  ;;  %vm688_vm4 = vcmp.lt.s32.totalorder %v10906_v13, 0 }
  0x5b   : > { %v801_v37 = vsel %vm10916_vm0, %v765_v21, %v459_v55  ;;  %v10962_v38 = vsub.s32 %v10759_v7, %v425_v20  ;;  %v502_v17 = vmul.u32 18, %v501_v23  ;;  %v10965_v39 = vadd.s32 18, %v10906_v13  ;;  %vm11001_vm15 = vmand %vm688_vm4, %vm652_vm1 }
  0x5c   : > { %vm656_vm5 = vcmp.ne.s32.totalorder %v10921_v25, 0  ;;  %vm692_vm6 = vcmp.lt.s32.totalorder %v10921_v25, 0  ;;  %v481_v40 = vsub.s32 %v10770_v12, %v480_v45  ;;  %vm655_vm7 = vcmp.ne.s32.totalorder %v10909_v16, 0 }
  0x5d   : > { %v470_v41 = vsub.s32 %v10774_v15, %v469_v27  ;;  %v10973_v42 = vmul.u32.u64.low 3817748708, %v10932_v29  ;;  %v10974_v44 = vmul.u32.u64.high 3817748708, %v10932_v29, %v10973_v42  ;;  %vm10976_vm8 = vcmp.lt.s32.totalorder %v801_v37, 16  ;;  %vm10985_vm12 = vmand %vm692_vm6, %vm656_vm5 }
  0x5e   : > { %vm691_vm9 = vcmp.lt.s32.totalorder %v10909_v16, 0  ;;  %v10982_v46 = vadd.s32 18, %v10909_v16  ;;  %v764_v51 = vadd.s32 18, %v10921_v25  ;;  %vm654_vm13 = vcmp.ne.s32.totalorder %v10962_v38, 0 }
  0x5f   : > { %vm690_vm10 = vcmp.lt.s32.totalorder %v10962_v38, 0  ;;  %v503_v15 = vsub.s32 %v10807_v26, %v502_v17  ;;  %v490_v55 = vshrl.u32 %v10914_v24, 4  ;;  %vm659_vm11 = vcmp.ne.s32.totalorder %v481_v40, 0  ;;  %vm11013_vm6 = vmand %vm691_vm9, %vm655_vm7 }
  0x60   : > { %vm695_vm14 = vcmp.lt.s32.totalorder %v481_v40, 0  ;;  %v523_v59 = vshrl.u32 %v10925_v43, 4  ;;  %v10995_v60 = vadd.s32 208, %v10454_v53  ;;  %vm658_vm0 = vcmp.ne.s32.totalorder %v470_v41, 0 }
  0x61   : > { %vm694_vm5 = vcmp.lt.s32.totalorder %v470_v41, 0  ;;  %v512_v26 = vshrl.u32 %v10929_v22, 4  ;;  %v11007_v62 = vadd.s32 232, %v10454_v53  ;;  %v800_v1 = vsel %vm10985_vm12, %v764_v51, %v10921_v25  ;;  %vm11027_vm1 = vmand %vm695_vm14, %vm659_vm11 }
  0x62   : > { %v11021_v49 = vadd.s32 18, %v10962_v38  ;;  %v767_v32 = vadd.s32 18, %v481_v40  ;;  %v11024_v3 = vadd.s32 224, %v10454_v53  ;;  %v766_v6 = vadd.s32 18, %v470_v41  ;;  %vm11032_vm9 = vmand %vm694_vm5, %vm658_vm0 }
  0x63   : > { %vm661_vm4 = vcmp.ne.s32.totalorder %v503_v15, 0  ;;  %vm697_vm7 = vcmp.lt.s32.totalorder %v503_v15, 0  ;;  %v491_v57 = vmul.u32 18, %v490_v55  ;;  %v769_v20 = vadd.s32 18, %v503_v15  ;;  %vm11044_vm12 = vmand %vm690_vm10, %vm654_vm13 }
  0x64   : > { %v524_v21 = vmul.u32 18, %v523_v59  ;;  %v11037_v23 = vmul.u32.u64.low 3817748708, %v10995_v60  ;;  %v11038_v19 = vmul.u32.u64.high 3817748708, %v10995_v60, %v11037_v23  ;;  %v545_v25 = vshrl.u32 %v10974_v44, 4  ;;  %vm11063_vm13 = vmand %vm697_vm7, %vm661_vm4 }
  0x65   : > { %v513_v4 = vmul.u32 18, %v512_v26  ;;  %v11050_v45 = vmul.u32.u64.low 3817748708, %v11007_v62  ;;  %v11051_v9 = vmul.u32.u64.high 3817748708, %v11007_v62, %v11050_v45  ;;  %v11056_v43 = vsel %vm10950_vm2, 1.0, %v10656_v33 }
  0x66   : > { %v11061_v27 = vsel %vm10954_vm3, 1.0, %v10656_v33  ;;  %v11068_v22 = vmul.u32.u64.low 3817748708, %v11024_v3  ;;  %v11069_v37 = vmul.u32.u64.high 3817748708, %v11024_v3, %v11068_v22  ;;  %vm836_vm10 = vcmp.lt.s32.totalorder %v800_v1, 16 }
  0x67   : > { %v803_v17 = vsel %vm11027_vm1, %v767_v32, %v481_v40  ;;  %v802_v35 = vsel %vm11032_vm9, %v766_v6, %v470_v41  ;;  %v492_v42 = vsub.s32 %v10890_v2, %v491_v57  ;;  %v11083_v44 = vsel %vm10976_vm8, 1.0, %v10656_v33 }
  0x68   : > { %12532 = vst [vmem:[#allocation3_spill] sm:$0xff] %v11083_v44  ;;  %v525_v51 = vsub.s32 %v10897_v8, %v524_v21  ;;  %v805_v41 = vsel %vm11063_vm13, %v769_v20, %v503_v15  ;;  %v514_v12 = vsub.s32 %v10901_v10, %v513_v4  ;;  %v546_v7 = vmul.u32 18, %v545_v25 }
  0x69   : > { %v11098_v55 = vsel %vm836_vm10, 1.0, %v10656_v33  ;;  %vm11100_vm2 = vcmp.lt.s32.totalorder %v803_v17, 16  ;;  %vm11104_vm3 = vcmp.lt.s32.totalorder %v802_v35, 16  ;;  %v11109_v26 = vadd.s32 248, %v10454_v53 }
  0x6a   : > { %vm660_vm8 = vcmp.ne.s32.totalorder %v492_v42, 0  ;;  %vm696_vm11 = vcmp.lt.s32.totalorder %v492_v42, 0  ;;  %v768_v15 = vadd.s32 18, %v492_v42  ;;  %v11112_v10 = vadd.s32 240, %v10454_v53 }
  0x6b   : > { %vm11114_vm14 = vcmp.lt.s32.totalorder %v805_v41, 16  ;;  %vm663_vm0 = vcmp.ne.s32.totalorder %v525_v51, 0  ;;  %vm699_vm5 = vcmp.lt.s32.totalorder %v525_v51, 0  ;;  %v534_v32 = vshrl.u32 %v11038_v19, 4  ;;  %vm11123_vm7 = vmand %vm696_vm11, %vm660_vm8 }
  0x6c   : > { %vm662_vm1 = vcmp.ne.s32.totalorder %v514_v12, 0  ;;  %vm698_vm4 = vcmp.lt.s32.totalorder %v514_v12, 0  ;;  %v11120_v5 = vsub.s32 %v10932_v29, %v546_v7  ;;  %v567_v6 = vshrl.u32 %v11051_v9, 4  ;;  %vm11132_vm9 = vmand %vm699_vm5, %vm663_vm0 }
  0x6d   : > { %v771_v11 = vadd.s32 18, %v525_v51  ;;  %v556_v20 = vshrl.u32 %v11069_v37, 4  ;;  %v11129_v21 = vmul.u32.u64.low 3817748708, %v11109_v26  ;;  %v11130_v23 = vmul.u32.u64.high 3817748708, %v11109_v26, %v11129_v21  ;;  %vm11153_vm13 = vmand %vm698_vm4, %vm662_vm1 }
  0x6e   : > { %v770_v4 = vadd.s32 18, %v514_v12  ;;  %v11137_v29 = vmul.u32.u64.low 3817748708, %v11112_v10  ;;  %v11138_v25 = vmul.u32.u64.high 3817748708, %v11112_v10, %v11137_v29  ;;  %v11141_v45 = vadd.s32 264, %v10454_v53 }
  0x6f   : > { %v11146_v9 = vsel %vm11100_vm2, 1.0, %v10656_v33  ;;  %v11151_v28 = vsel %vm11104_vm3, 1.0, %v10656_v33  ;;  %v535_v37 = vmul.u32 18, %v534_v32  ;;  %v11158_v17 = vadd.s32 256, %v10454_v53 }
  0x70   : > { %12543 = vst [vmem:[#allocation4_spill] sm:$0xff] %v11146_v9  ;;  %v11163_v35 = vsel %vm11114_vm14, 1.0, %v10656_v33  ;;  %vm665_vm10 = vcmp.ne.s32.totalorder %v11120_v5, 0  ;;  %vm701_vm2 = vcmp.lt.s32.totalorder %v11120_v5, 0  ;;  %v568_v41 = vmul.u32 18, %v567_v6 }
  0x71   : > { %v804_v7 = vsel %vm11123_vm7, %v768_v15, %v492_v42  ;;  %v807_v59 = vsel %vm11132_vm9, %v771_v11, %v525_v51  ;;  %v773_v8 = vadd.s32 18, %v11120_v5  ;;  %v557_v32 = vmul.u32 18, %v556_v20  ;;  %vm11183_vm3 = vmand %vm701_vm2, %vm665_vm10 }
  0x72   : > { %v806_v21 = vsel %vm11153_vm13, %v770_v4, %v514_v12  ;;  %v11175_v1 = vmul.u32.u64.low 3817748708, %v11141_v45  ;;  %v11176_v29 = vmul.u32.u64.high 3817748708, %v11141_v45, %v11175_v1  ;;  %v11179_v2 = vadd.s32 280, %v10454_v53 }
  0x73   : > { %v11188_v51 = vsub.s32 %v10995_v60, %v535_v37  ;;  %v11191_v15 = vmul.u32.u64.low 3817748708, %v11158_v17  ;;  %v11192_v57 = vmul.u32.u64.high 3817748708, %v11158_v17, %v11191_v15  ;;  %v11195_v12 = vadd.s32 272, %v10454_v53 }
  0x74   : > { %vm11201_vm8 = vcmp.lt.s32.totalorder %v804_v7, 16  ;;  %vm11205_vm11 = vcmp.lt.s32.totalorder %v807_v59, 16  ;;  %v11210_v60 = vsub.s32 %v11007_v62, %v568_v41  ;;  %vm11214_vm14 = vcmp.lt.s32.totalorder %v806_v21, 16 }
  0x75   : > { %v11219_v37 = vsub.s32 %v11024_v3, %v557_v32  ;;  %v589_v7 = vshrl.u32 %v11130_v23, 4  ;;  %v809_v59 = vsel %vm11183_vm3, %v773_v8, %v11120_v5  ;;  %v578_v62 = vshrl.u32 %v11138_v25, 4 }
  0x76   : > { %v11227_v41 = vmul.u32.u64.low 3817748708, %v11179_v2  ;;  %v11228_v1 = vmul.u32.u64.high 3817748708, %v11179_v2, %v11227_v41  ;;  %vm664_vm0 = vcmp.ne.s32.totalorder %v11188_v51, 0  ;;  %vm700_vm5 = vcmp.lt.s32.totalorder %v11188_v51, 0 }
  0x77   : > { %v11235_v3 = vmul.u32.u64.low 3817748708, %v11195_v12  ;;  %v11236_v23 = vmul.u32.u64.high 3817748708, %v11195_v12, %v11235_v3  ;;  %v772_v32 = vadd.s32 18, %v11188_v51  ;;  %vm667_vm1 = vcmp.ne.s32.totalorder %v11210_v60, 0  ;;  %vm11260_vm9 = vmand %vm700_vm5, %vm664_vm0 }
  0x78   : > { %vm703_vm4 = vcmp.lt.s32.totalorder %v11210_v60, 0  ;;  %vm666_vm7 = vcmp.ne.s32.totalorder %v11219_v37, 0  ;;  %vm702_vm13 = vcmp.lt.s32.totalorder %v11219_v37, 0  ;;  %v579_v40 = vmul.u32 18, %v578_v62 }
  0x79   : > { %v611_v36 = vshrl.u32 %v11176_v29, 4  ;;  %v11281_v62 = vsel %vm11214_vm14, 1.0, %v10656_v33  ;;  %v600_v29 = vshrl.u32 %v11192_v57, 4  ;;  %vm11290_vm10 = vcmp.lt.s32.totalorder %v809_v59, 16  ;;  %vm11298_vm2 = vmand %vm703_vm4, %vm667_vm1 }
  0x7a   : > { %v775_v57 = vadd.s32 18, %v11210_v60  ;;  %v11304_v22 = vadd.s32 18, %v11219_v37  ;;  %vm11319_vm3 = vmand %vm702_vm13, %vm666_vm7  ;;  %v11329_v3 = vsub.s32 %v11112_v10, %v579_v40  ;;  %v622_v40 = vshrl.u32 %v11236_v23, 4 }
  0x7c   : > { %v810_v23 = vsel %vm11319_vm3, %v11304_v22, %v11219_v37  ;;  %vm668_vm0 = vcmp.ne.s32.totalorder %v11329_v3, 0  ;;  %vm704_vm1 = vcmp.lt.s32.totalorder %v11329_v3, 0 }
  0x7d   : > { %vm11417_vm4 = vcmp.lt.s32.totalorder %v810_v23, 16 }
  0xe8   : > { %v11181_v6 = vpop.f32.mrb[0].mxu0 }
  0xe9   : > { %12546 = vst [vmem:[#allocation5_spill] sm:$0xff] %v11181_v6  ;;  %v1323_v11 = vmul.f32 %v11181_v6, %v10601_v14  ;;  %v11199_v20 = vpop.f32.mrb[1].mxu0  ;;  %v11242_v25 = vpop.f32.mrb[0].mxu1  ;;  %v808_v6 = vsel %vm11260_vm9, %v772_v32, %v11188_v51  ;;  %v612_v51 = vmul.u32 18, %v611_v36  ;;  %v633_v32 = vshrl.u32 %v11228_v1, 4  ;;  %vm11436_vm9 = vmand %vm704_vm1, %vm668_vm0 }
  0xea   : > { %12549 = vst [vmem:[#allocation6_spill] sm:$0xff] %v11199_v20  ;;  %v1322_v53 = vmul.f32 %v10618_v18, %v11199_v20  ;;  %12558 = vst [vmem:[#allocation9_spill] sm:$0xff] %v11242_v25  ;;  %v1341_v15 = vmul.f32 %v11242_v25, %v11083_v44 }
  0xeb   : > { %1359 = vst [vmem:[#allocation2 + $0x20] sm:$0xff] %v1323_v11  ;;  %v11251_v11 = vpop.f32.mrb[1].mxu1  ;;  %v634_v4 = vmul.u32 18, %v633_v32  ;;  %v623_v32 = vmul.u32 18, %v622_v40 }
  0xec   : > { %1358 = vst [vmem:[#allocation2 + $0x18] sm:$0xff] %v1322_v53  ;;  %v11230_v21 = vpop.f32.mrb[2].mxu0  ;;  %12559 = vst [vmem:[#allocation10_spill] sm:$0xff] %v11251_v11  ;;  %v590_v53 = vmul.u32 18, %v589_v7  ;;  %v1340_v41 = vmul.f32 %v11098_v55, %v11251_v11  ;;  %v11271_v7 = vsel %vm11201_vm8, 1.0, %v10656_v33  ;;  %vm11349_vm8 = vcmp.lt.s32.totalorder %v808_v6, 16 }
  0xed   : > { %12556 = vst [vmem:[#allocation7_spill] sm:$0xff] %v11230_v21  ;;  %v1325_v5 = vmul.f32 %v11230_v21, %v10661_v34  ;;  %v11240_v8 = vpop.f32.mrb[3].mxu0  ;;  %1377 = vst [vmem:[#allocation2 + $0xb0] sm:$0xff] %v1341_v15  ;;  %v11288_v19 = vpop.f32.mrb[2].mxu1  ;;  %v811_v11 = vsel %vm11298_vm2, %v775_v57, %v11210_v60  ;;  %v10289_v60 = vld [vmem:[%s12413_s2] sm:$0xff]  }
  0xee   : > { %12557 = vst [vmem:[#allocation8_spill] sm:$0xff] %v11240_v8  ;;  %v1324_v42 = vmul.f32 %v10713_v52, %v11240_v8  ;;  %1376 = vst [vmem:[#allocation2 + $0xa8] sm:$0xff] %v1340_v41  ;;  %v1343_v59 = vmul.f32 %v11288_v19, %v11146_v9  ;;  %v11324_v20 = vsub.s32 %v11109_v26, %v590_v53  ;;  %v10153_v26 = vld [vmem:[%s12413_s2 + $0x8] sm:$0xff]   ;;  %v11340_v53 = vsel %vm11290_vm10, 1.0, %v10656_v33 }
  0xef   : > { %1361 = vst [vmem:[#allocation2 + $0x30] sm:$0xff] %v1325_v5  ;;  %v11276_v5 = vsel %vm11205_vm11, 1.0, %v10656_v33  ;;  %12564 = vst [vmem:[#allocation13_spill] sm:$0xff] %v11288_v19 }
  0xf0   : > { %1360 = vst [vmem:[#allocation2 + $0x28] sm:$0xff] %v1324_v42  ;;  %v11266_v25 = vpop.f32.mrb[4].mxu0  ;;  %1379 = vst [vmem:[#allocation2 + $0xc0] sm:$0xff] %v1343_v59  ;;  %vm669_vm11 = vcmp.ne.s32.totalorder %v11324_v20, 0  ;;  %vm705_vm14 = vcmp.lt.s32.totalorder %v11324_v20, 0 }
  0xf1   : > { %12562 = vst [vmem:[#allocation11_spill] sm:$0xff] %v11266_v25  ;;  %v1327_v42 = vmul.f32 %v11266_v25, %v10718_v54  ;;  %v11286_v15 = vpop.f32.mrb[5].mxu0  ;;  %v11310_v25 = vpop.f32.mrb[3].mxu1  ;;  %vm11425_vm7 = vmand %vm705_vm14, %vm669_vm11 }
  0xf2   : > { %12563 = vst [vmem:[#allocation12_spill] sm:$0xff] %v11286_v15  ;;  %v1326_v41 = vmul.f32 %v10727_v56, %v11286_v15  ;;  %12569 = vst [vmem:[#allocation14_spill] sm:$0xff] %v11310_v25  ;;  %v1342_v8 = vmul.f32 %v11151_v28, %v11310_v25  ;;  %v11347_v1 = vpop.f32.mrb[4].mxu1 }
  0xf3   : > { %1363 = vst [vmem:[#allocation2 + $0x40] sm:$0xff] %v1327_v42  ;;  %v1466_v15 = vld [vmem:[#allocation2 + $0x16] sm:$0xff]  ;;  %v1467_v19 = vld [vmem:[#allocation2 + $0x1e] sm:$0xff]  ;;  %v601_v42 = vmul.u32 18, %v600_v29  ;;  %12574 = vst [vmem:[#allocation17_spill] sm:$0xff] %v11347_v1  ;;  %v11364_v6 = vpop.f32.mrb[5].mxu1 }
  0xf4   : > { %1362 = vst [vmem:[#allocation2 + $0x38] sm:$0xff] %v1326_v41  ;;  %v11332_v9 = vpop.f32.mrb[6].mxu0  ;;  %v1501_v44 = vpack.c.bf16 %v1467_v19, %v1466_v15  ;;  %1378 = vst [vmem:[#allocation2 + $0xb8] sm:$0xff] %v1342_v8  ;;  %v1345_v8 = vmul.f32 %v11347_v1, %v11163_v35  ;;  %v11375_v19 = vsub.s32 %v11141_v45, %v612_v51  ;;  %v10154_v45 = vld [vmem:[%s12413_s2 + $0x10] sm:$0xff]  }
  0xf5   : > { %12572 = vst [vmem:[#allocation15_spill] sm:$0xff] %v11332_v9  ;;  %v1329_v36 = vmul.f32 %v11332_v9, %v10730_v58  ;;  %v11345_v10 = vpop.f32.mrb[7].mxu0  ;;  %12577 = vst [vmem:[#allocation18_spill] sm:$0xff] %v11364_v6  ;;  %v12579_v41 = vsel %vm11001_vm15, %v10965_v39, %v10906_v13  ;;  %v11393_v51 = vsub.s32 %v11158_v17, %v601_v42  ;;  %v11399_v13 = vpop.f32.mrb[6].mxu1  ;;  %v11404_v39 = vsel %vm11349_vm8, 1.0, %v10656_v33 }
  0xf6   : > { %12573 = vst [vmem:[#allocation16_spill] sm:$0xff] %v11345_v10  ;;  %v1328_v29 = vmul.f32 %v10849_v47, %v11345_v10  ;;  %8558 = vmatmul.mubr.bf16.vlgmr.msra.gmra.mrb[20].mxu1 %v1501_v44  ;;  %v1344_v44 = vmul.f32 %v11271_v7, %v11364_v6  ;;  %vm11384_vm5 = vcmp.lt.s32.totalorder %v12579_v41, 16  ;;  %1381 = vst [vmem:[#allocation2 + $0xd0] sm:$0xff] %v1345_v8  ;;  %vm11406_vm15 = vcmp.lt.s32.totalorder %v811_v11, 16  ;;  %v11415_v8 = vpop.f32.mrb[7].mxu1 }
  0xf7   : > { %1365 = vst [vmem:[#allocation2 + $0x50] sm:$0xff] %v1329_v36  ;;  %8594 = vmatpush3.bf16.msra.mxu1 %v10289_v60  ;;  %v1468_v37 = vld [vmem:[#allocation2 + $0x26] sm:$0xff]  ;;  %v1469_v21 = vld [vmem:[#allocation2 + $0x2e] sm:$0xff]  ;;  %12583 = vst [vmem:[#allocation21_spill] sm:$0xff] %v11399_v13  ;;  %v777_v17 = vadd.s32 18, %v11324_v20  ;;  %v1347_v40 = vmul.f32 %v11399_v13, %v11276_v5  ;;  %v776_v11 = vadd.s32 18, %v11329_v3  ;;  %v1346_v23 = vmul.f32 %v11281_v62, %v11415_v8 }
  0xf8   : > { %1364 = vst [vmem:[#allocation2 + $0x48] sm:$0xff] %v1328_v29  ;;  %v11377_v57 = vpop.f32.mrb[8].mxu0  ;;  %v1502_v22 = vpack.c.bf16 %v1469_v21, %v1468_v37  ;;  %8595 = vmatprep.subr.bf16.mxu1 %v10153_v26  ;;  %1380 = vst [vmem:[#allocation2 + $0xc8] sm:$0xff] %v1344_v44  ;;  %vm671_vm13 = vcmp.ne.s32.totalorder %v11375_v19, 0  ;;  %vm707_vm10 = vcmp.lt.s32.totalorder %v11375_v19, 0  ;;  %vm670_vm2 = vcmp.ne.s32.totalorder %v11393_v51, 0 }
  0xf9   : > { %12578 = vst [vmem:[#allocation19_spill] sm:$0xff] %v11377_v57  ;;  %v1331_v61 = vmul.f32 %v11377_v57, %v10854_v48  ;;  %v11397_v36 = vpop.f32.mrb[9].mxu0  ;;  %12586 = vst [vmem:[#allocation22_spill] sm:$0xff] %v11415_v8  ;;  %vm706_vm3 = vcmp.lt.s32.totalorder %v11393_v51, 0  ;;  %v11453_v13 = vsub.s32 %v11195_v12, %v623_v32  ;;  %v779_v12 = vadd.s32 18, %v11375_v19  ;;  %v10156_v60 = vld [vmem:[%s12413_s2 + $0x20] sm:$0xff]  }
  0xfa   : > { %12582 = vst [vmem:[#allocation20_spill] sm:$0xff] %v11397_v36  ;;  %v1330_v42 = vmul.f32 %v10859_v50, %v11397_v36  ;;  %8561 = vmatprep.mubr.bf16.mxu1 %v1502_v22  ;;  %v11443_v22 = vsub.s32 %v11179_v2, %v634_v4  ;;  %1383 = vst [vmem:[#allocation2 + $0xe0] sm:$0xff] %v1347_v40  ;;  %v813_v40 = vsel %vm11425_vm7, %v777_v17, %v11324_v20 }
  0xfb   : > { %1367 = vst [vmem:[#allocation2 + $0x60] sm:$0xff] %v1331_v61  ;;  %v1470_v37 = vld [vmem:[#allocation2 + $0x36] sm:$0xff]  ;;  %v1471_v21 = vld [vmem:[#allocation2 + $0x3e] sm:$0xff]  ;;  %8596 = vmatpush3.bf16.msra.mxu1 %v10153_v26  ;;  %1382 = vst [vmem:[#allocation2 + $0xd8] sm:$0xff] %v1346_v23  ;;  %v812_v29 = vsel %vm11436_vm9, %v776_v11, %v11329_v3  ;;  %v778_v17 = vadd.s32 18, %v11393_v51  ;;  %v11493_v3 = vsel %vm11417_vm4, 1.0, %v10656_v33 }
  0xfc   : > { %1366 = vst [vmem:[#allocation2 + $0x58] sm:$0xff] %v1330_v42  ;;  %v11445_v26 = vpop.f32.mrb[10].mxu0  ;;  %v1503_v41 = vpack.c.bf16 %v1471_v21, %v1470_v37  ;;  %8597 = vmatprep.subr.bf16.mxu1 %v10154_v45  ;;  %v10155_v61 = vld [vmem:[%s12413_s2 + $0x18] sm:$0xff]   ;;  %v11459_v42 = vpop.f32.mrb[8].mxu1  ;;  %v11464_v37 = vsel %vm11406_vm15, 1.0, %v10656_v33  ;;  %vm11483_vm8 = vmand %vm707_vm10, %vm671_vm13  ;;  %vm673_vm14 = vcmp.ne.s32.totalorder %v11443_v22, 0 }
  0xfd   : > { %12593 = vst [vmem:[#allocation23_spill] sm:$0xff] %v11445_v26  ;;  %v1333_v2 = vmul.f32 %v11445_v26, %v10937_v30  ;;  %v11457_v4 = vpop.f32.mrb[11].mxu0  ;;  %12595 = vst [vmem:[#allocation25_spill] sm:$0xff] %v11459_v42  ;;  %v1349_v21 = vmul.f32 %v11459_v42, %v11340_v53  ;;  %v11474_v23 = vpop.f32.mrb[9].mxu1  ;;  %vm709_vm0 = vcmp.lt.s32.totalorder %v11443_v22, 0  ;;  %vm11510_vm1 = vcmp.lt.s32.totalorder %v813_v40, 16 }
  0xfe   : > { %12594 = vst [vmem:[#allocation24_spill] sm:$0xff] %v11457_v4  ;;  %v1332_v32 = vmul.f32 %v10942_v0, %v11457_v4  ;;  %8562 = vmatmul.mubr.bf16.gmra.mrb[24].mxu1 %v1503_v41  ;;  %12596 = vst [vmem:[#allocation26_spill] sm:$0xff] %v11474_v23  ;;  %v1348_v42 = vmul.f32 %v11404_v39, %v11474_v23  ;;  %vm672_vm15 = vcmp.ne.s32.totalorder %v11453_v13, 0  ;;  %vm708_vm4 = vcmp.lt.s32.totalorder %v11453_v13, 0 }
  0xff   : > { %1369 = vst [vmem:[#allocation2 + $0x70] sm:$0xff] %v1333_v2  ;;  %v1472_v15 = vld [vmem:[#allocation2 + $0x46] sm:$0xff]  ;;  %v1473_v41 = vld [vmem:[#allocation2 + $0x4e] sm:$0xff]  ;;  %8598 = vmatpush3.bf16.msra.mxu1 %v10154_v45  ;;  %vm11499_vm11 = vmand %vm706_vm3, %vm670_vm2  ;;  %vm11522_vm7 = vcmp.lt.s32.totalorder %v812_v29, 16  ;;  %v815_v40 = vsel %vm11483_vm8, %v779_v12, %v11375_v19  ;;  %v780_v12 = vadd.s32 18, %v11453_v13  ;;  %v11551_v20 = vsel %vm11384_vm5, 1.0, %v10656_v33 }
 0x100   : > { %1368 = vst [vmem:[#allocation2 + $0x68] sm:$0xff] %v1332_v32  ;;  %v11505_v45 = vpop.f32.mrb[12].mxu0  ;;  %v1504_v44 = vpack.c.bf16 %v1473_v41, %v1472_v15  ;;  %8599 = vmatprep.subr.bf16.mxu1 %v10155_v61  ;;  %1385 = vst [vmem:[#allocation2 + $0xf0] sm:$0xff] %v1349_v21  ;;  %v11520_v15 = vpop.f32.mrb[10].mxu1  ;;  %v781_v41 = vadd.s32 18, %v11443_v22  ;;  %v814_v29 = vsel %vm11499_vm11, %v778_v17, %v11393_v51  ;;  %v11567_v59 = vsel %vm11510_vm1, 1.0, %v10656_v33 }
 0x101   : > { %12601 = vst [vmem:[#allocation27_spill] sm:$0xff] %v11505_v45  ;;  %v1335_v32 = vmul.f32 %v11505_v45, %v10947_v31  ;;  %v11518_v8 = vpop.f32.mrb[13].mxu0  ;;  %1384 = vst [vmem:[#allocation2 + $0xe8] sm:$0xff] %v1348_v42  ;;  %v1351_v1 = vmul.f32 %v11520_v15, %v11464_v37  ;;  %v11534_v42 = vpop.f32.mrb[11].mxu1  ;;  %v12611_v51 = vsel %vm11013_vm6, %v10982_v46, %v10909_v16  ;;  %vm11596_vm10 = vcmp.lt.s32.totalorder %v815_v40, 16 }
 0x102   : > { %12604 = vst [vmem:[#allocation28_spill] sm:$0xff] %v11518_v8  ;;  %12605 = vst [vmem:[#allocation29_spill] sm:$0xff] %v11520_v15  ;;  %v1334_v23 = vmul.f32 %v11056_v43, %v11518_v8  ;;  %8565 = vmatprep.mubr.bf16.mxu1 %v1504_v44  ;;  %vm11558_vm13 = vcmp.lt.s32.totalorder %v12611_v51, 16  ;;  %v1350_v11 = vmul.f32 %v11493_v3, %v11534_v42  ;;  %v2011_v26 = vld [vmem:[#allocation2 + $0xd7] sm:$0xff]  ;;  %v2012_v36 = vld [vmem:[#allocation2 + $0xdf] sm:$0xff] }
 0x103   : > { %12608 = vst [vmem:[#allocation30_spill] sm:$0xff] %v11534_v42  ;;  %vm11543_vm9 = vmand %vm709_vm0, %vm673_vm14  ;;  %v1474_v44 = vld [vmem:[#allocation2 + $0x56] sm:$0xff]  ;;  %v1475_v15 = vld [vmem:[#allocation2 + $0x5e] sm:$0xff]  ;;  %8600 = vmatpush3.bf16.msra.mxu1 %v10155_v61  ;;  %v12617_v61 = vsel %vm11044_vm12, %v11021_v49, %v10962_v38  ;;  %vm11606_vm12 = vcmp.lt.s32.totalorder %v814_v29, 16 }
 0x104   : > { %1371 = vst [vmem:[#allocation2 + $0x80] sm:$0xff] %v1335_v32  ;;  %vm11573_vm5 = vmand %vm708_vm4, %vm672_vm15  ;;  %v11577_v16 = vpop.f32.mrb[14].mxu0  ;;  %v1505_v46 = vpack.c.bf16 %v1475_v15, %v1474_v44  ;;  %vm11584_vm6 = vcmp.lt.s32.totalorder %v12617_v61, 16  ;;  %8601 = vmatprep.subr.bf16.mxu1 %v10156_v60  ;;  %v11591_v32 = vsel %vm11522_vm7, 1.0, %v10656_v33  ;;  %v817_v21 = vsel %vm11543_vm9, %v781_v41, %v11443_v22  ;;  %v10158_v61 = vld [vmem:[%s12413_s2 + $0x30] sm:$0xff]  }
 0x105   : > { %1370 = vst [vmem:[#allocation2 + $0x78] sm:$0xff] %v1334_v23  ;;  %12616 = vst [vmem:[#allocation31_spill] sm:$0xff] %v11577_v16  ;;  %v10157_v23 = vld [vmem:[%s12413_s2 + $0x28] sm:$0xff]   ;;  %v1337_v38 = vmul.f32 %v11577_v16, %v11061_v27  ;;  %v11602_v49 = vpop.f32.mrb[15].mxu0  ;;  %v11618_v44 = vsel %vm11558_vm13, 1.0, %v10656_v33  ;;  %v11630_v22 = vsel %vm11584_vm6, 1.0, %v10656_v33 }
 0x106   : > { %1387 = vst [vmem:[#allocation2 + $0x100] sm:$0xff] %v1351_v1  ;;  %12622 = vst [vmem:[#allocation32_spill] sm:$0xff] %v11602_v49  ;;  %v11604_v1 = vpop.f32.mrb[12].mxu1  ;;  %v1336_v40 = vmul.f32 %v11551_v20, %v11602_v49  ;;  %8566 = vmatmul.mubr.bf16.gmra.mrb[28].mxu1 %v1505_v46  ;;  %v11637_v46 = vsel %vm11596_vm10, 1.0, %v10656_v33  ;;  %vm11646_vm2 = vcmp.lt.s32.totalorder %v817_v21, 16 }
 0x107   : > { %1386 = vst [vmem:[#allocation2 + $0xf8] sm:$0xff] %v1350_v11  ;;  %12623 = vst [vmem:[#allocation33_spill] sm:$0xff] %v11604_v1  ;;  %v1353_v51 = vmul.f32 %v11604_v1, %v11567_v59  ;;  %v11622_v29 = vpop.f32.mrb[13].mxu1  ;;  %v816_v11 = vsel %vm11573_vm5, %v780_v12, %v11453_v13  ;;  %v1476_v41 = vld [vmem:[#allocation2 + $0x66] sm:$0xff]  ;;  %v1477_v19 = vld [vmem:[#allocation2 + $0x6e] sm:$0xff]  ;;  %8602 = vmatpush3.bf16.msra.mxu1 %v10156_v60  ;;  %v11644_v12 = vsel %vm11606_vm12, 1.0, %v10656_v33 }
 0x108   : > { %12626 = vst [vmem:[#allocation34_spill] sm:$0xff] %v11622_v29  ;;  %1373 = vst [vmem:[#allocation2 + $0x90] sm:$0xff] %v1337_v38  ;;  %v1352_v17 = vmul.f32 %v11591_v32, %v11622_v29  ;;  %v11639_v63 = vpop.f32.mrb[16].mxu0  ;;  %v1506_v13 = vpack.c.bf16 %v1477_v19, %v1476_v41  ;;  %8603 = vmatprep.subr.bf16.mxu1 %v10157_v23  ;;  %v11657_v38 = vpop.f32.mrb[14].mxu1  ;;  %vm852_vm3 = vcmp.lt.s32.totalorder %v816_v11, 16  ;;  %v11672_v11 = vsel %vm11646_vm2, 1.0, %v10656_v33 }
 0x109   : > { %12627 = vst [vmem:[#allocation35_spill] sm:$0xff] %v11637_v46  ;;  %1372 = vst [vmem:[#allocation2 + $0x88] sm:$0xff] %v1336_v40  ;;  %v1339_v2 = vmul.f32 %v11639_v63, %v11618_v44  ;;  %v11655_v24 = vpop.f32.mrb[17].mxu0  ;;  %v1355_v21 = vmul.f32 %v11657_v38, %v11637_v46  ;;  %v11663_v40 = vpop.f32.mrb[15].mxu1  ;;  %v1489_v29 = vld [vmem:[#allocation2 + $0xce] sm:$0xff] }
 0x10a   : > { %12628 = vst [vmem:[#allocation36_spill] sm:$0xff] %v11639_v63  ;;  %1389 = vst [vmem:[#allocation2 + $0x110] sm:$0xff] %v1353_v51  ;;  %v1338_v15 = vmul.f32 %v11630_v22, %v11655_v24  ;;  %8569 = vmatprep.mubr.bf16.mxu1 %v1506_v13  ;;  %v11667_v19 = vmul.f32 %v11644_v12, %v11663_v40  ;;  %v11675_v13 = vsel %vm852_vm3, 1.0, %v10656_v33  ;;  %v1490_v63 = vld [vmem:[#allocation2 + $0xd6] sm:$0xff]  ;;  %v1493_v45 = vld [vmem:[#allocation2 + $0xee] sm:$0xff] }
 0x10b   : > { %12631 = vst [vmem:[#allocation37_spill] sm:$0xff] %v11655_v24  ;;  %1388 = vst [vmem:[#allocation2 + $0x108] sm:$0xff] %v1352_v17  ;;  %8604 = vmatpush3.bf16.msra.mxu1 %v10157_v23  ;;  %v10159_v23 = vld [vmem:[%s12413_s2 + $0x38] sm:$0xff]   ;;  %v1492_v24 = vld [vmem:[#allocation2 + $0xe6] sm:$0xff] }
 0x10c   : > { %12632 = vst [vmem:[#allocation38_spill] sm:$0xff] %v11657_v38  ;;  %12633 = vst [vmem:[#allocation39_spill] sm:$0xff] %v11663_v40  ;;  %v1478_v51 = vld [vmem:[#allocation2 + $0x76] sm:$0xff]  ;;  %v1479_v41 = vld [vmem:[#allocation2 + $0x7e] sm:$0xff]  ;;  %8605 = vmatprep.subr.bf16.mxu1 %v10158_v61  ;;  %v1514_v8 = vpack.c.bf16 %v1493_v45, %v1492_v24 }
 0x10d   : > { %1375 = vst [vmem:[#allocation2 + $0xa0] sm:$0xff] %v1339_v2  ;;  %12634 = vst [vmem:[#allocation40_spill] sm:$0xff] %v11672_v11  ;;  %v1507_v17 = vpack.c.bf16 %v1479_v41, %v1478_v51  ;;  %v11681_v2 = vpop.f32.mrb[16].mxu1  ;;  %v1397_v45 = vld [vmem:[#allocation2 + $0x1d] sm:$0xff]  ;;  %v2013_v4 = vld [vmem:[#allocation2 + $0xe7] sm:$0xff] }
 0x10e   : > { %1374 = vst [vmem:[#allocation2 + $0x98] sm:$0xff] %v1338_v15  ;;  %1391 = vst [vmem:[#allocation2 + $0x120] sm:$0xff] %v1355_v21  ;;  %v11685_v60 = vmul.f32 %v11681_v2, %v11672_v11  ;;  %v11687_v15 = vpop.f32.mrb[17].mxu1  ;;  %v2014_v9 = vld [vmem:[#allocation2 + $0xef] sm:$0xff] }
 0x10f   : > { %1390 = vst [vmem:[#allocation2 + $0x118] sm:$0xff] %v11667_v19  ;;  %12635 = vst [vmem:[#allocation41_spill] sm:$0xff] %v11681_v2  ;;  %8570 = vmatmul.mubr.bf16.gmra.mrb[32].mxu1 %v1507_v17  ;;  %v11691_v33 = vmul.f32 %v11675_v13, %v11687_v15  ;;  %v10160_v17 = vld [vmem:[%s12413_s2 + $0x80] sm:$0xff]   ;;  %v1485_v2 = vld [vmem:[#allocation2 + $0xae] sm:$0xff] }
 0x110   : > { %12636 = vst [vmem:[#allocation42_spill] sm:$0xff] %v11687_v15  ;;  %v1480_v21 = vld [vmem:[#allocation2 + $0x86] sm:$0xff]  ;;  %v1481_v51 = vld [vmem:[#allocation2 + $0x8e] sm:$0xff]  ;;  %8606 = vmatpush3.bf16.msra.mxu1 %v10158_v61  ;;  %1393 = vst [vmem:[#allocation2 + $0x130] sm:$0xff] %v11685_v60 }
 0x111   : > { %v1508_v41 = vpack.c.bf16 %v1481_v51, %v1480_v21  ;;  %8607 = vmatprep.subr.bf16.mxu1 %v10159_v23  ;;  %1392 = vst [vmem:[#allocation2 + $0x128] sm:$0xff] %v11691_v33  ;;  %v1486_v61 = vld [vmem:[#allocation2 + $0xb6] sm:$0xff]  ;;  %v1487_v21 = vld [vmem:[#allocation2 + $0xbe] sm:$0xff]  ;;  %v1488_v51 = vld [vmem:[#allocation2 + $0xc6] sm:$0xff] }
 0x112   : > { %v1511_v25 = vpack.c.bf16 %v1487_v21, %v1486_v61  ;;  %v1512_v6 = vpack.c.bf16 %v1489_v29, %v1488_v51  ;;  %v1395_v29 = vld [vmem:[#allocation2 + $0xd] sm:$0xff] }
 0x113   : > { %8573 = vmatprep.mubr.bf16.mxu1 %v1508_v41  ;;  %v1491_v41 = vld [vmem:[#allocation2 + $0xde] sm:$0xff]  ;;  %v10161_v51 = vld [vmem:[%s12413_s2 + $0x88] sm:$0xff]  }
 0x114   : > { %v1484_v38 = vld [vmem:[#allocation2 + $0xa6] sm:$0xff]  ;;  %8608 = vmatpush3.bf16.msra.mxu1 %v10159_v23  ;;  %v1513_v16 = vpack.c.bf16 %v1491_v41, %v1490_v63  ;;  %v1396_v63 = vld [vmem:[#allocation2 + $0x15] sm:$0xff] }
 0x115   : > { %v1482_v40 = vld [vmem:[#allocation2 + $0x96] sm:$0xff]  ;;  %v1483_v1 = vld [vmem:[#allocation2 + $0x9e] sm:$0xff]  ;;  %8645 = vmatprep.subr.bf16.mxu1 %v10160_v17  ;;  %v1510_v15 = vpack.c.bf16 %v1485_v2, %v1484_v38  ;;  %v1431_v24 = vpack.c.bf16 %v1397_v45, %v1396_v63  ;;  %v10165_v45 = vld [vmem:[%s12413_s2 + $0xa8] sm:$0xff]  }
 0x116   : > { %v1509_v42 = vpack.c.bf16 %v1483_v1, %v1482_v40  ;;  %v1494_v1 = vld [vmem:[#allocation2 + $0xf6] sm:$0xff]  ;;  %v1495_v38 = vld [vmem:[#allocation2 + $0xfe] sm:$0xff]  ;;  %v1497_v40 = vld [vmem:[#allocation2 + $0x10e] sm:$0xff] }
 0x117   : > { %v1515_v23 = vpack.c.bf16 %v1495_v38, %v1494_v1  ;;  %v10162_v1 = vld [vmem:[%s12413_s2 + $0x90] sm:$0xff]  }
 0x118   : > { %8574 = vmatmul.mubr.bf16.gmra.mrb[36].mxu1 %v1509_v42  ;;  %v1496_v42 = vld [vmem:[#allocation2 + $0x106] sm:$0xff]  ;;  %v1400_v38 = vld [vmem:[#allocation2 + $0x35] sm:$0xff] }
 0x119   : > { %8577 = vmatprep.mubr.bf16.mxu1 %v1510_v15  ;;  %v1516_v2 = vpack.c.bf16 %v1497_v40, %v1496_v42  ;;  %v1394_v15 = vld [vmem:[#allocation2 + $0x5] sm:$0xff]  ;;  %v1401_v42 = vld [vmem:[#allocation2 + $0x3d] sm:$0xff]  ;;  %v2018_v10 = vld [vmem:[#allocation2 + $0x10f] sm:$0xff] }
 0x11a   : > { %v1430_v61 = vpack.c.bf16 %v1395_v29, %v1394_v15  ;;  %v1402_v40 = vld [vmem:[#allocation2 + $0x45] sm:$0xff]  ;;  %v10163_v15 = vld [vmem:[%s12413_s2 + $0x98] sm:$0xff]  }
 0x120   : > { %8578 = vmatmul.mubr.bf16.gmra.mrb[40].mxu1 %v1511_v25  ;;  %v1498_v25 = vld [vmem:[#allocation2 + $0x116] sm:$0xff] }
 0x121   : > { %8581 = vmatprep.mubr.bf16.mxu1 %v1512_v6  ;;  %v1499_v6 = vld [vmem:[#allocation2 + $0x11e] sm:$0xff] }
 0x122   : > { %v1517_v21 = vpack.c.bf16 %v1499_v6, %v1498_v25  ;;  %v1404_v25 = vld [vmem:[#allocation2 + $0x55] sm:$0xff]  ;;  %v1405_v6 = vld [vmem:[#allocation2 + $0x5d] sm:$0xff] }
 0x123   : > { %v1435_v63 = vpack.c.bf16 %v1405_v6, %v1404_v25 }
 0x128   : > { %8582 = vmatmul.mubr.bf16.gmra.mrb[44].mxu1 %v1513_v16  ;;  %v1398_v16 = vld [vmem:[#allocation2 + $0x25] sm:$0xff] }
 0x129   : > { %8585 = vmatprep.mubr.bf16.mxu1 %v1514_v8  ;;  %v1399_v8 = vld [vmem:[#allocation2 + $0x2d] sm:$0xff] }
 0x12a   : > { %v1432_v41 = vpack.c.bf16 %v1399_v8, %v1398_v16  ;;  %v10166_v8 = vld [vmem:[%s12413_s2 + $0xb0] sm:$0xff]  }
 0x130   : > { %8586 = vmatmul.mubr.bf16.gmra.mrb[48].mxu1 %v1515_v23  ;;  %v1403_v23 = vld [vmem:[#allocation2 + $0x4d] sm:$0xff] }
 0x131   : > { %8589 = vmatprep.mubr.bf16.mxu1 %v1516_v2  ;;  %v1433_v2 = vpack.c.bf16 %v1401_v42, %v1400_v38  ;;  %v1434_v29 = vpack.c.bf16 %v1403_v23, %v1402_v40  ;;  %v10167_v42 = vld [vmem:[%s12413_s2 + $0xb8] sm:$0xff]   ;;  %v10168_v23 = vld [vmem:[%s12413_s2 + $0xc0] sm:$0xff]  }
 0x138   : > { %8590 = vmatmul.mubr.bf16.gmra.mrb[52].mxu1 %v1517_v21  ;;  %v1407_v21 = vld [vmem:[#allocation2 + $0x6d] sm:$0xff] }
 0x139   : > { %8609 = vmatprep.mubr.bf16.mxu1 %v1430_v61  ;;  %v1406_v61 = vld [vmem:[#allocation2 + $0x65] sm:$0xff] }
 0x13a   : > { %v1436_v16 = vpack.c.bf16 %v1407_v21, %v1406_v61  ;;  %v1416_v61 = vld [vmem:[#allocation2 + $0xb5] sm:$0xff]  ;;  %v1417_v21 = vld [vmem:[#allocation2 + $0xbd] sm:$0xff] }
 0x140   : > { %8610 = vmatmul.mubr.bf16.vlgmr.msra.gmra.mrb[20].mxu1 %v1431_v24  ;;  %v1408_v24 = vld [vmem:[#allocation2 + $0x75] sm:$0xff] }
 0x141   : > { %8646 = vmatpush3.bf16.msra.mxu1 %v10160_v17  ;;  %8613 = vmatprep.mubr.bf16.mxu1 %v1432_v41  ;;  %v10164_v17 = vld [vmem:[%s12413_s2 + $0xa0] sm:$0xff]  }
 0x142   : > { %8647 = vmatprep.subr.bf16.mxu1 %v10161_v51  ;;  %v1410_v41 = vld [vmem:[#allocation2 + $0x85] sm:$0xff] }
 0x145   : > { %8648 = vmatpush3.bf16.msra.mxu1 %v10161_v51  ;;  %v1409_v51 = vld [vmem:[#allocation2 + $0x7d] sm:$0xff] }
 0x146   : > { %8649 = vmatprep.subr.bf16.mxu1 %v10162_v1  ;;  %v1437_v38 = vpack.c.bf16 %v1409_v51, %v1408_v24  ;;  %v1420_v24 = vld [vmem:[#allocation2 + $0xd5] sm:$0xff]  ;;  %v1421_v51 = vld [vmem:[#allocation2 + $0xdd] sm:$0xff] }
 0x148   : > { %8614 = vmatmul.mubr.bf16.gmra.mrb[24].mxu1 %v1433_v2  ;;  %v1412_v2 = vld [vmem:[#allocation2 + $0x95] sm:$0xff] }
 0x149   : > { %8617 = vmatprep.mubr.bf16.mxu1 %v1434_v29  ;;  %8650 = vmatpush3.bf16.msra.mxu1 %v10162_v1  ;;  %v1411_v1 = vld [vmem:[#allocation2 + $0x8d] sm:$0xff]  ;;  %v1414_v29 = vld [vmem:[#allocation2 + $0xa5] sm:$0xff] }
 0x14a   : > { %8651 = vmatprep.subr.bf16.mxu1 %v10163_v15  ;;  %v1438_v40 = vpack.c.bf16 %v1411_v1, %v1410_v41  ;;  %v1422_v41 = vld [vmem:[#allocation2 + $0xe5] sm:$0xff]  ;;  %v1423_v1 = vld [vmem:[#allocation2 + $0xed] sm:$0xff] }
 0x14d   : > { %8652 = vmatpush3.bf16.msra.mxu1 %v10163_v15  ;;  %v1413_v15 = vld [vmem:[#allocation2 + $0x9d] sm:$0xff] }
 0x14e   : > { %8653 = vmatprep.subr.bf16.mxu1 %v10164_v17  ;;  %v1439_v25 = vpack.c.bf16 %v1413_v15, %v1412_v2  ;;  %v1425_v2 = vld [vmem:[#allocation2 + $0xfd] sm:$0xff]  ;;  %v1426_v15 = vld [vmem:[#allocation2 + $0x105] sm:$0xff] }
 0x150   : > { %8618 = vmatmul.mubr.bf16.gmra.mrb[28].mxu1 %v1435_v63  ;;  %v1418_v63 = vld [vmem:[#allocation2 + $0xc5] sm:$0xff] }
 0x151   : > { %8621 = vmatprep.mubr.bf16.mxu1 %v1436_v16  ;;  %8654 = vmatpush3.bf16.msra.mxu1 %v10164_v17  ;;  %v1415_v17 = vld [vmem:[#allocation2 + $0xad] sm:$0xff]  ;;  %v1441_v16 = vpack.c.bf16 %v1417_v21, %v1416_v61  ;;  %v1428_v21 = vld [vmem:[#allocation2 + $0x115] sm:$0xff] }
 0x152   : > { %8655 = vmatprep.subr.bf16.mxu1 %v10165_v45  ;;  %v1440_v6 = vpack.c.bf16 %v1415_v17, %v1414_v29  ;;  %v1427_v29 = vld [vmem:[#allocation2 + $0x10d] sm:$0xff] }
 0x153   : > { %v1986_v61 = vld [vmem:[#allocation2 + $0xf] sm:$0xff] }
 0x155   : > { %8656 = vmatpush3.bf16.msra.mxu1 %v10165_v45  ;;  %v1419_v45 = vld [vmem:[#allocation2 + $0xcd] sm:$0xff] }
 0x156   : > { %8657 = vmatprep.subr.bf16.mxu1 %v10166_v8 }
 0x158   : > { %8622 = vmatmul.mubr.bf16.gmra.mrb[32].mxu1 %v1437_v38  ;;  %v1443_v38 = vpack.c.bf16 %v1421_v51, %v1420_v24  ;;  %v1988_v24 = vld [vmem:[#allocation2 + $0x1f] sm:$0xff]  ;;  %v1989_v51 = vld [vmem:[#allocation2 + $0x27] sm:$0xff] }
 0x159   : > { %8625 = vmatprep.mubr.bf16.mxu1 %v1438_v40  ;;  %8658 = vmatpush3.bf16.msra.mxu1 %v10166_v8  ;;  %v1442_v8 = vpack.c.bf16 %v1419_v45, %v1418_v63  ;;  %v1444_v40 = vpack.c.bf16 %v1423_v1, %v1422_v41  ;;  %v1429_v63 = vld [vmem:[#allocation2 + $0x11d] sm:$0xff]  ;;  %v1990_v41 = vld [vmem:[#allocation2 + $0x2f] sm:$0xff] }
 0x15a   : > { %8659 = vmatprep.subr.bf16.mxu1 %v10167_v42 }
 0x15d   : > { %8660 = vmatpush3.bf16.msra.mxu1 %v10167_v42  ;;  %v1424_v42 = vld [vmem:[#allocation2 + $0xf5] sm:$0xff] }
 0x15e   : > { %8697 = vmatprep.subr.bf16.mxu1 %v10168_v23  ;;  %v1445_v17 = vpack.c.bf16 %v1425_v2, %v1424_v42  ;;  %v10170_v42 = vld [vmem:[%s12413_s2 + $0xd0] sm:$0xff]  }
 0x15f   : > { %v1991_v2 = vld [vmem:[#allocation2 + $0x37] sm:$0xff] }
 0x160   : > { %8626 = vmatmul.mubr.bf16.gmra.mrb[36].mxu1 %v1439_v25  ;;  %v1446_v25 = vpack.c.bf16 %v1427_v29, %v1426_v15  ;;  %v1992_v15 = vld [vmem:[#allocation2 + $0x3f] sm:$0xff]  ;;  %v1993_v29 = vld [vmem:[#allocation2 + $0x47] sm:$0xff] }
 0x161   : > { %8629 = vmatprep.mubr.bf16.mxu1 %v1440_v6  ;;  %v1985_v6 = vld [vmem:[#allocation2 + $0x7] sm:$0xff] }
 0x162   : > { %v2021_v45 = vpack.c.bf16 %v1986_v61, %v1985_v6  ;;  %v10171_v6 = vld [vmem:[%s12413_s2 + $0xd8] sm:$0xff]   ;;  %v10172_v61 = vld [vmem:[%s12413_s2 + $0xe0] sm:$0xff]  }
 0x168   : > { %8630 = vmatmul.mubr.bf16.gmra.mrb[40].mxu1 %v1441_v16  ;;  %v1447_v16 = vpack.c.bf16 %v1429_v63, %v1428_v21  ;;  %v1995_v21 = vld [vmem:[#allocation2 + $0x57] sm:$0xff]  ;;  %v1996_v63 = vld [vmem:[#allocation2 + $0x5f] sm:$0xff] }
 0x169   : > { %8633 = vmatprep.mubr.bf16.mxu1 %v1442_v8  ;;  %v1987_v8 = vld [vmem:[#allocation2 + $0x17] sm:$0xff] }
 0x16a   : > { %v11722_v1 = vpack.c.bf16 %v1988_v24, %v1987_v8  ;;  %v11746_v8 = vpack.c.bf16 %v1996_v63, %v1995_v21  ;;  %v10173_v24 = vld [vmem:[%s12413_s2 + $0xe8] sm:$0xff]   ;;  %v2003_v21 = vld [vmem:[#allocation2 + $0x97] sm:$0xff]  ;;  %v2004_v63 = vld [vmem:[#allocation2 + $0x9f] sm:$0xff] }
 0x170   : > { %8634 = vmatmul.mubr.bf16.gmra.mrb[44].mxu1 %v1443_v38  ;;  %v10169_v38 = vld [vmem:[%s12413_s2 + $0xc8] sm:$0xff]  }
 0x171   : > { %8637 = vmatprep.mubr.bf16.mxu1 %v1444_v40  ;;  %v11727_v40 = vpack.c.bf16 %v1990_v41, %v1989_v51  ;;  %v10174_v41 = vld [vmem:[%s12413_s2 + $0xf0] sm:$0xff]  }
 0x178   : > { %8638 = vmatmul.mubr.bf16.gmra.mrb[48].mxu1 %v1445_v17  ;;  %v1994_v17 = vld [vmem:[#allocation2 + $0x4f] sm:$0xff] }
 0x179   : > { %8641 = vmatprep.mubr.bf16.mxu1 %v1446_v25  ;;  %v11734_v25 = vpack.c.bf16 %v1992_v15, %v1991_v2  ;;  %v2001_v2 = vld [vmem:[#allocation2 + $0x87] sm:$0xff]  ;;  %v2002_v15 = vld [vmem:[#allocation2 + $0x8f] sm:$0xff] }
 0x180   : > { %8642 = vmatmul.mubr.bf16.gmra.mrb[52].mxu1 %v1447_v16  ;;  %v1998_v16 = vld [vmem:[#allocation2 + $0x6f] sm:$0xff] }
 0x181   : > { %8661 = vmatprep.mubr.bf16.mxu1 %v2021_v45  ;;  %v1997_v45 = vld [vmem:[#allocation2 + $0x67] sm:$0xff] }
 0x182   : > { %v11751_v51 = vpack.c.bf16 %v1998_v16, %v1997_v45  ;;  %v2005_v45 = vld [vmem:[#allocation2 + $0xa7] sm:$0xff]  ;;  %v2006_v16 = vld [vmem:[#allocation2 + $0xaf] sm:$0xff] }
 0x188   : > { %8662 = vmatmul.mubr.bf16.vlgmr.msra.gmra.mrb[20].mxu1 %v11722_v1 }
 0x189   : > { %8698 = vmatpush3.bf16.msra.mxu1 %v10168_v23  ;;  %8665 = vmatprep.mubr.bf16.mxu1 %v11727_v40  ;;  %v11739_v23 = vpack.c.bf16 %v1994_v17, %v1993_v29  ;;  %v10175_v17 = vld [vmem:[%s12413_s2 + $0xf8] sm:$0xff]  }
 0x18a   : > { %8699 = vmatprep.subr.bf16.mxu1 %v10169_v38 }
 0x18d   : > { %8700 = vmatpush3.bf16.msra.mxu1 %v10169_v38  ;;  %v1999_v38 = vld [vmem:[#allocation2 + $0x77] sm:$0xff] }
 0x18e   : > { %8701 = vmatprep.subr.bf16.mxu1 %v10170_v42 }
 0x190   : > { %8666 = vmatmul.mubr.bf16.gmra.mrb[24].mxu1 %v11734_v25 }
 0x191   : > { %8669 = vmatprep.mubr.bf16.mxu1 %v11739_v23  ;;  %8702 = vmatpush3.bf16.msra.mxu1 %v10170_v42  ;;  %v2000_v42 = vld [vmem:[#allocation2 + $0x7f] sm:$0xff] }
 0x192   : > { %8703 = vmatprep.subr.bf16.mxu1 %v10171_v6  ;;  %v11758_v29 = vpack.c.bf16 %v2000_v42, %v1999_v38  ;;  %v11770_v38 = vpack.c.bf16 %v2006_v16, %v2005_v45  ;;  %v2007_v42 = vld [vmem:[#allocation2 + $0xb7] sm:$0xff]  ;;  %v2016_v45 = vld [vmem:[#allocation2 + $0xff] sm:$0xff]  ;;  %v2017_v16 = vld [vmem:[#allocation2 + $0x107] sm:$0xff] }
 0x193   : > { %v2037_v11 = vpack.c.bf16 %v2018_v10, %v2017_v16  ;;  %v10178_v10 = vld [vmem:[%s12413_s2 + $0x110] sm:$0xff]   ;;  %v2658_v16 = vld [vmem:[#allocation2 + $0x60] sm:$0xff] }
 0x195   : > { %8704 = vmatpush3.bf16.msra.mxu1 %v10171_v6  ;;  %v11763_v6 = vpack.c.bf16 %v2002_v15, %v2001_v2  ;;  %v2008_v2 = vld [vmem:[#allocation2 + $0xbf] sm:$0xff]  ;;  %v2010_v15 = vld [vmem:[#allocation2 + $0xcf] sm:$0xff] }
 0x196   : > { %8705 = vmatprep.subr.bf16.mxu1 %v10172_v61  ;;  %v2032_v49 = vpack.c.bf16 %v2008_v2, %v2007_v42  ;;  %v2019_v42 = vld [vmem:[#allocation2 + $0x117] sm:$0xff]  ;;  %v2020_v2 = vld [vmem:[#allocation2 + $0x11f] sm:$0xff] }
 0x198   : > { %8670 = vmatmul.mubr.bf16.gmra.mrb[28].mxu1 %v11746_v8 }
 0x199   : > { %8673 = vmatprep.mubr.bf16.mxu1 %v11751_v51  ;;  %8706 = vmatpush3.bf16.msra.mxu1 %v10172_v61  ;;  %v10176_v61 = vld [vmem:[%s12413_s2 + $0x100] sm:$0xff]  }
 0x19a   : > { %8707 = vmatprep.subr.bf16.mxu1 %v10173_v24 }
 0x19d   : > { %8708 = vmatpush3.bf16.msra.mxu1 %v10173_v24  ;;  %v2030_v24 = vpack.c.bf16 %v2004_v63, %v2003_v21  ;;  %v2035_v21 = vpack.c.bf16 %v2014_v9, %v2013_v4  ;;  %v2015_v63 = vld [vmem:[#allocation2 + $0xf7] sm:$0xff]  ;;  %v10177_v9 = vld [vmem:[%s12413_s2 + $0x108] sm:$0xff]  }
 0x19e   : > { %8709 = vmatprep.subr.bf16.mxu1 %v10174_v41  ;;  %v2036_v46 = vpack.c.bf16 %v2016_v45, %v2015_v63  ;;  %v10181_v4 = vld [vmem:[%s12413_s2 + $0x128] sm:$0xff]   ;;  %v2653_v63 = vld [vmem:[#allocation2 + $0x38] sm:$0xff]  ;;  %v2654_v45 = vld [vmem:[#allocation2 + $0x40] sm:$0xff] }
 0x1a0   : > { %8674 = vmatmul.mubr.bf16.gmra.mrb[32].mxu1 %v11758_v29 }
 0x1a1   : > { %8677 = vmatprep.mubr.bf16.mxu1 %v11763_v6  ;;  %8710 = vmatpush3.bf16.msra.mxu1 %v10174_v41  ;;  %v2009_v41 = vld [vmem:[#allocation2 + $0xc7] sm:$0xff] }
 0x1a2   : > { %8711 = vmatprep.subr.bf16.mxu1 %v10175_v17  ;;  %v2033_v57 = vpack.c.bf16 %v2010_v15, %v2009_v41  ;;  %v2038_v41 = vpack.c.bf16 %v2020_v2, %v2019_v42  ;;  %v2652_v15 = vld [vmem:[#allocation2 + $0x30] sm:$0xff]  ;;  %v10187_v2 = vld [vmem:[%s12413_s2 + $0x158] sm:$0xff]  }
 0x1a5   : > { %8712 = vmatpush3.bf16.msra.mxu1 %v10175_v17  ;;  %v2034_v17 = vpack.c.bf16 %v2012_v36, %v2011_v26  ;;  %v10179_v36 = vld [vmem:[%s12413_s2 + $0x118] sm:$0xff]   ;;  %v10180_v26 = vld [vmem:[%s12413_s2 + $0x120] sm:$0xff]  }
 0x1a6   : > { %8749 = vmatprep.subr.bf16.mxu1 %v10176_v61 }
 0x1a8   : > { %8678 = vmatmul.mubr.bf16.gmra.mrb[36].mxu1 %v2030_v24 }
 0x1a9   : > { %8681 = vmatprep.mubr.bf16.mxu1 %v11770_v38 }
 0x1b0   : > { %8682 = vmatmul.mubr.bf16.gmra.mrb[40].mxu1 %v2032_v49 }
 0x1b1   : > { %8685 = vmatprep.mubr.bf16.mxu1 %v2033_v57 }
 0x1b8   : > { %8686 = vmatmul.mubr.bf16.gmra.mrb[44].mxu1 %v2034_v17 }
 0x1b9   : > { %8689 = vmatprep.mubr.bf16.mxu1 %v2035_v21 }
 0x1c0   : > { %8690 = vmatmul.mubr.bf16.gmra.mrb[48].mxu1 %v2036_v46 }
 0x1c1   : > { %8693 = vmatprep.mubr.bf16.mxu1 %v2037_v11 }
 0x1c8   : > { %8694 = vmatmul.mubr.bf16.gmra.mrb[52].mxu1 %v2038_v41 }
 0x1c9   : > { %8713 = vmatprep.mubr.bf16.mxu1 %v11722_v1  ;;  %v10182_v1 = vld [vmem:[%s12413_s2 + $0x130] sm:$0xff]  }
 0x1d0   : > { %8714 = vmatmul.mubr.bf16.vlgmr.msra.gmra.mrb[20].mxu1 %v11727_v40  ;;  %v10183_v40 = vld [vmem:[%s12413_s2 + $0x138] sm:$0xff]  }
 0x1d1   : > { %8750 = vmatpush3.bf16.msra.mxu1 %v10176_v61  ;;  %8717 = vmatprep.mubr.bf16.mxu1 %v11734_v25  ;;  %v10184_v25 = vld [vmem:[%s12413_s2 + $0x140] sm:$0xff]  }
 0x1d2   : > { %8751 = vmatprep.subr.bf16.mxu1 %v10177_v9 }
 0x1d5   : > { %8752 = vmatpush3.bf16.msra.mxu1 %v10177_v9  ;;  %v10188_v9 = vld [vmem:[%s12413_s2 + $0x160] sm:$0xff]  }
 0x1d6   : > { %8753 = vmatprep.subr.bf16.mxu1 %v10178_v10 }
 0x1d8   : > { %8718 = vmatmul.mubr.bf16.gmra.mrb[24].mxu1 %v11739_v23  ;;  %v2351_v23 = vld [vmem:[#allocation2 + $0x127] sm:$0xff] }
 0x1d9   : > { %8721 = vmatprep.mubr.bf16.mxu1 %v11746_v8  ;;  %8754 = vmatpush3.bf16.msra.mxu1 %v10178_v10  ;;  %v2352_v8 = vld [vmem:[#allocation2 + $0x12f] sm:$0xff] }
 0x1da   : > { %8755 = vmatprep.subr.bf16.mxu1 %v10179_v36  ;;  %v2659_v10 = vld [vmem:[#allocation2 + $0x68] sm:$0xff] }
 0x1dd   : > { %8756 = vmatpush3.bf16.msra.mxu1 %v10179_v36  ;;  %v2660_v36 = vld [vmem:[#allocation2 + $0x70] sm:$0xff] }
 0x1de   : > { %8757 = vmatprep.subr.bf16.mxu1 %v10180_v26 }
 0x1e0   : > { %8722 = vmatmul.mubr.bf16.gmra.mrb[28].mxu1 %v11751_v51  ;;  %v2649_v51 = vld [vmem:[#allocation2 + $0x18] sm:$0xff] }
 0x1e1   : > { %8725 = vmatprep.mubr.bf16.mxu1 %v11758_v29  ;;  %8758 = vmatpush3.bf16.msra.mxu1 %v10180_v26  ;;  %v2650_v29 = vld [vmem:[#allocation2 + $0x20] sm:$0xff]  ;;  %v2661_v26 = vld [vmem:[#allocation2 + $0x78] sm:$0xff] }
 0x1e2   : > { %8759 = vmatprep.subr.bf16.mxu1 %v10181_v4  ;;  %v2685_v61 = vpack.c.bf16 %v2650_v29, %v2649_v51  ;;  %v2664_v51 = vld [vmem:[#allocation2 + $0x90] sm:$0xff]  ;;  %v2665_v29 = vld [vmem:[#allocation2 + $0x98] sm:$0xff] }
 0x1e5   : > { %8760 = vmatpush3.bf16.msra.mxu1 %v10181_v4  ;;  %v2662_v4 = vld [vmem:[#allocation2 + $0x80] sm:$0xff] }
 0x1e6   : > { %8761 = vmatprep.subr.bf16.mxu1 %v10182_v1 }
 0x1e8   : > { %8726 = vmatmul.mubr.bf16.gmra.mrb[32].mxu1 %v11763_v6  ;;  %v2370_v6 = vpack.c.bf16 %v2352_v8, %v2351_v23  ;;  %v10190_v23 = vld [vmem:[%s12413_s2 + $0x170] sm:$0xff]   ;;  %v2663_v8 = vld [vmem:[#allocation2 + $0x88] sm:$0xff] }
 0x1e9   : > { %8729 = vmatprep.mubr.bf16.mxu1 %v2030_v24  ;;  %8762 = vmatpush3.bf16.msra.mxu1 %v10182_v1  ;;  %v2651_v24 = vld [vmem:[#allocation2 + $0x28] sm:$0xff]  ;;  %v2690_v1 = vpack.c.bf16 %v2660_v36, %v2659_v10  ;;  %v2676_v10 = vld [vmem:[#allocation2 + $0xf0] sm:$0xff]  ;;  %v2677_v36 = vld [vmem:[#allocation2 + $0xf8] sm:$0xff] }
 0x1ea   : > { %8763 = vmatprep.subr.bf16.mxu1 %v10183_v40 }
 0x1ed   : > { %8764 = vmatpush3.bf16.msra.mxu1 %v10183_v40  ;;  %v10189_v40 = vld [vmem:[%s12413_s2 + $0x168] sm:$0xff]  }
 0x1ee   : > { %8801 = vmatprep.subr.bf16.mxu1 %v10184_v25 }
 0x1f0   : > { %8730 = vmatmul.mubr.bf16.gmra.mrb[36].mxu1 %v11770_v38  ;;  %v2686_v38 = vpack.c.bf16 %v2652_v15, %v2651_v24  ;;  %v10191_v24 = vld [vmem:[%s12413_s2 + $0x178] sm:$0xff]  }
 0x1f1   : > { %8733 = vmatprep.mubr.bf16.mxu1 %v2032_v49  ;;  %v2687_v49 = vpack.c.bf16 %v2654_v45, %v2653_v63  ;;  %v10192_v63 = vld [vmem:[%s12413_s2 + $0x180] sm:$0xff]   ;;  %v2667_v45 = vld [vmem:[#allocation2 + $0xa8] sm:$0xff] }
 0x1f8   : > { %8734 = vmatmul.mubr.bf16.gmra.mrb[40].mxu1 %v2033_v57  ;;  %v10185_v57 = vld [vmem:[%s12413_s2 + $0x148] sm:$0xff]  }
 0x1f9   : > { %8737 = vmatprep.mubr.bf16.mxu1 %v2034_v17  ;;  %v2656_v17 = vld [vmem:[#allocation2 + $0x50] sm:$0xff] }
 0x200   : > { %8738 = vmatmul.mubr.bf16.gmra.mrb[44].mxu1 %v2035_v21  ;;  %v2657_v21 = vld [vmem:[#allocation2 + $0x58] sm:$0xff] }
 0x201   : > { %8741 = vmatprep.mubr.bf16.mxu1 %v2036_v46  ;;  %v10186_v46 = vld [vmem:[%s12413_s2 + $0x150] sm:$0xff]  }
 0x208   : > { %8742 = vmatmul.mubr.bf16.gmra.mrb[48].mxu1 %v2037_v11  ;;  %v2655_v11 = vld [vmem:[#allocation2 + $0x48] sm:$0xff] }
 0x209   : > { %8745 = vmatprep.mubr.bf16.mxu1 %v2038_v41  ;;  %v2688_v42 = vpack.c.bf16 %v2656_v17, %v2655_v11  ;;  %v2689_v41 = vpack.c.bf16 %v2658_v16, %v2657_v21  ;;  %v2671_v17 = vld [vmem:[#allocation2 + $0xc8] sm:$0xff]  ;;  %v2672_v21 = vld [vmem:[#allocation2 + $0xd0] sm:$0xff]  ;;  %v2673_v16 = vld [vmem:[#allocation2 + $0xd8] sm:$0xff] }
 0x210   : > { %8746 = vmatmul.mubr.bf16.gmra.mrb[52].mxu1 %v2370_v6  ;;  %v2666_v6 = vld [vmem:[#allocation2 + $0xa0] sm:$0xff] }
 0x211   : > { %8765 = vmatprep.mubr.bf16.mxu1 %v2685_v61  ;;  %v2692_v61 = vpack.c.bf16 %v2664_v51, %v2663_v8  ;;  %v2693_v15 = vpack.c.bf16 %v2666_v6, %v2665_v29  ;;  %v2982_v29 = vld [vmem:[#allocation2 + $0x21] sm:$0xff]  ;;  %v2702_v6 = vpack.c.bf16 %v11685_v60, %v11691_v33  ;;  %v10194_v60 = vld [vmem:[%s12413_s2 + $0x190] sm:$0xff]  }
 0x212   : > { %v2988_v33 = vld [vmem:[#allocation2 + $0x51] sm:$0xff] }
 0x218   : > { %8766 = vmatmul.mubr.bf16.vlgmr.msra.gmra.mrb[20].mxu1 %v2686_v38  ;;  %v2668_v38 = vld [vmem:[#allocation2 + $0xb0] sm:$0xff] }
 0x219   : > { %8802 = vmatpush3.bf16.msra.mxu1 %v10184_v25  ;;  %8769 = vmatprep.mubr.bf16.mxu1 %v2687_v49  ;;  %v2691_v25 = vpack.c.bf16 %v2662_v4, %v2661_v26  ;;  %v2670_v49 = vld [vmem:[#allocation2 + $0xc0] sm:$0xff] }
 0x21a   : > { %8803 = vmatprep.subr.bf16.mxu1 %v10185_v57  ;;  %v2678_v26 = vld [vmem:[#allocation2 + $0x100] sm:$0xff] }
 0x21d   : > { %8804 = vmatpush3.bf16.msra.mxu1 %v10185_v57  ;;  %v2669_v57 = vld [vmem:[#allocation2 + $0xb8] sm:$0xff] }
 0x21e   : > { %8805 = vmatprep.subr.bf16.mxu1 %v10186_v46  ;;  %v2695_v11 = vpack.c.bf16 %v2670_v49, %v2669_v57  ;;  %v2985_v49 = vld [vmem:[#allocation2 + $0x39] sm:$0xff] }
 0x220   : > { %8770 = vmatmul.mubr.bf16.gmra.mrb[24].mxu1 %v2688_v42  ;;  %v2674_v42 = vld [vmem:[#allocation2 + $0xe0] sm:$0xff] }
 0x221   : > { %8773 = vmatprep.mubr.bf16.mxu1 %v2689_v41  ;;  %8806 = vmatpush3.bf16.msra.mxu1 %v10186_v46  ;;  %v2694_v46 = vpack.c.bf16 %v2668_v38, %v2667_v45  ;;  %v2697_v41 = vpack.c.bf16 %v2674_v42, %v2673_v16  ;;  %v2986_v45 = vld [vmem:[#allocation2 + $0x41] sm:$0xff]  ;;  %v2983_v38 = vld [vmem:[#allocation2 + $0x29] sm:$0xff]  ;;  %v2989_v16 = vld [vmem:[#allocation2 + $0x59] sm:$0xff] }
 0x222   : > { %8807 = vmatprep.subr.bf16.mxu1 %v10187_v2  ;;  %v10195_v42 = vld [vmem:[%s12413_s2 + $0x198] sm:$0xff]  }
 0x225   : > { %8808 = vmatpush3.bf16.msra.mxu1 %v10187_v2  ;;  %v2696_v2 = vpack.c.bf16 %v2672_v21, %v2671_v17  ;;  %v2987_v17 = vld [vmem:[#allocation2 + $0x49] sm:$0xff] }
 0x226   : > { %8809 = vmatprep.subr.bf16.mxu1 %v10188_v9  ;;  %v11845_v21 = vpack.c.bf16 %v2988_v33, %v2987_v17  ;;  %v3003_v33 = vld [vmem:[#allocation2 + $0xc9] sm:$0xff]  ;;  %v3005_v17 = vld [vmem:[#allocation2 + $0xd9] sm:$0xff] }
 0x228   : > { %8774 = vmatmul.mubr.bf16.gmra.mrb[28].mxu1 %v2690_v1  ;;  %v2699_v1 = vpack.c.bf16 %v2678_v26, %v2677_v36  ;;  %v2993_v26 = vld [vmem:[#allocation2 + $0x79] sm:$0xff] }
 0x229   : > { %8777 = vmatprep.mubr.bf16.mxu1 %v2691_v25  ;;  %8810 = vmatpush3.bf16.msra.mxu1 %v10188_v9  ;;  %v2675_v9 = vld [vmem:[#allocation2 + $0xe8] sm:$0xff]  ;;  %v2680_v25 = vld [vmem:[#allocation2 + $0x110] sm:$0xff] }
 0x22a   : > { %8811 = vmatprep.subr.bf16.mxu1 %v10189_v40  ;;  %v2698_v4 = vpack.c.bf16 %v2676_v10, %v2675_v9  ;;  %v2994_v9 = vld [vmem:[#allocation2 + $0x81] sm:$0xff]  ;;  %v2991_v10 = vld [vmem:[#allocation2 + $0x69] sm:$0xff] }
 0x22d   : > { %8812 = vmatpush3.bf16.msra.mxu1 %v10189_v40  ;;  %v2679_v40 = vld [vmem:[#allocation2 + $0x108] sm:$0xff] }
 0x22e   : > { %8813 = vmatprep.subr.bf16.mxu1 %v10190_v23  ;;  %v2700_v8 = vpack.c.bf16 %v2680_v25, %v2679_v40  ;;  %v10198_v40 = vld [vmem:[%s12413_s2 + $0x1b0] sm:$0xff]  }
 0x22f   : > { %v2996_v25 = vld [vmem:[#allocation2 + $0x91] sm:$0xff] }
 0x230   : > { %8778 = vmatmul.mubr.bf16.gmra.mrb[32].mxu1 %v2692_v61  ;;  %v2981_v61 = vld [vmem:[#allocation2 + $0x19] sm:$0xff] }
 0x231   : > { %8781 = vmatprep.mubr.bf16.mxu1 %v2693_v15  ;;  %8814 = vmatpush3.bf16.msra.mxu1 %v10190_v23  ;;  %v2682_v23 = vld [vmem:[#allocation2 + $0x120] sm:$0xff]  ;;  %v2984_v15 = vld [vmem:[#allocation2 + $0x31] sm:$0xff] }
 0x232   : > { %8815 = vmatprep.subr.bf16.mxu1 %v10191_v24  ;;  %v2701_v51 = vpack.c.bf16 %v2682_v23, %v11667_v19  ;;  %v11833_v57 = vpack.c.bf16 %v2984_v15, %v2983_v38  ;;  %v10193_v19 = vld [vmem:[%s12413_s2 + $0x188] sm:$0xff]   ;;  %v2997_v23 = vld [vmem:[#allocation2 + $0x99] sm:$0xff] }
 0x233   : > { %v2999_v15 = vld [vmem:[#allocation2 + $0xa9] sm:$0xff]  ;;  %v3001_v38 = vld [vmem:[#allocation2 + $0xb9] sm:$0xff] }
 0x235   : > { %8816 = vmatpush3.bf16.msra.mxu1 %v10191_v24  ;;  %v3017_v24 = vpack.c.bf16 %v2982_v29, %v2981_v61 }
 0x236   : > { %8853 = vmatprep.subr.bf16.mxu1 %v10192_v63 }
 0x238   : > { %8782 = vmatmul.mubr.bf16.gmra.mrb[36].mxu1 %v2694_v46  ;;  %v11838_v46 = vpack.c.bf16 %v2986_v45, %v2985_v49  ;;  %v3000_v45 = vld [vmem:[#allocation2 + $0xb1] sm:$0xff]  ;;  %v3002_v49 = vld [vmem:[#allocation2 + $0xc1] sm:$0xff] }
 0x239   : > { %8785 = vmatprep.mubr.bf16.mxu1 %v2695_v11  ;;  %v2990_v11 = vld [vmem:[#allocation2 + $0x61] sm:$0xff] }
 0x240   : > { %8786 = vmatmul.mubr.bf16.gmra.mrb[40].mxu1 %v2696_v2  ;;  %v10196_v2 = vld [vmem:[%s12413_s2 + $0x1a0] sm:$0xff]  }
 0x241   : > { %8789 = vmatprep.mubr.bf16.mxu1 %v2697_v41  ;;  %v2992_v41 = vld [vmem:[#allocation2 + $0x71] sm:$0xff] }
 0x242   : > { %v11857_v36 = vpack.c.bf16 %v2992_v41, %v2991_v10  ;;  %v3007_v41 = vld [vmem:[#allocation2 + $0xe9] sm:$0xff]  ;;  %v3009_v10 = vld [vmem:[#allocation2 + $0xf9] sm:$0xff] }
 0x248   : > { %8790 = vmatmul.mubr.bf16.gmra.mrb[44].mxu1 %v2698_v4  ;;  %v10197_v4 = vld [vmem:[%s12413_s2 + $0x1a8] sm:$0xff]  }
 0x249   : > { %8793 = vmatprep.mubr.bf16.mxu1 %v2699_v1  ;;  %v11862_v1 = vpack.c.bf16 %v2994_v9, %v2993_v26  ;;  %v3008_v9 = vld [vmem:[#allocation2 + $0xf1] sm:$0xff]  ;;  %v3010_v26 = vld [vmem:[#allocation2 + $0x101] sm:$0xff] }
 0x250   : > { %8794 = vmatmul.mubr.bf16.gmra.mrb[48].mxu1 %v2700_v8  ;;  %v2998_v8 = vld [vmem:[#allocation2 + $0xa1] sm:$0xff] }
 0x251   : > { %8797 = vmatprep.mubr.bf16.mxu1 %v2701_v51  ;;  %v2995_v51 = vld [vmem:[#allocation2 + $0x89] sm:$0xff]  ;;  %v11874_v61 = vpack.c.bf16 %v2998_v8, %v2997_v23  ;;  %v3012_v23 = vld [vmem:[#allocation2 + $0x111] sm:$0xff]  ;;  %v3013_v8 = vld [vmem:[#allocation2 + $0x119] sm:$0xff] }
 0x252   : > { %v11869_v29 = vpack.c.bf16 %v2996_v25, %v2995_v51  ;;  %v3011_v25 = vld [vmem:[#allocation2 + $0x109] sm:$0xff]  ;;  %v3014_v51 = vld [vmem:[#allocation2 + $0x121] sm:$0xff] }
 0x258   : > { %8798 = vmatmul.mubr.bf16.gmra.mrb[52].mxu1 %v2702_v6  ;;  %v10199_v6 = vld [vmem:[%s12413_s2 + $0x1b8] sm:$0xff]  }
 0x259   : > { %8817 = vmatprep.mubr.bf16.mxu1 %v3017_v24  ;;  %v10200_v24 = vld [vmem:[%s12413_s2 + $0x1c0] sm:$0xff]  }
 0x260   : > { %8818 = vmatmul.mubr.bf16.vlgmr.msra.gmra.mrb[20].mxu1 %v11833_v57 }
 0x261   : > { %8854 = vmatpush3.bf16.msra.mxu1 %v10192_v63  ;;  %8821 = vmatprep.mubr.bf16.mxu1 %v11838_v46  ;;  %v11850_v63 = vpack.c.bf16 %v2990_v11, %v2989_v16  ;;  %v3004_v11 = vld [vmem:[#allocation2 + $0xd1] sm:$0xff]  ;;  %v3006_v16 = vld [vmem:[#allocation2 + $0xe1] sm:$0xff] }
 0x262   : > { %8855 = vmatprep.subr.bf16.mxu1 %v10193_v19 }
 0x265   : > { %8856 = vmatpush3.bf16.msra.mxu1 %v10193_v19  ;;  %v3026_v19 = vpack.c.bf16 %v3000_v45, %v2999_v15  ;;  %v3033_v15 = vpack.c.bf16 %v3014_v51, %v3013_v8  ;;  %v3015_v45 = vld [vmem:[#allocation2 + $0x129] sm:$0xff] }
 0x266   : > { %8857 = vmatprep.subr.bf16.mxu1 %v10194_v60  ;;  %v3653_v51 = vld [vmem:[#allocation2 + $0x6a] sm:$0xff] }
 0x268   : > { %8822 = vmatmul.mubr.bf16.gmra.mrb[24].mxu1 %v11845_v21 }
 0x269   : > { %8825 = vmatprep.mubr.bf16.mxu1 %v11850_v63  ;;  %8858 = vmatpush3.bf16.msra.mxu1 %v10194_v60  ;;  %v11881_v60 = vpack.c.bf16 %v3002_v49, %v3001_v38  ;;  %v3016_v38 = vld [vmem:[#allocation2 + $0x131] sm:$0xff] }
 0x26a   : > { %8859 = vmatprep.subr.bf16.mxu1 %v10195_v42  ;;  %v3034_v49 = vpack.c.bf16 %v3016_v38, %v3015_v45  ;;  %v10216_v45 = vld [vmem:[%s12414_s3 + $0x40] sm:$0xff]   ;;  %v10217_v38 = vld [vmem:[%s12414_s3 + $0x48] sm:$0xff]  }
 0x26b   : > { %9009 = vmatprep.subr.bf16.mxu0 %v10216_v45 }
 0x26c   : > { %9010 = vmatpush3.bf16.msra.mxu0 %v10216_v45 }
 0x26d   : > { %8860 = vmatpush3.bf16.msra.mxu1 %v10195_v42  ;;  %v3028_v42 = vpack.c.bf16 %v3004_v11, %v3003_v33  ;;  %v10201_v33 = vld [vmem:[%s12413_s2 + $0x1c8] sm:$0xff]   ;;  %v10202_v11 = vld [vmem:[%s12413_s2 + $0x1d0] sm:$0xff]   ;;  %9011 = vmatprep.subr.bf16.mxu0 %v10217_v38 }
 0x26e   : > { %8861 = vmatprep.subr.bf16.mxu1 %v10196_v2 }
 0x270   : > { %8826 = vmatmul.mubr.bf16.gmra.mrb[28].mxu1 %v11857_v36  ;;  %9012 = vmatpush3.bf16.msra.mxu0 %v10217_v38  ;;  %v3671_v38 = vld [vmem:[#allocation2 + $0xfa] sm:$0xff] }
 0x271   : > { %8829 = vmatprep.mubr.bf16.mxu1 %v11862_v1  ;;  %8862 = vmatpush3.bf16.msra.mxu1 %v10196_v2  ;;  %v3029_v2 = vpack.c.bf16 %v3006_v16, %v3005_v17  ;;  %v3645_v17 = vld [vmem:[#allocation2 + $0x2a] sm:$0xff] }
 0x272   : > { %8863 = vmatprep.subr.bf16.mxu1 %v10197_v4 }
 0x275   : > { %8864 = vmatpush3.bf16.msra.mxu1 %v10197_v4  ;;  %v3030_v4 = vpack.c.bf16 %v3008_v9, %v3007_v41  ;;  %v3648_v41 = vld [vmem:[#allocation2 + $0x42] sm:$0xff]  ;;  %v3650_v9 = vld [vmem:[#allocation2 + $0x52] sm:$0xff] }
 0x276   : > { %8865 = vmatprep.subr.bf16.mxu1 %v10198_v40 }
 0x278   : > { %8830 = vmatmul.mubr.bf16.gmra.mrb[32].mxu1 %v11869_v29 }
 0x279   : > { %8833 = vmatprep.mubr.bf16.mxu1 %v11874_v61  ;;  %8866 = vmatpush3.bf16.msra.mxu1 %v10198_v40  ;;  %v3031_v40 = vpack.c.bf16 %v3010_v26, %v3009_v10  ;;  %v3647_v10 = vld [vmem:[#allocation2 + $0x3a] sm:$0xff] }
 0x27a   : > { %8867 = vmatprep.subr.bf16.mxu1 %v10199_v6  ;;  %v3682_v26 = vpack.c.bf16 %v3648_v41, %v3647_v10  ;;  %v10220_v41 = vld [vmem:[%s12414_s3 + $0x60] sm:$0xff]   ;;  %v10215_v10 = vld [vmem:[%s12413_s2 + $0x238] sm:$0xff]  }
 0x27d   : > { %8868 = vmatpush3.bf16.msra.mxu1 %v10199_v6  ;;  %v3032_v6 = vpack.c.bf16 %v3012_v23, %v3011_v25  ;;  %v3654_v25 = vld [vmem:[#allocation2 + $0x72] sm:$0xff]  ;;  %v3651_v23 = vld [vmem:[#allocation2 + $0x5a] sm:$0xff] }
 0x27e   : > { %8905 = vmatprep.subr.bf16.mxu1 %v10200_v24 }
 0x280   : > { %8834 = vmatmul.mubr.bf16.gmra.mrb[36].mxu1 %v3026_v19 }
 0x281   : > { %8837 = vmatprep.mubr.bf16.mxu1 %v11881_v60 }
 0x288   : > { %8838 = vmatmul.mubr.bf16.gmra.mrb[40].mxu1 %v3028_v42 }
 0x289   : > { %8841 = vmatprep.mubr.bf16.mxu1 %v3029_v2 }
 0x290   : > { %8842 = vmatmul.mubr.bf16.gmra.mrb[44].mxu1 %v3030_v4 }
 0x291   : > { %8845 = vmatprep.mubr.bf16.mxu1 %v3031_v40 }
 0x298   : > { %8846 = vmatmul.mubr.bf16.gmra.mrb[48].mxu1 %v3032_v6 }
 0x299   : > { %8849 = vmatprep.mubr.bf16.mxu1 %v3033_v15 }
 0x2a0   : > { %8850 = vmatmul.mubr.bf16.gmra.mrb[52].mxu1 %v3034_v49 }
 0x2a1   : > { %8869 = vmatprep.mubr.bf16.mxu1 %v11833_v57  ;;  %v10203_v57 = vld [vmem:[%s12413_s2 + $0x1d8] sm:$0xff]  }
 0x2a8   : > { %8870 = vmatmul.mubr.bf16.vlgmr.msra.gmra.mrb[20].mxu1 %v11838_v46  ;;  %v10204_v46 = vld [vmem:[%s12413_s2 + $0x1e0] sm:$0xff]  }
 0x2a9   : > { %8906 = vmatpush3.bf16.msra.mxu1 %v10200_v24  ;;  %8873 = vmatprep.mubr.bf16.mxu1 %v11845_v21  ;;  %v10205_v21 = vld [vmem:[%s12413_s2 + $0x1e8] sm:$0xff]  }
 0x2aa   : > { %8907 = vmatprep.subr.bf16.mxu1 %v10201_v33 }
 0x2ad   : > { %8908 = vmatpush3.bf16.msra.mxu1 %v10201_v33  ;;  %v3656_v33 = vld [vmem:[#allocation2 + $0x82] sm:$0xff] }
 0x2ae   : > { %8909 = vmatprep.subr.bf16.mxu1 %v10202_v11 }
 0x2b0   : > { %8874 = vmatmul.mubr.bf16.gmra.mrb[24].mxu1 %v11850_v63  ;;  %v10206_v63 = vld [vmem:[%s12413_s2 + $0x1f0] sm:$0xff]  }
 0x2b1   : > { %8877 = vmatprep.mubr.bf16.mxu1 %v11857_v36  ;;  %8910 = vmatpush3.bf16.msra.mxu1 %v10202_v11  ;;  %v10207_v36 = vld [vmem:[%s12413_s2 + $0x1f8] sm:$0xff]  }
 0x2b2   : > { %8911 = vmatprep.subr.bf16.mxu1 %v10203_v57  ;;  %v3658_v11 = vld [vmem:[#allocation2 + $0x92] sm:$0xff] }
 0x2b5   : > { %8912 = vmatpush3.bf16.msra.mxu1 %v10203_v57  ;;  %v10218_v57 = vld [vmem:[%s12414_s3 + $0x50] sm:$0xff]  }
 0x2b6   : > { %8913 = vmatprep.subr.bf16.mxu1 %v10204_v46  ;;  %9013 = vmatprep.subr.bf16.mxu0 %v10218_v57 }
 0x2b7   : > { %9014 = vmatpush3.bf16.msra.mxu0 %v10218_v57 }
 0x2b8   : > { %8878 = vmatmul.mubr.bf16.gmra.mrb[28].mxu1 %v11862_v1  ;;  %v10208_v1 = vld [vmem:[%s12413_s2 + $0x200] sm:$0xff]  }
 0x2b9   : > { %8881 = vmatprep.mubr.bf16.mxu1 %v11869_v29  ;;  %8914 = vmatpush3.bf16.msra.mxu1 %v10204_v46  ;;  %v3347_v29 = vld [vmem:[#allocation2 + $0x139] sm:$0xff] }
 0x2ba   : > { %8915 = vmatprep.subr.bf16.mxu1 %v10205_v21  ;;  %v3655_v46 = vld [vmem:[#allocation2 + $0x7a] sm:$0xff] }
 0x2bd   : > { %8916 = vmatpush3.bf16.msra.mxu1 %v10205_v21  ;;  %v3686_v21 = vpack.c.bf16 %v3656_v33, %v3655_v46  ;;  %v3673_v33 = vld [vmem:[#allocation2 + $0x10a] sm:$0xff] }
 0x2be   : > { %8917 = vmatprep.subr.bf16.mxu1 %v10206_v63 }
 0x2c0   : > { %8882 = vmatmul.mubr.bf16.gmra.mrb[32].mxu1 %v11874_v61  ;;  %v3348_v61 = vld [vmem:[#allocation2 + $0x141] sm:$0xff] }
 0x2c1   : > { %8885 = vmatprep.mubr.bf16.mxu1 %v3026_v19  ;;  %8918 = vmatpush3.bf16.msra.mxu1 %v10206_v63  ;;  %v3366_v24 = vpack.c.bf16 %v3348_v61, %v3347_v29  ;;  %v3646_v19 = vld [vmem:[#allocation2 + $0x32] sm:$0xff]  ;;  %v3657_v63 = vld [vmem:[#allocation2 + $0x8a] sm:$0xff] }
 0x2c2   : > { %8919 = vmatprep.subr.bf16.mxu1 %v10207_v36  ;;  %v3681_v16 = vpack.c.bf16 %v3646_v19, %v3645_v17  ;;  %v10219_v29 = vld [vmem:[%s12414_s3 + $0x58] sm:$0xff]   ;;  %v10214_v61 = vld [vmem:[%s12413_s2 + $0x230] sm:$0xff]   ;;  %v3660_v19 = vld [vmem:[#allocation2 + $0xa2] sm:$0xff] }
 0x2c3   : > { %v3661_v17 = vld [vmem:[#allocation2 + $0xaa] sm:$0xff]  ;;  %9015 = vmatprep.subr.bf16.mxu0 %v10219_v29 }
 0x2c4   : > { %9016 = vmatpush3.bf16.msra.mxu0 %v10219_v29 }
 0x2c5   : > { %8920 = vmatpush3.bf16.msra.mxu1 %v10207_v36  ;;  %v10213_v36 = vld [vmem:[%s12413_s2 + $0x228] sm:$0xff]   ;;  %9017 = vmatprep.subr.bf16.mxu0 %v10220_v41 }
 0x2c6   : > { %8957 = vmatprep.subr.bf16.mxu1 %v10208_v1 }
 0x2c8   : > { %8886 = vmatmul.mubr.bf16.gmra.mrb[36].mxu1 %v11881_v60  ;;  %v3649_v60 = vld [vmem:[#allocation2 + $0x4a] sm:$0xff]  ;;  %9018 = vmatpush3.bf16.msra.mxu0 %v10220_v41 }
 0x2c9   : > { %8889 = vmatprep.mubr.bf16.mxu1 %v3028_v42  ;;  %v10209_v42 = vld [vmem:[%s12413_s2 + $0x208] sm:$0xff]  }
 0x2ca   : > { %v3977_v41 = vld [vmem:[#allocation2 + $0x2b] sm:$0xff] }
 0x2d0   : > { %8890 = vmatmul.mubr.bf16.gmra.mrb[40].mxu1 %v3029_v2  ;;  %v3683_v2 = vpack.c.bf16 %v3650_v9, %v3649_v60  ;;  %v3663_v60 = vld [vmem:[#allocation2 + $0xba] sm:$0xff] }
 0x2d1   : > { %8893 = vmatprep.mubr.bf16.mxu1 %v3030_v4  ;;  %v10210_v4 = vld [vmem:[%s12413_s2 + $0x210] sm:$0xff]  }
 0x2d8   : > { %8894 = vmatmul.mubr.bf16.gmra.mrb[44].mxu1 %v3031_v40  ;;  %v3652_v40 = vld [vmem:[#allocation2 + $0x62] sm:$0xff] }
 0x2d9   : > { %8897 = vmatprep.mubr.bf16.mxu1 %v3032_v6  ;;  %v3684_v8 = vpack.c.bf16 %v3652_v40, %v3651_v23  ;;  %v10211_v6 = vld [vmem:[%s12413_s2 + $0x218] sm:$0xff]  }
 0x2da   : > { %v3667_v23 = vld [vmem:[#allocation2 + $0xda] sm:$0xff] }
 0x2e0   : > { %8898 = vmatmul.mubr.bf16.gmra.mrb[48].mxu1 %v3033_v15  ;;  %v3685_v15 = vpack.c.bf16 %v3654_v25, %v3653_v51  ;;  %v3669_v51 = vld [vmem:[#allocation2 + $0xea] sm:$0xff] }
 0x2e1   : > { %8901 = vmatprep.mubr.bf16.mxu1 %v3034_v49  ;;  %v10212_v49 = vld [vmem:[%s12413_s2 + $0x220] sm:$0xff]  }
 0x2e8   : > { %8902 = vmatmul.mubr.bf16.gmra.mrb[52].mxu1 %v3366_v24  ;;  %v3659_v24 = vld [vmem:[#allocation2 + $0x9a] sm:$0xff] }
 0x2e9   : > { %8921 = vmatprep.mubr.bf16.mxu1 %v3681_v16  ;;  %v3662_v16 = vld [vmem:[#allocation2 + $0xb2] sm:$0xff]  ;;  %v3688_v9 = vpack.c.bf16 %v3660_v19, %v3659_v24  ;;  %v3679_v24 = vld [vmem:[#allocation2 + $0x13a] sm:$0xff]  ;;  %v3680_v19 = vld [vmem:[#allocation2 + $0x142] sm:$0xff] }
 0x2f0   : > { %8922 = vmatmul.mubr.bf16.vlgmr.msra.gmra.mrb[20].mxu1 %v3682_v26  ;;  %v3689_v26 = vpack.c.bf16 %v3662_v16, %v3661_v17  ;;  %v3698_v17 = vpack.c.bf16 %v3680_v19, %v3679_v24  ;;  %v3978_v16 = vld [vmem:[#allocation2 + $0x33] sm:$0xff]  ;;  %v3997_v24 = vld [vmem:[#allocation2 + $0xcb] sm:$0xff] }
 0x2f1   : > { %8958 = vmatpush3.bf16.msra.mxu1 %v10208_v1  ;;  %8925 = vmatprep.mubr.bf16.mxu1 %v3683_v2  ;;  %v3687_v1 = vpack.c.bf16 %v3658_v11, %v3657_v63  ;;  %v3665_v2 = vld [vmem:[#allocation2 + $0xca] sm:$0xff]  ;;  %v3674_v11 = vld [vmem:[#allocation2 + $0x112] sm:$0xff]  ;;  %v3676_v63 = vld [vmem:[#allocation2 + $0x122] sm:$0xff] }
 0x2f2   : > { %8959 = vmatprep.subr.bf16.mxu1 %v10209_v42  ;;  %v3695_v46 = vpack.c.bf16 %v3674_v11, %v3673_v33  ;;  %v3989_v33 = vld [vmem:[#allocation2 + $0x8b] sm:$0xff]  ;;  %v3998_v19 = vld [vmem:[#allocation2 + $0xd3] sm:$0xff] }
 0x2f5   : > { %8960 = vmatpush3.bf16.msra.mxu1 %v10209_v42  ;;  %v3664_v42 = vld [vmem:[#allocation2 + $0xc2] sm:$0xff] }
 0x2f6   : > { %8961 = vmatprep.subr.bf16.mxu1 %v10210_v4  ;;  %v3690_v40 = vpack.c.bf16 %v3664_v42, %v3663_v60  ;;  %v3979_v60 = vld [vmem:[#allocation2 + $0x3b] sm:$0xff] }
 0x2f8   : > { %8926 = vmatmul.mubr.bf16.gmra.mrb[24].mxu1 %v3684_v8  ;;  %v3668_v8 = vld [vmem:[#allocation2 + $0xe2] sm:$0xff] }
 0x2f9   : > { %8929 = vmatprep.mubr.bf16.mxu1 %v3685_v15  ;;  %8962 = vmatpush3.bf16.msra.mxu1 %v10210_v4  ;;  %v3666_v4 = vld [vmem:[#allocation2 + $0xd2] sm:$0xff]  ;;  %v3692_v15 = vpack.c.bf16 %v3668_v8, %v3667_v23  ;;  %v3983_v23 = vld [vmem:[#allocation2 + $0x5b] sm:$0xff] }
 0x2fa   : > { %8963 = vmatprep.subr.bf16.mxu1 %v10211_v6  ;;  %v3691_v25 = vpack.c.bf16 %v3666_v4, %v3665_v2  ;;  %v3981_v2 = vld [vmem:[#allocation2 + $0x4b] sm:$0xff] }
 0x2fd   : > { %8964 = vmatpush3.bf16.msra.mxu1 %v10211_v6  ;;  %v3670_v6 = vld [vmem:[#allocation2 + $0xf2] sm:$0xff] }
 0x2fe   : > { %8965 = vmatprep.subr.bf16.mxu1 %v10212_v49  ;;  %v3693_v45 = vpack.c.bf16 %v3670_v6, %v3669_v51  ;;  %v3985_v51 = vld [vmem:[#allocation2 + $0x6b] sm:$0xff] }
 0x300   : > { %8930 = vmatmul.mubr.bf16.gmra.mrb[28].mxu1 %v3686_v21  ;;  %v3675_v21 = vld [vmem:[#allocation2 + $0x11a] sm:$0xff] }
 0x301   : > { %8933 = vmatprep.mubr.bf16.mxu1 %v3687_v1  ;;  %8966 = vmatpush3.bf16.msra.mxu1 %v10212_v49  ;;  %v3672_v49 = vld [vmem:[#allocation2 + $0x102] sm:$0xff]  ;;  %v3678_v1 = vld [vmem:[#allocation2 + $0x132] sm:$0xff]  ;;  %v3696_v29 = vpack.c.bf16 %v3676_v63, %v3675_v21 }
 0x302   : > { %8967 = vmatprep.subr.bf16.mxu1 %v10213_v36  ;;  %v3694_v57 = vpack.c.bf16 %v3672_v49, %v3671_v38  ;;  %v3987_v38 = vld [vmem:[#allocation2 + $0x7b] sm:$0xff]  ;;  %v3993_v21 = vld [vmem:[#allocation2 + $0xab] sm:$0xff]  ;;  %v3994_v63 = vld [vmem:[#allocation2 + $0xb3] sm:$0xff] }
 0x305   : > { %8968 = vmatpush3.bf16.msra.mxu1 %v10213_v36  ;;  %v3677_v36 = vld [vmem:[#allocation2 + $0x12a] sm:$0xff] }
 0x306   : > { %8969 = vmatprep.subr.bf16.mxu1 %v10214_v61 }
 0x308   : > { %8934 = vmatmul.mubr.bf16.gmra.mrb[32].mxu1 %v3688_v9  ;;  %v4013_v9 = vpack.c.bf16 %v3978_v16, %v3977_v41  ;;  %v4023_v16 = vpack.c.bf16 %v3998_v19, %v3997_v24  ;;  %v3999_v41 = vld [vmem:[#allocation2 + $0xdb] sm:$0xff] }
 0x309   : > { %8937 = vmatprep.mubr.bf16.mxu1 %v3689_v26  ;;  %8970 = vmatpush3.bf16.msra.mxu1 %v10214_v61  ;;  %v3697_v61 = vpack.c.bf16 %v3678_v1, %v3677_v36  ;;  %v3982_v26 = vld [vmem:[#allocation2 + $0x53] sm:$0xff]  ;;  %v4021_v1 = vpack.c.bf16 %v3994_v63, %v3993_v21 }
 0x30a   : > { %8971 = vmatprep.subr.bf16.mxu1 %v10215_v10  ;;  %v4015_v4 = vpack.c.bf16 %v3982_v26, %v3981_v2  ;;  %v4002_v26 = vld [vmem:[#allocation2 + $0xf3] sm:$0xff]  ;;  %v4003_v2 = vld [vmem:[#allocation2 + $0xfb] sm:$0xff] }
 0x30b   : > { %v10222_v21 = vld [vmem:[%s12414_s3 + $0x70] sm:$0xff]   ;;  %v10223_v63 = vld [vmem:[%s12414_s3 + $0x78] sm:$0xff]  }
 0x30d   : > { %8972 = vmatpush3.bf16.msra.mxu1 %v10215_v10  ;;  %v3980_v10 = vld [vmem:[#allocation2 + $0x43] sm:$0xff] }
 0x30e   : > { %v4014_v42 = vpack.c.bf16 %v3980_v10, %v3979_v60  ;;  %v4001_v10 = vld [vmem:[#allocation2 + $0xeb] sm:$0xff] }
 0x310   : > { %8938 = vmatmul.mubr.bf16.gmra.mrb[36].mxu1 %v3690_v40  ;;  %v3984_v40 = vld [vmem:[#allocation2 + $0x63] sm:$0xff] }
 0x311   : > { %8941 = vmatprep.mubr.bf16.mxu1 %v3691_v25  ;;  %v3986_v25 = vld [vmem:[#allocation2 + $0x73] sm:$0xff]  ;;  %v4016_v8 = vpack.c.bf16 %v3984_v40, %v3983_v23  ;;  %v4005_v40 = vld [vmem:[#allocation2 + $0x10b] sm:$0xff] }
 0x312   : > { %v4017_v6 = vpack.c.bf16 %v3986_v25, %v3985_v51  ;;  %v4006_v25 = vld [vmem:[#allocation2 + $0x113] sm:$0xff]  ;;  %v4007_v51 = vld [vmem:[#allocation2 + $0x11b] sm:$0xff] }
 0x318   : > { %8942 = vmatmul.mubr.bf16.gmra.mrb[40].mxu1 %v3692_v15  ;;  %v3988_v15 = vld [vmem:[#allocation2 + $0x83] sm:$0xff] }
 0x319   : > { %8945 = vmatprep.mubr.bf16.mxu1 %v3693_v45  ;;  %v3990_v45 = vld [vmem:[#allocation2 + $0x93] sm:$0xff]  ;;  %v4018_v49 = vpack.c.bf16 %v3988_v15, %v3987_v38  ;;  %v4009_v15 = vld [vmem:[#allocation2 + $0x12b] sm:$0xff] }
 0x31a   : > { %v4019_v11 = vpack.c.bf16 %v3990_v45, %v3989_v33  ;;  %v4010_v45 = vld [vmem:[#allocation2 + $0x133] sm:$0xff]  ;;  %v4011_v33 = vld [vmem:[#allocation2 + $0x13b] sm:$0xff] }
 0x320   : > { %8946 = vmatmul.mubr.bf16.gmra.mrb[44].mxu1 %v3694_v57  ;;  %v3991_v57 = vld [vmem:[#allocation2 + $0x9b] sm:$0xff] }
 0x321   : > { %8949 = vmatprep.mubr.bf16.mxu1 %v3695_v46  ;;  %v3992_v46 = vld [vmem:[#allocation2 + $0xa3] sm:$0xff] }
 0x322   : > { %v4020_v36 = vpack.c.bf16 %v3992_v46, %v3991_v57  ;;  %v10221_v46 = vld [vmem:[%s12414_s3 + $0x68] sm:$0xff]  }
 0x323   : > { %9019 = vmatprep.subr.bf16.mxu0 %v10221_v46 }
 0x324   : > { %9020 = vmatpush3.bf16.msra.mxu0 %v10221_v46 }
 0x325   : > { %9021 = vmatprep.subr.bf16.mxu0 %v10222_v21 }
 0x328   : > { %8950 = vmatmul.mubr.bf16.gmra.mrb[48].mxu1 %v3696_v29  ;;  %v3995_v29 = vld [vmem:[#allocation2 + $0xbb] sm:$0xff]  ;;  %9022 = vmatpush3.bf16.msra.mxu0 %v10222_v21 }
 0x329   : > { %8953 = vmatprep.mubr.bf16.mxu1 %v3697_v61  ;;  %v3996_v61 = vld [vmem:[#allocation2 + $0xc3] sm:$0xff]  ;;  %9023 = vmatprep.subr.bf16.mxu0 %v10223_v63 }
 0x32c   : > { %9024 = vmatpush3.bf16.msra.mxu0 %v10223_v63 }
 0x330   : > { %8954 = vmatmul.mubr.bf16.gmra.mrb[52].mxu1 %v3698_v17  ;;  %v4022_v17 = vpack.c.bf16 %v3996_v61, %v3995_v29  ;;  %v10224_v29 = vld [vmem:[%s12414_s3] sm:$0xff]  }
 0x331   : > { %8973 = vmatprep.mubr.bf16.mxu1 %v4013_v9  ;;  %v4000_v9 = vld [vmem:[#allocation2 + $0xe3] sm:$0xff]  ;;  %9061 = vmatprep.subr.bf16.mxu0 %v10224_v29 }
 0x332   : > { %v4024_v60 = vpack.c.bf16 %v4000_v9, %v3999_v41 }
 0x338   : > { %8974 = vmatmul.mubr.bf16.vlgmr.msra.gmra.mrb[20].mxu1 %v4014_v42  ;;  %v4025_v42 = vpack.c.bf16 %v4002_v26, %v4001_v10 }
 0x339   : > { %8977 = vmatprep.mubr.bf16.mxu1 %v4015_v4  ;;  %v4004_v4 = vld [vmem:[#allocation2 + $0x103] sm:$0xff] }
 0x33a   : > { %v4026_v23 = vpack.c.bf16 %v4004_v4, %v4003_v2 }
 0x340   : > { %8978 = vmatmul.mubr.bf16.gmra.mrb[24].mxu1 %v4016_v8  ;;  %v4027_v8 = vpack.c.bf16 %v4006_v25, %v4005_v40 }
 0x341   : > { %8981 = vmatprep.mubr.bf16.mxu1 %v4017_v6  ;;  %v4008_v6 = vld [vmem:[#allocation2 + $0x123] sm:$0xff] }
 0x342   : > { %v4028_v38 = vpack.c.bf16 %v4008_v6, %v4007_v51 }
 0x348   : > { %8982 = vmatmul.mubr.bf16.gmra.mrb[28].mxu1 %v4018_v49  ;;  %v4029_v49 = vpack.c.bf16 %v4010_v45, %v4009_v15 }
 0x349   : > { %8985 = vmatprep.mubr.bf16.mxu1 %v4019_v11  ;;  %v4012_v11 = vld [vmem:[#allocation2 + $0x143] sm:$0xff] }
 0x34a   : > { %v4030_v57 = vpack.c.bf16 %v4012_v11, %v4011_v33 }
 0x350   : > { %8986 = vmatmul.mubr.bf16.gmra.mrb[32].mxu1 %v4020_v36  ;;  %v4487_v36 = vld [vmem:[#allocation2 + $0x6] sm:$0xff] }
 0x351   : > { %8989 = vmatprep.mubr.bf16.mxu1 %v4021_v1  ;;  %v4488_v1 = vld [vmem:[#allocation2 + $0xe] sm:$0xff] }
 0x352   : > { %v4523_v61 = vpack.c.bf16 %v4488_v1, %v4487_v36 }
 0x354   : > { %9025 = vmatprep.mubr.bf16.mxu0 %v4523_v61 }
 0x358   : > { %8990 = vmatmul.mubr.bf16.gmra.mrb[36].mxu1 %v4022_v17 }
 0x359   : > { %8993 = vmatprep.mubr.bf16.mxu1 %v4023_v16 }
 0x360   : > { %8994 = vmatmul.mubr.bf16.gmra.mrb[40].mxu1 %v4024_v60 }
 0x361   : > { %8997 = vmatprep.mubr.bf16.mxu1 %v4025_v42 }
 0x368   : > { %8998 = vmatmul.mubr.bf16.gmra.mrb[44].mxu1 %v4026_v23 }
 0x369   : > { %9001 = vmatprep.mubr.bf16.mxu1 %v4027_v8 }
 0x370   : > { %9002 = vmatmul.mubr.bf16.gmra.mrb[48].mxu1 %v4028_v38 }
 0x371   : > { %9005 = vmatprep.mubr.bf16.mxu1 %v4029_v49 }
 0x378   : > { %9006 = vmatmul.mubr.bf16.gmra.mrb[52].mxu1 %v4030_v57 }
 0x40b   : > { %v8975_v24 = vpop.f32.mrb[20].mxu1 }
 0x40c   : > { %v4311_v19 = vmax.f32 %v8975_v24, 0.0  ;;  %v4130_v17 = vpop.f32.mrb[21].mxu1 }
 0x40d   : > { %v4309_v16 = vmax.f32 %v4130_v17, 0.0  ;;  %v8976_v41 = vpop.f32.mrb[22].mxu1  ;;  %v10226_v17 = vld [vmem:[%s12414_s3 + $0x10] sm:$0xff]  }
 0x40e   : > { %v4347_v9 = vmul.f32 %v10713_v52, %v4311_v19  ;;  %v4312_v10 = vmax.f32 %v8976_v41, 0.0  ;;  %v4133_v26 = vpop.f32.mrb[23].mxu1 }
 0x40f   : > { %v4345_v60 = vmul.f32 %v10618_v18, %v4309_v16  ;;  %v4310_v42 = vmax.f32 %v4133_v26, 0.0 }
 0x410   : > { %4383 = vst [vmem:[#allocation2 + $0x28] sm:$0xff] %v4347_v9  ;;  %v4348_v2 = vmul.f32 %v10661_v34, %v4312_v10 }
 0x411   : > { %4381 = vst [vmem:[#allocation2 + $0x18] sm:$0xff] %v4345_v60  ;;  %v4346_v4 = vmul.f32 %v10601_v14, %v4310_v42  ;;  %v10227_v42 = vld [vmem:[%s12414_s3 + $0x18] sm:$0xff]  }
 0x412   : > { %4384 = vst [vmem:[#allocation2 + $0x30] sm:$0xff] %v4348_v2 }
 0x413   : > { %4382 = vst [vmem:[#allocation2 + $0x20] sm:$0xff] %v4346_v4  ;;  %v8979_v40 = vpop.f32.mrb[24].mxu1 }
 0x414   : > { %v4315_v25 = vmax.f32 %v8979_v40, 0.0  ;;  %v4146_v23 = vpop.f32.mrb[25].mxu1 }
 0x415   : > { %v4313_v8 = vmax.f32 %v4146_v23, 0.0  ;;  %v8980_v51 = vpop.f32.mrb[26].mxu1 }
 0x416   : > { %v4351_v52 = vmul.f32 %v10849_v47, %v4315_v25  ;;  %v4316_v6 = vmax.f32 %v8980_v51, 0.0  ;;  %v4149_v15 = vpop.f32.mrb[27].mxu1 }
 0x417   : > { %v4349_v18 = vmul.f32 %v10727_v56, %v4313_v8  ;;  %v4314_v45 = vmax.f32 %v4149_v15, 0.0  ;;  %v10225_v56 = vld [vmem:[%s12414_s3 + $0x8] sm:$0xff]  }
 0x418   : > { %4387 = vst [vmem:[#allocation2 + $0x48] sm:$0xff] %v4351_v52  ;;  %v4352_v34 = vmul.f32 %v10730_v58, %v4316_v6  ;;  %v4489_v49 = vld [vmem:[#allocation2 + $0x16] sm:$0xff]  ;;  %v10228_v52 = vld [vmem:[%s12414_s3 + $0x20] sm:$0xff]  }
 0x419   : > { %4385 = vst [vmem:[#allocation2 + $0x38] sm:$0xff] %v4349_v18  ;;  %v4350_v14 = vmul.f32 %v10718_v54, %v4314_v45  ;;  %v4492_v38 = vld [vmem:[#allocation2 + $0x2e] sm:$0xff] }
 0x41a   : > { %4388 = vst [vmem:[#allocation2 + $0x50] sm:$0xff] %v4352_v34  ;;  %v4490_v33 = vld [vmem:[#allocation2 + $0x1e] sm:$0xff]  ;;  %v4491_v11 = vld [vmem:[#allocation2 + $0x26] sm:$0xff] }
 0x41b   : > { %4386 = vst [vmem:[#allocation2 + $0x40] sm:$0xff] %v4350_v14  ;;  %v8983_v57 = vpop.f32.mrb[28].mxu1  ;;  %v4524_v46 = vpack.c.bf16 %v4490_v33, %v4489_v49  ;;  %v4525_v47 = vpack.c.bf16 %v4492_v38, %v4491_v11  ;;  %v10229_v49 = vld [vmem:[%s12414_s3 + $0x28] sm:$0xff]  }
 0x41c   : > { %v4319_v21 = vmax.f32 %v8983_v57, 0.0  ;;  %v4162_v63 = vpop.f32.mrb[29].mxu1 }
 0x41d   : > { %v4317_v36 = vmax.f32 %v4162_v63, 0.0  ;;  %v8984_v58 = vpop.f32.mrb[30].mxu1  ;;  %9026 = vmatmul.mubr.bf16.vlgmr.msra.gmra.mrb[20].mxu0 %v4524_v46  ;;  %v10230_v63 = vld [vmem:[%s12414_s3 + $0x30] sm:$0xff]  }
 0x41e   : > { %v4355_v54 = vmul.f32 %v10942_v0, %v4319_v21  ;;  %v4320_v1 = vmax.f32 %v8984_v58, 0.0  ;;  %9062 = vmatpush3.bf16.msra.mxu0 %v10224_v29  ;;  %v4165_v61 = vpop.f32.mrb[31].mxu1  ;;  %9029 = vmatprep.mubr.bf16.mxu0 %v4525_v47 }
 0x41f   : > { %v4353_v24 = vmul.f32 %v10859_v50, %v4317_v36  ;;  %v4318_v19 = vmax.f32 %v4165_v61, 0.0  ;;  %9063 = vmatprep.subr.bf16.mxu0 %v10225_v56  ;;  %v12637_v36 = vld [vmem:[#allocation3_spill] sm:$0xff] }
 0x420   : > { %4391 = vst [vmem:[#allocation2 + $0x68] sm:$0xff] %v4355_v54  ;;  %v4356_v16 = vmul.f32 %v10937_v30, %v4320_v1  ;;  %v4493_v0 = vld [vmem:[#allocation2 + $0x36] sm:$0xff] }
 0x421   : > { %4389 = vst [vmem:[#allocation2 + $0x58] sm:$0xff] %v4353_v24  ;;  %v4354_v41 = vmul.f32 %v10854_v48, %v4318_v19  ;;  %v4496_v9 = vld [vmem:[#allocation2 + $0x4e] sm:$0xff] }
 0x422   : > { %4392 = vst [vmem:[#allocation2 + $0x70] sm:$0xff] %v4356_v16  ;;  %v4494_v29 = vld [vmem:[#allocation2 + $0x3e] sm:$0xff]  ;;  %v4495_v10 = vld [vmem:[#allocation2 + $0x46] sm:$0xff]  ;;  %9064 = vmatpush3.bf16.msra.mxu0 %v10225_v56 }
 0x423   : > { %4390 = vst [vmem:[#allocation2 + $0x60] sm:$0xff] %v4354_v41  ;;  %v8987_v50 = vpop.f32.mrb[32].mxu1  ;;  %v4526_v26 = vpack.c.bf16 %v4494_v29, %v4493_v0  ;;  %v4527_v60 = vpack.c.bf16 %v4496_v9, %v4495_v10  ;;  %9065 = vmatprep.subr.bf16.mxu0 %v10226_v17  ;;  %v10231_v16 = vld [vmem:[%s12414_s3 + $0x38] sm:$0xff]  }
 0x424   : > { %v4323_v2 = vmax.f32 %v8987_v50, 0.0  ;;  %v4178_v30 = vpop.f32.mrb[33].mxu1 }
 0x425   : > { %v4321_v4 = vmax.f32 %v4178_v30, 0.0  ;;  %v8988_v40 = vpop.f32.mrb[34].mxu1  ;;  %9030 = vmatmul.mubr.bf16.gmra.mrb[24].mxu0 %v4526_v26  ;;  %v12638_v30 = vld [vmem:[#allocation4_spill] sm:$0xff] }
 0x426   : > { %v4359_v48 = vmul.f32 %v11551_v20, %v4323_v2  ;;  %v4324_v25 = vmax.f32 %v8988_v40, 0.0  ;;  %v4181_v23 = vpop.f32.mrb[35].mxu1  ;;  %9033 = vmatprep.mubr.bf16.mxu0 %v4527_v60  ;;  %9066 = vmatpush3.bf16.msra.mxu0 %v10226_v17 }
 0x427   : > { %v4357_v8 = vmul.f32 %v11056_v43, %v4321_v4  ;;  %v4322_v51 = vmax.f32 %v4181_v23, 0.0  ;;  %9067 = vmatprep.subr.bf16.mxu0 %v10227_v42 }
 0x428   : > { %4395 = vst [vmem:[#allocation2 + $0x88] sm:$0xff] %v4359_v48  ;;  %v4360_v6 = vmul.f32 %v11061_v27, %v4324_v25  ;;  %v4497_v20 = vld [vmem:[#allocation2 + $0x56] sm:$0xff] }
 0x429   : > { %4393 = vst [vmem:[#allocation2 + $0x78] sm:$0xff] %v4357_v8  ;;  %v4358_v15 = vmul.f32 %v10947_v31, %v4322_v51  ;;  %v4500_v18 = vld [vmem:[#allocation2 + $0x6e] sm:$0xff] }
 0x42a   : > { %4396 = vst [vmem:[#allocation2 + $0x90] sm:$0xff] %v4360_v6  ;;  %v4498_v45 = vld [vmem:[#allocation2 + $0x5e] sm:$0xff]  ;;  %v4499_v34 = vld [vmem:[#allocation2 + $0x66] sm:$0xff]  ;;  %9068 = vmatpush3.bf16.msra.mxu0 %v10227_v42 }
 0x42b   : > { %4394 = vst [vmem:[#allocation2 + $0x80] sm:$0xff] %v4358_v15  ;;  %v8991_v43 = vpop.f32.mrb[36].mxu1  ;;  %v4528_v14 = vpack.c.bf16 %v4498_v45, %v4497_v20  ;;  %v4529_v38 = vpack.c.bf16 %v4500_v18, %v4499_v34  ;;  %9069 = vmatprep.subr.bf16.mxu0 %v10228_v52  ;;  %v12011_v42 = vld [vmem:[%s12414_s3 + $0x80] sm:$0xff]  }
 0x42c   : > { %v4327_v33 = vmax.f32 %v8991_v43, 0.0  ;;  %v4194_v27 = vpop.f32.mrb[37].mxu1 }
 0x42d   : > { %v4325_v11 = vmax.f32 %v4194_v27, 0.0  ;;  %v8992_v57 = vpop.f32.mrb[38].mxu1  ;;  %9034 = vmatmul.mubr.bf16.gmra.mrb[28].mxu0 %v4528_v14 }
 0x42e   : > { %v4363_v31 = vmul.f32 %v11098_v55, %v4327_v33  ;;  %v4328_v46 = vmax.f32 %v8992_v57, 0.0  ;;  %v4197_v47 = vpop.f32.mrb[39].mxu1  ;;  %9037 = vmatprep.mubr.bf16.mxu0 %v4529_v38  ;;  %9070 = vmatpush3.bf16.msra.mxu0 %v10228_v52 }
 0x42f   : > { %v4361_v56 = vmul.f32 %v11630_v22, %v4325_v11  ;;  %v4326_v21 = vmax.f32 %v4197_v47, 0.0  ;;  %9071 = vmatprep.subr.bf16.mxu0 %v10229_v49 }
 0x430   : > { %4399 = vst [vmem:[#allocation2 + $0xa8] sm:$0xff] %v4363_v31  ;;  %v4364_v58 = vmul.f32 %v12637_v36, %v4328_v46  ;;  %v4501_v55 = vld [vmem:[#allocation2 + $0x76] sm:$0xff] }
 0x431   : > { %4397 = vst [vmem:[#allocation2 + $0x98] sm:$0xff] %v4361_v56  ;;  %v4362_v54 = vmul.f32 %v11618_v44, %v4326_v21  ;;  %v4504_v1 = vld [vmem:[#allocation2 + $0x8e] sm:$0xff] }
 0x432   : > { %4400 = vst [vmem:[#allocation2 + $0xb0] sm:$0xff] %v4364_v58  ;;  %v4502_v61 = vld [vmem:[#allocation2 + $0x7e] sm:$0xff]  ;;  %v4503_v24 = vld [vmem:[#allocation2 + $0x86] sm:$0xff]  ;;  %9072 = vmatpush3.bf16.msra.mxu0 %v10229_v49 }
 0x433   : > { %4398 = vst [vmem:[#allocation2 + $0xa0] sm:$0xff] %v4362_v54  ;;  %v8995_v22 = vpop.f32.mrb[40].mxu1  ;;  %v4530_v19 = vpack.c.bf16 %v4502_v61, %v4501_v55  ;;  %v4531_v17 = vpack.c.bf16 %v4504_v1, %v4503_v24  ;;  %9073 = vmatprep.subr.bf16.mxu0 %v10230_v63 }
 0x434   : > { %v4331_v41 = vmax.f32 %v8995_v22, 0.0  ;;  %v4210_v9 = vpop.f32.mrb[41].mxu1 }
 0x435   : > { %v4329_v0 = vmax.f32 %v4210_v9, 0.0  ;;  %v8996_v29 = vpop.f32.mrb[42].mxu1  ;;  %9038 = vmatmul.mubr.bf16.gmra.mrb[32].mxu0 %v4530_v19 }
 0x436   : > { %v4367_v44 = vmul.f32 %v11271_v7, %v4331_v41  ;;  %v4332_v10 = vmax.f32 %v8996_v29, 0.0  ;;  %v4213_v50 = vpop.f32.mrb[43].mxu1  ;;  %9041 = vmatprep.mubr.bf16.mxu0 %v4531_v17  ;;  %9074 = vmatpush3.bf16.msra.mxu0 %v10230_v63 }
 0x437   : > { %v4365_v26 = vmul.f32 %v11151_v28, %v4329_v0  ;;  %v4330_v60 = vmax.f32 %v4213_v50, 0.0  ;;  %9075 = vmatprep.subr.bf16.mxu0 %v10231_v16  ;;  %v12639_v50 = vld [vmem:[#allocation40_spill] sm:$0xff] }
 0x438   : > { %4403 = vst [vmem:[#allocation2 + $0xc8] sm:$0xff] %v4367_v44  ;;  %v4368_v2 = vmul.f32 %v11163_v35, %v4332_v10  ;;  %v4505_v40 = vld [vmem:[#allocation2 + $0x96] sm:$0xff] }
 0x439   : > { %4401 = vst [vmem:[#allocation2 + $0xb8] sm:$0xff] %v4365_v26  ;;  %v12015_v4 = vmul.f32 %v12638_v30, %v4330_v60  ;;  %v4508_v7 = vld [vmem:[#allocation2 + $0xae] sm:$0xff] }
 0x43a   : > { %4404 = vst [vmem:[#allocation2 + $0xd0] sm:$0xff] %v4368_v2  ;;  %v4506_v48 = vld [vmem:[#allocation2 + $0x9e] sm:$0xff]  ;;  %v4507_v25 = vld [vmem:[#allocation2 + $0xa6] sm:$0xff]  ;;  %9076 = vmatpush3.bf16.msra.mxu0 %v10231_v16  ;;  %v12640_v60 = vld [vmem:[#allocation35_spill] sm:$0xff] }
 0x43b   : > { %4402 = vst [vmem:[#allocation2 + $0xc0] sm:$0xff] %v12015_v4  ;;  %v8999_v28 = vpop.f32.mrb[44].mxu1  ;;  %v4532_v23 = vpack.c.bf16 %v4506_v48, %v4505_v40  ;;  %v4533_v8 = vpack.c.bf16 %v4508_v7, %v4507_v25  ;;  %9113 = vmatprep.subr.bf16.mxu0 %v12011_v42 }
 0x43c   : > { %v4335_v51 = vmax.f32 %v8999_v28, 0.0  ;;  %v4226_v52 = vpop.f32.mrb[45].mxu1 }
 0x43d   : > { %v4333_v35 = vmax.f32 %v4226_v52, 0.0  ;;  %v9000_v6 = vpop.f32.mrb[46].mxu1  ;;  %9042 = vmatmul.mubr.bf16.gmra.mrb[36].mxu0 %v4532_v23  ;;  %v4417_v23 = vld [vmem:[#allocation2 + $0x5] sm:$0xff] }
 0x43e   : > { %v4371_v15 = vmul.f32 %v11404_v39, %v4335_v51  ;;  %v4336_v18 = vmax.f32 %v9000_v6, 0.0  ;;  %v4229_v20 = vpop.f32.mrb[47].mxu1  ;;  %9045 = vmatprep.mubr.bf16.mxu0 %v4533_v8  ;;  %v4418_v8 = vld [vmem:[#allocation2 + $0xd] sm:$0xff] }
 0x43f   : > { %v12021_v45 = vmul.f32 %v11281_v62, %v4333_v35  ;;  %v4334_v34 = vmax.f32 %v4229_v20, 0.0  ;;  %v4453_v35 = vpack.c.bf16 %v4418_v8, %v4417_v23  ;;  %v4422_v20 = vld [vmem:[#allocation2 + $0x2d] sm:$0xff] }
 0x440   : > { %4407 = vst [vmem:[#allocation2 + $0xe8] sm:$0xff] %v4371_v15  ;;  %v12024_v43 = vmul.f32 %v11340_v53, %v4336_v18  ;;  %v4509_v39 = vld [vmem:[#allocation2 + $0xb6] sm:$0xff]  ;;  %v4421_v18 = vld [vmem:[#allocation2 + $0x25] sm:$0xff] }
 0x441   : > { %4405 = vst [vmem:[#allocation2 + $0xd8] sm:$0xff] %v12021_v45  ;;  %v12028_v14 = vmul.f32 %v11276_v5, %v4334_v34  ;;  %v4512_v38 = vld [vmem:[#allocation2 + $0xce] sm:$0xff]  ;;  %v4420_v15 = vld [vmem:[#allocation2 + $0x1d] sm:$0xff] }
 0x442   : > { %4408 = vst [vmem:[#allocation2 + $0xf0] sm:$0xff] %v12024_v43  ;;  %v4510_v49 = vld [vmem:[#allocation2 + $0xbe] sm:$0xff]  ;;  %v4511_v33 = vld [vmem:[#allocation2 + $0xc6] sm:$0xff]  ;;  %v4419_v34 = vld [vmem:[#allocation2 + $0x15] sm:$0xff] }
 0x443   : > { %4406 = vst [vmem:[#allocation2 + $0xe0] sm:$0xff] %v12028_v14  ;;  %v9003_v62 = vpop.f32.mrb[48].mxu1  ;;  %v4534_v27 = vpack.c.bf16 %v4510_v49, %v4509_v39  ;;  %v4535_v11 = vpack.c.bf16 %v4512_v38, %v4511_v33  ;;  %v5720_v53 = vpack.c.bf16 %v12028_v14, %v12021_v45  ;;  %v4454_v38 = vpack.c.bf16 %v4420_v15, %v4419_v34  ;;  %v10233_v39 = vld [vmem:[%s12414_s3 + $0x88] sm:$0xff]   ;;  %v10234_v33 = vld [vmem:[%s12414_s3 + $0x90] sm:$0xff]   ;;  %v6008_v14 = vld [vmem:[#allocation2 + $0x39] sm:$0xff] }
 0x444   : > { %v4339_v57 = vmax.f32 %v9003_v62, 0.0  ;;  %v4242_v31 = vpop.f32.mrb[49].mxu1  ;;  %v4455_v49 = vpack.c.bf16 %v4422_v20, %v4421_v18  ;;  %v4424_v62 = vld [vmem:[#allocation2 + $0x3d] sm:$0xff]  ;;  %v4439_v23 = vld [vmem:[#allocation2 + $0xb5] sm:$0xff] }
 0x445   : > { %v4337_v46 = vmax.f32 %v4242_v31, 0.0  ;;  %v9004_v47 = vpop.f32.mrb[50].mxu1  ;;  %9046 = vmatmul.mubr.bf16.gmra.mrb[40].mxu0 %v4534_v27  ;;  %v4425_v27 = vld [vmem:[#allocation2 + $0x45] sm:$0xff] }
 0x446   : > { %v12035_v5 = vmul.f32 %v11591_v32, %v4339_v57  ;;  %v4340_v56 = vmax.f32 %v9004_v47, 0.0  ;;  %v4245_v21 = vpop.f32.mrb[51].mxu1  ;;  %9049 = vmatprep.mubr.bf16.mxu0 %v4535_v11  ;;  %v4426_v11 = vld [vmem:[#allocation2 + $0x4d] sm:$0xff]  ;;  %v4423_v57 = vld [vmem:[#allocation2 + $0x35] sm:$0xff] }
 0x447   : > { %v12038_v63 = vmul.f32 %v11493_v3, %v4337_v46  ;;  %v4338_v36 = vmax.f32 %v4245_v21, 0.0  ;;  %v4456_v31 = vpack.c.bf16 %v4424_v62, %v4423_v57  ;;  %v10235_v46 = vld [vmem:[%s12414_s3 + $0x98] sm:$0xff]   ;;  %v4457_v47 = vpack.c.bf16 %v4426_v11, %v4425_v27  ;;  %v4429_v21 = vld [vmem:[#allocation2 + $0x65] sm:$0xff]  ;;  %v5009_v11 = vld [vmem:[#allocation2 + $0xf] sm:$0xff] }
 0x448   : > { %4411 = vst [vmem:[#allocation2 + $0x108] sm:$0xff] %v12035_v5  ;;  %v12042_v58 = vmul.f32 %v11567_v59, %v4340_v56  ;;  %v4513_v32 = vld [vmem:[#allocation2 + $0xd6] sm:$0xff]  ;;  %v5008_v27 = vld [vmem:[#allocation2 + $0x7] sm:$0xff] }
 0x449   : > { %4409 = vst [vmem:[#allocation2 + $0xf8] sm:$0xff] %v12038_v63  ;;  %v12046_v54 = vmul.f32 %v11464_v37, %v4338_v36  ;;  %v4516_v1 = vld [vmem:[#allocation2 + $0xee] sm:$0xff]  ;;  %v4428_v56 = vld [vmem:[#allocation2 + $0x5d] sm:$0xff] }
 0x44a   : > { %4412 = vst [vmem:[#allocation2 + $0x110] sm:$0xff] %v12042_v58  ;;  %v4514_v55 = vld [vmem:[#allocation2 + $0xde] sm:$0xff]  ;;  %v4515_v61 = vld [vmem:[#allocation2 + $0xe6] sm:$0xff]  ;;  %v5723_v3 = vpack.c.bf16 %v12042_v58, %v12035_v5  ;;  %v4443_v15 = vld [vmem:[#allocation2 + $0xd5] sm:$0xff] }
 0x44b   : > { %4410 = vst [vmem:[#allocation2 + $0x100] sm:$0xff] %v12046_v54  ;;  %v9007_v24 = vpop.f32.mrb[52].mxu1  ;;  %v4536_v22 = vpack.c.bf16 %v4514_v55, %v4513_v32  ;;  %v4537_v59 = vpack.c.bf16 %v4516_v1, %v4515_v61  ;;  %v5722_v19 = vpack.c.bf16 %v12046_v54, %v12038_v63  ;;  %v4430_v36 = vld [vmem:[#allocation2 + $0x6d] sm:$0xff]  ;;  %v4427_v1 = vld [vmem:[#allocation2 + $0x55] sm:$0xff] }
 0x44c   : > { %v4343_v17 = vmax.f32 %v9007_v24, 0.0  ;;  %v4258_v37 = vpop.f32.mrb[53].mxu1  ;;  %v4458_v32 = vpack.c.bf16 %v4428_v56, %v4427_v1  ;;  %v10237_v55 = vld [vmem:[%s12414_s3 + $0xa8] sm:$0xff]   ;;  %v4459_v61 = vpack.c.bf16 %v4430_v36, %v4429_v21  ;;  %v10238_v24 = vld [vmem:[%s12414_s3 + $0xb0] sm:$0xff]  }
 0x44d   : > { %v4341_v16 = vmax.f32 %v4258_v37, 0.0  ;;  %v9008_v41 = vpop.f32.mrb[54].mxu1  ;;  %9050 = vmatmul.mubr.bf16.gmra.mrb[44].mxu0 %v4536_v22  ;;  %v4432_v22 = vld [vmem:[#allocation2 + $0x7d] sm:$0xff]  ;;  %v4431_v37 = vld [vmem:[#allocation2 + $0x75] sm:$0xff]  ;;  %v5012_v56 = vld [vmem:[#allocation2 + $0x27] sm:$0xff] }
 0x44e   : > { %v12055_v9 = vmul.f32 %v11675_v13, %v4343_v17  ;;  %v4344_v0 = vmax.f32 %v9008_v41, 0.0  ;;  %v4261_v29 = vpop.f32.mrb[55].mxu1  ;;  %9053 = vmatprep.mubr.bf16.mxu0 %v4537_v59  ;;  %v4433_v59 = vld [vmem:[#allocation2 + $0x85] sm:$0xff]  ;;  %v4434_v17 = vld [vmem:[#allocation2 + $0x8d] sm:$0xff]  ;;  %v10239_v41 = vld [vmem:[%s12414_s3 + $0xb8] sm:$0xff]  }
 0x44f   : > { %v12058_v44 = vmul.f32 %v11644_v12, %v4341_v16  ;;  %v4342_v10 = vmax.f32 %v4261_v29, 0.0  ;;  %v4460_v16 = vpack.c.bf16 %v4432_v22, %v4431_v37  ;;  %v10240_v29 = vld [vmem:[%s12414_s3 + $0xc0] sm:$0xff]   ;;  %v5013_v21 = vld [vmem:[#allocation2 + $0x2f] sm:$0xff]  ;;  %v5010_v36 = vld [vmem:[#allocation2 + $0x17] sm:$0xff] }
 0x450   : > { %4415 = vst [vmem:[#allocation2 + $0x128] sm:$0xff] %v12055_v9  ;;  %v12062_v26 = vmul.f32 %v12639_v50, %v4344_v0  ;;  %v4517_v13 = vld [vmem:[#allocation2 + $0xf6] sm:$0xff]  ;;  %v4461_v0 = vpack.c.bf16 %v4434_v17, %v4433_v59  ;;  %v4437_v50 = vld [vmem:[#allocation2 + $0xa5] sm:$0xff] }
 0x451   : > { %4413 = vst [vmem:[#allocation2 + $0x118] sm:$0xff] %v12058_v44  ;;  %v12066_v2 = vmul.f32 %v12640_v60, %v4342_v10  ;;  %v4520_v30 = vld [vmem:[#allocation2 + $0x10e] sm:$0xff]  ;;  %v4436_v10 = vld [vmem:[#allocation2 + $0x9d] sm:$0xff] }
 0x452   : > { %4416 = vst [vmem:[#allocation2 + $0x130] sm:$0xff] %v12062_v26  ;;  %v4518_v7 = vld [vmem:[#allocation2 + $0xfe] sm:$0xff]  ;;  %v4519_v40 = vld [vmem:[#allocation2 + $0x106] sm:$0xff]  ;;  %v5725_v12 = vpack.c.bf16 %v12062_v26, %v12055_v9  ;;  %v5017_v59 = vld [vmem:[#allocation2 + $0x4f] sm:$0xff] }
 0x453   : > { %4414 = vst [vmem:[#allocation2 + $0x120] sm:$0xff] %v12066_v2  ;;  %v4538_v48 = vpack.c.bf16 %v4518_v7, %v4517_v13  ;;  %v4539_v25 = vpack.c.bf16 %v4520_v30, %v4519_v40  ;;  %v5724_v28 = vpack.c.bf16 %v12066_v2, %v12058_v44  ;;  %v4438_v60 = vld [vmem:[#allocation2 + $0xad] sm:$0xff]  ;;  %v4435_v30 = vld [vmem:[#allocation2 + $0x95] sm:$0xff]  ;;  %v4440_v40 = vld [vmem:[#allocation2 + $0xbd] sm:$0xff] }
 0x454   : > { %v4462_v13 = vpack.c.bf16 %v4436_v10, %v4435_v30  ;;  %v4463_v7 = vpack.c.bf16 %v4438_v60, %v4437_v50  ;;  %v4464_v8 = vpack.c.bf16 %v4440_v40, %v4439_v23  ;;  %v4448_v34 = vld [vmem:[#allocation2 + $0xfd] sm:$0xff]  ;;  %v5016_v22 = vld [vmem:[#allocation2 + $0x47] sm:$0xff]  ;;  %v5021_v50 = vld [vmem:[#allocation2 + $0x6f] sm:$0xff] }
 0x455   : > { %9054 = vmatmul.mubr.bf16.gmra.mrb[48].mxu0 %v4538_v48  ;;  %v4441_v48 = vld [vmem:[#allocation2 + $0xc5] sm:$0xff]  ;;  %v5014_v17 = vld [vmem:[#allocation2 + $0x37] sm:$0xff]  ;;  %v5025_v23 = vld [vmem:[#allocation2 + $0x8f] sm:$0xff] }
 0x456   : > { %9057 = vmatprep.mubr.bf16.mxu0 %v4539_v25  ;;  %v4442_v25 = vld [vmem:[#allocation2 + $0xcd] sm:$0xff]  ;;  %v5018_v60 = vld [vmem:[#allocation2 + $0x57] sm:$0xff]  ;;  %v6013_v44 = vld [vmem:[#allocation2 + $0x61] sm:$0xff] }
 0x457   : > { %v5020_v10 = vld [vmem:[#allocation2 + $0x67] sm:$0xff]  ;;  %v10246_v40 = vld [vmem:[%s12414_s3 + $0xf0] sm:$0xff]   ;;  %v6012_v9 = vld [vmem:[#allocation2 + $0x59] sm:$0xff] }
 0x458   : > { %v4521_v51 = vld [vmem:[#allocation2 + $0x116] sm:$0xff]  ;;  %v6006_v63 = vld [vmem:[#allocation2 + $0x29] sm:$0xff] }
 0x459   : > { %v10265_v5 = vld [vmem:[%s12414_s3 + $0x188] sm:$0xff]  }
 0x45a   : > { %v4522_v52 = vld [vmem:[#allocation2 + $0x11e] sm:$0xff]  ;;  %v6010_v26 = vld [vmem:[#allocation2 + $0x49] sm:$0xff] }
 0x45b   : > { %v4540_v6 = vpack.c.bf16 %v4522_v52, %v4521_v51  ;;  %v4465_v51 = vpack.c.bf16 %v4442_v25, %v4441_v48  ;;  %v4444_v52 = vld [vmem:[#allocation2 + $0xdd] sm:$0xff]  ;;  %v5024_v25 = vld [vmem:[#allocation2 + $0x87] sm:$0xff] }
 0x45c   : > { %v4466_v18 = vpack.c.bf16 %v4444_v52, %v4443_v15  ;;  %v4452_v57 = vld [vmem:[#allocation2 + $0x11d] sm:$0xff] }
 0x45d   : > { %9058 = vmatmul.mubr.bf16.gmra.mrb[52].mxu0 %v4540_v6  ;;  %v4446_v6 = vld [vmem:[#allocation2 + $0xed] sm:$0xff]  ;;  %v5023_v48 = vld [vmem:[#allocation2 + $0x7f] sm:$0xff] }
 0x45e   : > { %9077 = vmatprep.mubr.bf16.mxu0 %v4453_v35  ;;  %v4445_v35 = vld [vmem:[#allocation2 + $0xe5] sm:$0xff]  ;;  %v10247_v52 = vld [vmem:[%s12414_s3 + $0xf8] sm:$0xff]  }
 0x45f   : > { %v4467_v20 = vpack.c.bf16 %v4446_v6, %v4445_v35  ;;  %v12140_v35 = vpack.c.bf16 %v5025_v23, %v5024_v25  ;;  %v10248_v6 = vld [vmem:[%s12414_s3 + $0x100] sm:$0xff]   ;;  %v5675_v23 = vld [vmem:[#allocation2 + $0x30] sm:$0xff] }
 0x460   : > { %v5027_v15 = vld [vmem:[#allocation2 + $0x9f] sm:$0xff] }
 0x465   : > { %9078 = vmatmul.mubr.bf16.vlgmr.msra.gmra.mrb[20].mxu0 %v4454_v38  ;;  %v4449_v38 = vld [vmem:[#allocation2 + $0x105] sm:$0xff] }
 0x466   : > { %9114 = vmatpush3.bf16.msra.mxu0 %v12011_v42  ;;  %9081 = vmatprep.mubr.bf16.mxu0 %v4455_v49  ;;  %v10236_v42 = vld [vmem:[%s12414_s3 + $0xa0] sm:$0xff]   ;;  %v4447_v49 = vld [vmem:[#allocation2 + $0xf5] sm:$0xff] }
 0x467   : > { %9115 = vmatprep.subr.bf16.mxu0 %v10233_v39 }
 0x46a   : > { %9116 = vmatpush3.bf16.msra.mxu0 %v10233_v39  ;;  %v4450_v39 = vld [vmem:[#allocation2 + $0x10d] sm:$0xff] }
 0x46b   : > { %9117 = vmatprep.subr.bf16.mxu0 %v10234_v33  ;;  %v4469_v62 = vpack.c.bf16 %v4450_v39, %v4449_v38 }
 0x46d   : > { %9082 = vmatmul.mubr.bf16.gmra.mrb[24].mxu0 %v4456_v31  ;;  %v4451_v31 = vld [vmem:[#allocation2 + $0x115] sm:$0xff] }
 0x46e   : > { %9085 = vmatprep.mubr.bf16.mxu0 %v4457_v47  ;;  %9118 = vmatpush3.bf16.msra.mxu0 %v10234_v33  ;;  %v4468_v33 = vpack.c.bf16 %v4448_v34, %v4447_v49  ;;  %v4470_v47 = vpack.c.bf16 %v4452_v57, %v4451_v31  ;;  %v5026_v34 = vld [vmem:[#allocation2 + $0x97] sm:$0xff]  ;;  %v5031_v49 = vld [vmem:[#allocation2 + $0xbf] sm:$0xff] }
 0x46f   : > { %9119 = vmatprep.subr.bf16.mxu0 %v10235_v46  ;;  %v5053_v38 = vpack.c.bf16 %v5027_v15, %v5026_v34  ;;  %v5035_v31 = vld [vmem:[#allocation2 + $0xdf] sm:$0xff] }
 0x470   : > { %v5681_v34 = vld [vmem:[#allocation2 + $0x60] sm:$0xff] }
 0x472   : > { %9120 = vmatpush3.bf16.msra.mxu0 %v10235_v46  ;;  %v5044_v46 = vpack.c.bf16 %v5009_v11, %v5008_v27  ;;  %v5030_v27 = vld [vmem:[#allocation2 + $0xb7] sm:$0xff] }
 0x473   : > { %9121 = vmatprep.subr.bf16.mxu0 %v10236_v42  ;;  %v5055_v11 = vpack.c.bf16 %v5031_v49, %v5030_v27  ;;  %v5680_v49 = vld [vmem:[#allocation2 + $0x58] sm:$0xff]  ;;  %v10260_v27 = vld [vmem:[%s12414_s3 + $0x160] sm:$0xff]  }
 0x475   : > { %9086 = vmatmul.mubr.bf16.gmra.mrb[28].mxu0 %v4458_v32  ;;  %v10241_v32 = vld [vmem:[%s12414_s3 + $0xc8] sm:$0xff]  }
 0x476   : > { %9089 = vmatprep.mubr.bf16.mxu0 %v4459_v61  ;;  %9122 = vmatpush3.bf16.msra.mxu0 %v10236_v42  ;;  %v5011_v42 = vld [vmem:[#allocation2 + $0x1f] sm:$0xff]  ;;  %v10242_v61 = vld [vmem:[%s12414_s3 + $0xd0] sm:$0xff]  }
 0x477   : > { %9123 = vmatprep.subr.bf16.mxu0 %v10237_v55  ;;  %v12099_v1 = vpack.c.bf16 %v5011_v42, %v5010_v36  ;;  %v5034_v42 = vld [vmem:[#allocation2 + $0xd7] sm:$0xff]  ;;  %v5039_v36 = vld [vmem:[#allocation2 + $0xff] sm:$0xff] }
 0x47a   : > { %9124 = vmatpush3.bf16.msra.mxu0 %v10237_v55  ;;  %v12104_v55 = vpack.c.bf16 %v5013_v21, %v5012_v56  ;;  %v5057_v56 = vpack.c.bf16 %v5035_v31, %v5034_v42  ;;  %v5682_v31 = vld [vmem:[#allocation2 + $0x68] sm:$0xff] }
 0x47b   : > { %9125 = vmatprep.subr.bf16.mxu0 %v10238_v24  ;;  %v10261_v42 = vld [vmem:[%s12414_s3 + $0x168] sm:$0xff]  }
 0x47d   : > { %9090 = vmatmul.mubr.bf16.gmra.mrb[32].mxu0 %v4460_v16  ;;  %v10243_v16 = vld [vmem:[%s12414_s3 + $0xd8] sm:$0xff]  }
 0x47e   : > { %9093 = vmatprep.mubr.bf16.mxu0 %v4461_v0  ;;  %9126 = vmatpush3.bf16.msra.mxu0 %v10238_v24  ;;  %v5015_v24 = vld [vmem:[#allocation2 + $0x3f] sm:$0xff] }
 0x47f   : > { %9127 = vmatprep.subr.bf16.mxu0 %v10239_v41  ;;  %v12111_v37 = vpack.c.bf16 %v5015_v24, %v5014_v17  ;;  %v10244_v0 = vld [vmem:[%s12414_s3 + $0xe0] sm:$0xff]   ;;  %v5038_v24 = vld [vmem:[#allocation2 + $0xf7] sm:$0xff] }
 0x480   : > { %v5043_v17 = vld [vmem:[#allocation2 + $0x11f] sm:$0xff] }
 0x482   : > { %9128 = vmatpush3.bf16.msra.mxu0 %v10239_v41  ;;  %v12116_v41 = vpack.c.bf16 %v5017_v59, %v5016_v22  ;;  %v5059_v22 = vpack.c.bf16 %v5039_v36, %v5038_v24  ;;  %v5687_v36 = vld [vmem:[#allocation2 + $0x90] sm:$0xff] }
 0x483   : > { %9165 = vmatprep.subr.bf16.mxu0 %v10240_v29 }
 0x485   : > { %9094 = vmatmul.mubr.bf16.gmra.mrb[36].mxu0 %v4462_v13  ;;  %v10245_v13 = vld [vmem:[%s12414_s3 + $0xe8] sm:$0xff]  }
 0x486   : > { %9097 = vmatprep.mubr.bf16.mxu0 %v4463_v7  ;;  %v12128_v7 = vpack.c.bf16 %v5021_v50, %v5020_v10  ;;  %v10250_v10 = vld [vmem:[%s12414_s3 + $0x110] sm:$0xff]   ;;  %v10255_v50 = vld [vmem:[%s12414_s3 + $0x138] sm:$0xff]  }
 0x48d   : > { %9098 = vmatmul.mubr.bf16.gmra.mrb[40].mxu0 %v4464_v8  ;;  %v5022_v8 = vld [vmem:[#allocation2 + $0x77] sm:$0xff] }
 0x48e   : > { %9101 = vmatprep.mubr.bf16.mxu0 %v4465_v51  ;;  %v12135_v51 = vpack.c.bf16 %v5023_v48, %v5022_v8  ;;  %v5672_v48 = vld [vmem:[#allocation2 + $0x18] sm:$0xff]  ;;  %v5677_v8 = vld [vmem:[#allocation2 + $0x40] sm:$0xff] }
 0x495   : > { %9102 = vmatmul.mubr.bf16.gmra.mrb[44].mxu0 %v4466_v18  ;;  %v5028_v18 = vld [vmem:[#allocation2 + $0xa7] sm:$0xff] }
 0x496   : > { %9105 = vmatprep.mubr.bf16.mxu0 %v4467_v20  ;;  %v5029_v20 = vld [vmem:[#allocation2 + $0xaf] sm:$0xff] }
 0x497   : > { %v12147_v39 = vpack.c.bf16 %v5029_v20, %v5028_v18  ;;  %v10258_v18 = vld [vmem:[%s12414_s3 + $0x150] sm:$0xff]  }
 0x498   : > { %v5679_v20 = vld [vmem:[#allocation2 + $0x50] sm:$0xff] }
 0x49d   : > { %9106 = vmatmul.mubr.bf16.gmra.mrb[48].mxu0 %v4468_v33  ;;  %v5032_v33 = vld [vmem:[#allocation2 + $0xc7] sm:$0xff] }
 0x49e   : > { %9109 = vmatprep.mubr.bf16.mxu0 %v4469_v62  ;;  %v5033_v62 = vld [vmem:[#allocation2 + $0xcf] sm:$0xff] }
 0x49f   : > { %v5056_v57 = vpack.c.bf16 %v5033_v62, %v5032_v33  ;;  %v10259_v33 = vld [vmem:[%s12414_s3 + $0x158] sm:$0xff]   ;;  %v5712_v62 = vpack.c.bf16 %v5681_v34, %v5680_v49  ;;  %v10272_v49 = vld [vmem:[%s12414_s3 + $0x1c0] sm:$0xff]  }
 0x4a5   : > { %9110 = vmatmul.mubr.bf16.gmra.mrb[52].mxu0 %v4470_v47  ;;  %v5037_v47 = vld [vmem:[#allocation2 + $0xef] sm:$0xff] }
 0x4a6   : > { %9129 = vmatprep.mubr.bf16.mxu0 %v5044_v46  ;;  %v5036_v46 = vld [vmem:[#allocation2 + $0xe7] sm:$0xff] }
 0x4a7   : > { %v5058_v21 = vpack.c.bf16 %v5037_v47, %v5036_v46  ;;  %v5684_v47 = vld [vmem:[#allocation2 + $0x78] sm:$0xff] }
 0x4ad   : > { %9130 = vmatmul.mubr.bf16.vlgmr.msra.gmra.mrb[20].mxu0 %v12099_v1 }
 0x4ae   : > { %9166 = vmatpush3.bf16.msra.mxu0 %v10240_v29  ;;  %9133 = vmatprep.mubr.bf16.mxu0 %v12104_v55  ;;  %v5019_v29 = vld [vmem:[#allocation2 + $0x5f] sm:$0xff] }
 0x4af   : > { %9167 = vmatprep.subr.bf16.mxu0 %v10241_v32  ;;  %v12123_v30 = vpack.c.bf16 %v5019_v29, %v5018_v60  ;;  %v10249_v29 = vld [vmem:[%s12414_s3 + $0x108] sm:$0xff]   ;;  %v10256_v60 = vld [vmem:[%s12414_s3 + $0x140] sm:$0xff]  }
 0x4b2   : > { %9168 = vmatpush3.bf16.msra.mxu0 %v10241_v32  ;;  %v5040_v32 = vld [vmem:[#allocation2 + $0x107] sm:$0xff] }
 0x4b3   : > { %9169 = vmatprep.subr.bf16.mxu0 %v10242_v61 }
 0x4b5   : > { %9134 = vmatmul.mubr.bf16.gmra.mrb[24].mxu0 %v12111_v37 }
 0x4b6   : > { %9137 = vmatprep.mubr.bf16.mxu0 %v12116_v41  ;;  %9170 = vmatpush3.bf16.msra.mxu0 %v10242_v61  ;;  %v5041_v61 = vld [vmem:[#allocation2 + $0x10f] sm:$0xff] }
 0x4b7   : > { %9171 = vmatprep.subr.bf16.mxu0 %v10243_v16  ;;  %v5060_v59 = vpack.c.bf16 %v5041_v61, %v5040_v32  ;;  %v5689_v32 = vld [vmem:[#allocation2 + $0xa0] sm:$0xff]  ;;  %v5686_v61 = vld [vmem:[#allocation2 + $0x88] sm:$0xff] }
 0x4b8   : > { %v5715_v24 = vpack.c.bf16 %v5687_v36, %v5686_v61  ;;  %v6032_v61 = vld [vmem:[#allocation2 + $0xf9] sm:$0xff] }
 0x4ba   : > { %9172 = vmatpush3.bf16.msra.mxu0 %v10243_v16  ;;  %v5042_v16 = vld [vmem:[#allocation2 + $0x117] sm:$0xff] }
 0x4bb   : > { %9173 = vmatprep.subr.bf16.mxu0 %v10244_v0 }
 0x4bd   : > { %9138 = vmatmul.mubr.bf16.gmra.mrb[28].mxu0 %v12123_v30 }
 0x4be   : > { %9141 = vmatprep.mubr.bf16.mxu0 %v12128_v7  ;;  %9174 = vmatpush3.bf16.msra.mxu0 %v10244_v0  ;;  %v5061_v0 = vpack.c.bf16 %v5043_v17, %v5042_v16  ;;  %v10264_v16 = vld [vmem:[%s12414_s3 + $0x180] sm:$0xff]  }
 0x4bf   : > { %9175 = vmatprep.subr.bf16.mxu0 %v10245_v13 }
 0x4c2   : > { %9176 = vmatpush3.bf16.msra.mxu0 %v10245_v13  ;;  %v5375_v13 = vld [vmem:[#allocation2 + $0x12f] sm:$0xff] }
 0x4c3   : > { %9177 = vmatprep.subr.bf16.mxu0 %v10246_v40 }
 0x4c5   : > { %9142 = vmatmul.mubr.bf16.gmra.mrb[32].mxu0 %v12135_v51 }
 0x4c6   : > { %9145 = vmatprep.mubr.bf16.mxu0 %v12140_v35  ;;  %9178 = vmatpush3.bf16.msra.mxu0 %v10246_v40 }
 0x4c7   : > { %9179 = vmatprep.subr.bf16.mxu0 %v10247_v52 }
 0x4ca   : > { %9180 = vmatpush3.bf16.msra.mxu0 %v10247_v52 }
 0x4cb   : > { %9217 = vmatprep.subr.bf16.mxu0 %v10248_v6 }
 0x4cd   : > { %9146 = vmatmul.mubr.bf16.gmra.mrb[36].mxu0 %v5053_v38 }
 0x4ce   : > { %9149 = vmatprep.mubr.bf16.mxu0 %v12147_v39 }
 0x4d5   : > { %9150 = vmatmul.mubr.bf16.gmra.mrb[40].mxu0 %v5055_v11 }
 0x4d6   : > { %9153 = vmatprep.mubr.bf16.mxu0 %v5056_v57 }
 0x4dd   : > { %9154 = vmatmul.mubr.bf16.gmra.mrb[44].mxu0 %v5057_v56 }
 0x4de   : > { %9157 = vmatprep.mubr.bf16.mxu0 %v5058_v21 }
 0x4e5   : > { %9158 = vmatmul.mubr.bf16.gmra.mrb[48].mxu0 %v5059_v22 }
 0x4e6   : > { %9161 = vmatprep.mubr.bf16.mxu0 %v5060_v59 }
 0x4ed   : > { %9162 = vmatmul.mubr.bf16.gmra.mrb[52].mxu0 %v5061_v0 }
 0x4ee   : > { %9181 = vmatprep.mubr.bf16.mxu0 %v12099_v1  ;;  %v10251_v1 = vld [vmem:[%s12414_s3 + $0x118] sm:$0xff]  }
 0x4f5   : > { %9182 = vmatmul.mubr.bf16.vlgmr.msra.gmra.mrb[20].mxu0 %v12104_v55  ;;  %v10252_v55 = vld [vmem:[%s12414_s3 + $0x120] sm:$0xff]  }
 0x4f6   : > { %9218 = vmatpush3.bf16.msra.mxu0 %v10248_v6  ;;  %9185 = vmatprep.mubr.bf16.mxu0 %v12111_v37  ;;  %v10253_v37 = vld [vmem:[%s12414_s3 + $0x128] sm:$0xff]  }
 0x4f7   : > { %9219 = vmatprep.subr.bf16.mxu0 %v10249_v29  ;;  %v10257_v6 = vld [vmem:[%s12414_s3 + $0x148] sm:$0xff]  }
 0x4fa   : > { %9220 = vmatpush3.bf16.msra.mxu0 %v10249_v29  ;;  %v5692_v29 = vld [vmem:[#allocation2 + $0xb8] sm:$0xff] }
 0x4fb   : > { %9221 = vmatprep.subr.bf16.mxu0 %v10250_v10 }
 0x4fd   : > { %9186 = vmatmul.mubr.bf16.gmra.mrb[24].mxu0 %v12116_v41  ;;  %v10254_v41 = vld [vmem:[%s12414_s3 + $0x130] sm:$0xff]  }
 0x4fe   : > { %9189 = vmatprep.mubr.bf16.mxu0 %v12123_v30  ;;  %9222 = vmatpush3.bf16.msra.mxu0 %v10250_v10  ;;  %v5374_v30 = vld [vmem:[#allocation2 + $0x127] sm:$0xff] }
 0x4ff   : > { %9223 = vmatprep.subr.bf16.mxu0 %v10251_v1  ;;  %v5393_v40 = vpack.c.bf16 %v5375_v13, %v5374_v30  ;;  %v5690_v10 = vld [vmem:[#allocation2 + $0xa8] sm:$0xff] }
 0x500   : > { %v6005_v13 = vld [vmem:[#allocation2 + $0x21] sm:$0xff] }
 0x502   : > { %9224 = vmatpush3.bf16.msra.mxu0 %v10251_v1 }
 0x503   : > { %9225 = vmatprep.subr.bf16.mxu0 %v10252_v55 }
 0x505   : > { %9190 = vmatmul.mubr.bf16.gmra.mrb[28].mxu0 %v12128_v7  ;;  %v5673_v7 = vld [vmem:[#allocation2 + $0x20] sm:$0xff] }
 0x506   : > { %9193 = vmatprep.mubr.bf16.mxu0 %v12135_v51  ;;  %9226 = vmatpush3.bf16.msra.mxu0 %v10252_v55  ;;  %v5708_v25 = vpack.c.bf16 %v5673_v7, %v5672_v48  ;;  %v5674_v51 = vld [vmem:[#allocation2 + $0x28] sm:$0xff]  ;;  %v5718_v55 = vpack.c.bf16 %v12015_v4, %v5692_v29  ;;  %v6004_v4 = vld [vmem:[#allocation2 + $0x19] sm:$0xff] }
 0x507   : > { %9227 = vmatprep.subr.bf16.mxu0 %v10253_v37  ;;  %v5709_v52 = vpack.c.bf16 %v5675_v23, %v5674_v51  ;;  %v6040_v45 = vpack.c.bf16 %v6005_v13, %v6004_v4  ;;  %v10268_v7 = vld [vmem:[%s12414_s3 + $0x1a0] sm:$0xff]   ;;  %v6014_v23 = vld [vmem:[#allocation2 + $0x69] sm:$0xff]  ;;  %v10275_v4 = vld [vmem:[%s12414_s3 + $0x1d8] sm:$0xff]  }
 0x508   : > { %v6016_v48 = vld [vmem:[#allocation2 + $0x79] sm:$0xff]  ;;  %v10269_v51 = vld [vmem:[%s12414_s3 + $0x1a8] sm:$0xff]  }
 0x509   : > { %v6037_v29 = vld [vmem:[#allocation2 + $0x121] sm:$0xff] }
 0x50a   : > { %9228 = vmatpush3.bf16.msra.mxu0 %v10253_v37  ;;  %v5695_v37 = vld [vmem:[#allocation2 + $0xd0] sm:$0xff]  ;;  %v10276_v13 = vld [vmem:[%s12414_s3 + $0x1e0] sm:$0xff]  }
 0x50b   : > { %9229 = vmatprep.subr.bf16.mxu0 %v10254_v41 }
 0x50d   : > { %9194 = vmatmul.mubr.bf16.gmra.mrb[32].mxu0 %v12140_v35  ;;  %v5676_v35 = vld [vmem:[#allocation2 + $0x38] sm:$0xff] }
 0x50e   : > { %9197 = vmatprep.mubr.bf16.mxu0 %v5053_v38  ;;  %9230 = vmatpush3.bf16.msra.mxu0 %v10254_v41  ;;  %v5710_v15 = vpack.c.bf16 %v5677_v8, %v5676_v35  ;;  %v5678_v38 = vld [vmem:[#allocation2 + $0x48] sm:$0xff]  ;;  %v10270_v35 = vld [vmem:[%s12414_s3 + $0x1b0] sm:$0xff]  }
 0x50f   : > { %9231 = vmatprep.subr.bf16.mxu0 %v10255_v50  ;;  %v5694_v41 = vld [vmem:[#allocation2 + $0xc8] sm:$0xff] }
 0x512   : > { %9232 = vmatpush3.bf16.msra.mxu0 %v10255_v50  ;;  %v5719_v50 = vpack.c.bf16 %v5695_v37, %v5694_v41  ;;  %v6038_v37 = vld [vmem:[#allocation2 + $0x129] sm:$0xff]  ;;  %v6039_v41 = vld [vmem:[#allocation2 + $0x131] sm:$0xff] }
 0x513   : > { %9269 = vmatprep.subr.bf16.mxu0 %v10256_v60 }
 0x515   : > { %9198 = vmatmul.mubr.bf16.gmra.mrb[36].mxu0 %v12147_v39  ;;  %v5711_v39 = vpack.c.bf16 %v5679_v20, %v5678_v38  ;;  %v6018_v20 = vld [vmem:[#allocation2 + $0x89] sm:$0xff]  ;;  %v10271_v38 = vld [vmem:[%s12414_s3 + $0x1b8] sm:$0xff]  }
 0x516   : > { %9201 = vmatprep.mubr.bf16.mxu0 %v5055_v11  ;;  %v5683_v11 = vld [vmem:[#allocation2 + $0x70] sm:$0xff] }
 0x517   : > { %v5713_v46 = vpack.c.bf16 %v5683_v11, %v5682_v31  ;;  %v6022_v11 = vld [vmem:[#allocation2 + $0xa9] sm:$0xff] }
 0x51d   : > { %9202 = vmatmul.mubr.bf16.gmra.mrb[40].mxu0 %v5056_v57  ;;  %v5685_v57 = vld [vmem:[#allocation2 + $0x80] sm:$0xff] }
 0x51e   : > { %9205 = vmatprep.mubr.bf16.mxu0 %v5057_v56  ;;  %v5714_v56 = vpack.c.bf16 %v5685_v57, %v5684_v47  ;;  %v6028_v47 = vld [vmem:[#allocation2 + $0xd9] sm:$0xff] }
 0x525   : > { %9206 = vmatmul.mubr.bf16.gmra.mrb[44].mxu0 %v5058_v21  ;;  %v10262_v21 = vld [vmem:[%s12414_s3 + $0x170] sm:$0xff]  }
 0x526   : > { %9209 = vmatprep.mubr.bf16.mxu0 %v5059_v22  ;;  %v5688_v22 = vld [vmem:[#allocation2 + $0x98] sm:$0xff] }
 0x527   : > { %v5716_v17 = vpack.c.bf16 %v5689_v32, %v5688_v22  ;;  %v6031_v32 = vld [vmem:[#allocation2 + $0xf1] sm:$0xff]  ;;  %v6030_v22 = vld [vmem:[#allocation2 + $0xe9] sm:$0xff] }
 0x52d   : > { %9210 = vmatmul.mubr.bf16.gmra.mrb[48].mxu0 %v5060_v59  ;;  %v10263_v59 = vld [vmem:[%s12414_s3 + $0x178] sm:$0xff]  }
 0x52e   : > { %9213 = vmatprep.mubr.bf16.mxu0 %v5061_v0  ;;  %v5691_v0 = vld [vmem:[#allocation2 + $0xb0] sm:$0xff] }
 0x52f   : > { %v5717_v1 = vpack.c.bf16 %v5691_v0, %v5690_v10  ;;  %v6036_v0 = vld [vmem:[#allocation2 + $0x119] sm:$0xff]  ;;  %v6034_v10 = vld [vmem:[#allocation2 + $0x109] sm:$0xff] }
 0x535   : > { %9214 = vmatmul.mubr.bf16.gmra.mrb[52].mxu0 %v5393_v40  ;;  %v6015_v40 = vld [vmem:[#allocation2 + $0x71] sm:$0xff] }
 0x536   : > { %9233 = vmatprep.mubr.bf16.mxu0 %v5708_v25  ;;  %v6017_v25 = vld [vmem:[#allocation2 + $0x81] sm:$0xff]  ;;  %v12248_v8 = vpack.c.bf16 %v6015_v40, %v6014_v23  ;;  %v10282_v40 = vld [vmem:[%s12414_s3 + $0x210] sm:$0xff]  }
 0x537   : > { %v6677_v23 = vld [vmem:[#allocation2 + $0x72] sm:$0xff] }
 0x53d   : > { %9234 = vmatmul.mubr.bf16.vlgmr.msra.gmra.mrb[20].mxu0 %v5709_v52  ;;  %v12253_v52 = vpack.c.bf16 %v6017_v25, %v6016_v48  ;;  %v6674_v48 = vld [vmem:[#allocation2 + $0x5a] sm:$0xff]  ;;  %v6675_v25 = vld [vmem:[#allocation2 + $0x62] sm:$0xff] }
 0x53e   : > { %9270 = vmatpush3.bf16.msra.mxu0 %v10256_v60  ;;  %9237 = vmatprep.mubr.bf16.mxu0 %v5710_v15  ;;  %v5698_v60 = vld [vmem:[#allocation2 + $0xe8] sm:$0xff]  ;;  %v6020_v15 = vld [vmem:[#allocation2 + $0x99] sm:$0xff] }
 0x53f   : > { %9271 = vmatprep.subr.bf16.mxu0 %v10257_v6  ;;  %v5721_v30 = vpack.c.bf16 %v12024_v43, %v5698_v60  ;;  %v6007_v43 = vld [vmem:[#allocation2 + $0x31] sm:$0xff]  ;;  %v10273_v60 = vld [vmem:[%s12414_s3 + $0x1c8] sm:$0xff]  }
 0x540   : > { %v12224_v54 = vpack.c.bf16 %v6007_v43, %v6006_v63  ;;  %v10278_v43 = vld [vmem:[%s12414_s3 + $0x1f0] sm:$0xff]   ;;  %v6370_v63 = vld [vmem:[#allocation2 + $0x139] sm:$0xff] }
 0x542   : > { %9272 = vmatpush3.bf16.msra.mxu0 %v10257_v6  ;;  %v6019_v6 = vld [vmem:[#allocation2 + $0x91] sm:$0xff] }
 0x543   : > { %9273 = vmatprep.subr.bf16.mxu0 %v10258_v18  ;;  %v12260_v34 = vpack.c.bf16 %v6019_v6, %v6018_v20  ;;  %v10284_v6 = vld [vmem:[%s12414_s3 + $0x220] sm:$0xff]   ;;  %v6681_v20 = vld [vmem:[#allocation2 + $0x92] sm:$0xff] }
 0x545   : > { %9238 = vmatmul.mubr.bf16.gmra.mrb[24].mxu0 %v5711_v39 }
 0x546   : > { %9241 = vmatprep.mubr.bf16.mxu0 %v5712_v62  ;;  %9274 = vmatpush3.bf16.msra.mxu0 %v10258_v18  ;;  %v6021_v18 = vld [vmem:[#allocation2 + $0xa1] sm:$0xff]  ;;  %v6024_v62 = vld [vmem:[#allocation2 + $0xb9] sm:$0xff] }
 0x547   : > { %9275 = vmatprep.subr.bf16.mxu0 %v10259_v33  ;;  %v12265_v39 = vpack.c.bf16 %v6021_v18, %v6020_v15  ;;  %v6678_v15 = vld [vmem:[#allocation2 + $0x7a] sm:$0xff]  ;;  %v6679_v18 = vld [vmem:[#allocation2 + $0x82] sm:$0xff] }
 0x54a   : > { %9276 = vmatpush3.bf16.msra.mxu0 %v10259_v33  ;;  %v6023_v33 = vld [vmem:[#allocation2 + $0xb1] sm:$0xff] }
 0x54b   : > { %9277 = vmatprep.subr.bf16.mxu0 %v10260_v27  ;;  %v6049_v57 = vpack.c.bf16 %v6023_v33, %v6022_v11  ;;  %v10286_v33 = vld [vmem:[%s12414_s3 + $0x230] sm:$0xff]  }
 0x54c   : > { %v6685_v11 = vld [vmem:[#allocation2 + $0xb2] sm:$0xff] }
 0x54d   : > { %9242 = vmatmul.mubr.bf16.gmra.mrb[28].mxu0 %v5713_v46  ;;  %v6027_v46 = vld [vmem:[#allocation2 + $0xd1] sm:$0xff] }
 0x54e   : > { %9245 = vmatprep.mubr.bf16.mxu0 %v5714_v56  ;;  %9278 = vmatpush3.bf16.msra.mxu0 %v10260_v27  ;;  %v6025_v27 = vld [vmem:[#allocation2 + $0xc1] sm:$0xff]  ;;  %v6026_v56 = vld [vmem:[#allocation2 + $0xc9] sm:$0xff] }
 0x54f   : > { %9279 = vmatprep.subr.bf16.mxu0 %v10261_v42  ;;  %v12272_v31 = vpack.c.bf16 %v6025_v27, %v6024_v62  ;;  %v6682_v62 = vld [vmem:[#allocation2 + $0x9a] sm:$0xff]  ;;  %v6683_v27 = vld [vmem:[#allocation2 + $0xa2] sm:$0xff] }
 0x552   : > { %9280 = vmatpush3.bf16.msra.mxu0 %v10261_v42  ;;  %v6029_v42 = vld [vmem:[#allocation2 + $0xe1] sm:$0xff] }
 0x553   : > { %9281 = vmatprep.subr.bf16.mxu0 %v10262_v21  ;;  %v6052_v36 = vpack.c.bf16 %v6029_v42, %v6028_v47  ;;  %v6686_v42 = vld [vmem:[#allocation2 + $0xba] sm:$0xff] }
 0x555   : > { %9246 = vmatmul.mubr.bf16.gmra.mrb[32].mxu0 %v5715_v24  ;;  %v6033_v24 = vld [vmem:[#allocation2 + $0x101] sm:$0xff] }
 0x556   : > { %9249 = vmatprep.mubr.bf16.mxu0 %v5716_v17  ;;  %9282 = vmatpush3.bf16.msra.mxu0 %v10262_v21  ;;  %v6051_v21 = vpack.c.bf16 %v6027_v46, %v6026_v56  ;;  %v6054_v17 = vpack.c.bf16 %v6033_v24, %v6032_v61  ;;  %v10287_v46 = vld [vmem:[%s12414_s3 + $0x238] sm:$0xff]   ;;  %v6687_v56 = vld [vmem:[#allocation2 + $0xc2] sm:$0xff] }
 0x557   : > { %9283 = vmatprep.subr.bf16.mxu0 %v10263_v59  ;;  %v6690_v24 = vld [vmem:[#allocation2 + $0xda] sm:$0xff] }
 0x55a   : > { %9284 = vmatpush3.bf16.msra.mxu0 %v10263_v59  ;;  %v6053_v59 = vpack.c.bf16 %v6031_v32, %v6030_v22  ;;  %v6688_v32 = vld [vmem:[#allocation2 + $0xca] sm:$0xff]  ;;  %v6691_v22 = vld [vmem:[#allocation2 + $0xe2] sm:$0xff] }
 0x55b   : > { %9321 = vmatprep.subr.bf16.mxu0 %v10264_v16 }
 0x55d   : > { %9250 = vmatmul.mubr.bf16.gmra.mrb[36].mxu0 %v5717_v1 }
 0x55e   : > { %9253 = vmatprep.mubr.bf16.mxu0 %v5718_v55  ;;  %v6056_v55 = vpack.c.bf16 %v6037_v29, %v6036_v0  ;;  %v6694_v29 = vld [vmem:[#allocation2 + $0xfa] sm:$0xff] }
 0x565   : > { %9254 = vmatmul.mubr.bf16.gmra.mrb[40].mxu0 %v5719_v50  ;;  %v6057_v50 = vpack.c.bf16 %v6039_v41, %v6038_v37  ;;  %v6696_v37 = vld [vmem:[#allocation2 + $0x10a] sm:$0xff] }
 0x566   : > { %9257 = vmatprep.mubr.bf16.mxu0 %v5720_v53  ;;  %v6009_v53 = vld [vmem:[#allocation2 + $0x41] sm:$0xff] }
 0x567   : > { %v12229_v58 = vpack.c.bf16 %v6009_v53, %v6008_v14  ;;  %v10279_v14 = vld [vmem:[%s12414_s3 + $0x1f8] sm:$0xff]   ;;  %v10280_v53 = vld [vmem:[%s12414_s3 + $0x200] sm:$0xff]  }
 0x56d   : > { %9258 = vmatmul.mubr.bf16.gmra.mrb[44].mxu0 %v5721_v30  ;;  %v10274_v30 = vld [vmem:[%s12414_s3 + $0x1d0] sm:$0xff]  }
 0x56e   : > { %9261 = vmatprep.mubr.bf16.mxu0 %v5722_v19  ;;  %v6011_v19 = vld [vmem:[#allocation2 + $0x51] sm:$0xff] }
 0x56f   : > { %v12236_v2 = vpack.c.bf16 %v6011_v19, %v6010_v26  ;;  %v6673_v26 = vld [vmem:[#allocation2 + $0x52] sm:$0xff] }
 0x575   : > { %9262 = vmatmul.mubr.bf16.gmra.mrb[48].mxu0 %v5723_v3  ;;  %v10266_v3 = vld [vmem:[%s12414_s3 + $0x190] sm:$0xff]  }
 0x576   : > { %9265 = vmatprep.mubr.bf16.mxu0 %v5724_v28  ;;  %v12241_v28 = vpack.c.bf16 %v6013_v44, %v6012_v9  ;;  %v6670_v9 = vld [vmem:[#allocation2 + $0x3a] sm:$0xff]  ;;  %v6671_v44 = vld [vmem:[#allocation2 + $0x42] sm:$0xff] }
 0x57d   : > { %9266 = vmatmul.mubr.bf16.gmra.mrb[52].mxu0 %v5725_v12  ;;  %v10267_v12 = vld [vmem:[%s12414_s3 + $0x198] sm:$0xff]  }
 0x57e   : > { %9285 = vmatprep.mubr.bf16.mxu0 %v6040_v45  ;;  %v10277_v45 = vld [vmem:[%s12414_s3 + $0x1e8] sm:$0xff]  }
 0x585   : > { %9286 = vmatmul.mubr.bf16.vlgmr.msra.gmra.mrb[20].mxu0 %v12224_v54 }
 0x586   : > { %9322 = vmatpush3.bf16.msra.mxu0 %v10264_v16  ;;  %9289 = vmatprep.mubr.bf16.mxu0 %v12229_v58  ;;  %v6035_v16 = vld [vmem:[#allocation2 + $0x111] sm:$0xff] }
 0x587   : > { %9323 = vmatprep.subr.bf16.mxu0 %v10265_v5  ;;  %v6055_v1 = vpack.c.bf16 %v6035_v16, %v6034_v10  ;;  %v6692_v16 = vld [vmem:[#allocation2 + $0xea] sm:$0xff]  ;;  %v6695_v10 = vld [vmem:[#allocation2 + $0x102] sm:$0xff] }
 0x58a   : > { %9324 = vmatpush3.bf16.msra.mxu0 %v10265_v5 }
 0x58b   : > { %9325 = vmatprep.subr.bf16.mxu0 %v10266_v3 }
 0x58d   : > { %9290 = vmatmul.mubr.bf16.gmra.mrb[24].mxu0 %v12236_v2 }
 0x58e   : > { %9293 = vmatprep.mubr.bf16.mxu0 %v12241_v28  ;;  %9326 = vmatpush3.bf16.msra.mxu0 %v10266_v3  ;;  %v6668_v3 = vld [vmem:[#allocation2 + $0x2a] sm:$0xff] }
 0x58f   : > { %9327 = vmatprep.subr.bf16.mxu0 %v10267_v12 }
 0x592   : > { %9328 = vmatpush3.bf16.msra.mxu0 %v10267_v12  ;;  %v6672_v12 = vld [vmem:[#allocation2 + $0x4a] sm:$0xff] }
 0x593   : > { %9329 = vmatprep.subr.bf16.mxu0 %v10268_v7 }
 0x595   : > { %9294 = vmatmul.mubr.bf16.gmra.mrb[28].mxu0 %v12248_v8 }
 0x596   : > { %9297 = vmatprep.mubr.bf16.mxu0 %v12253_v52  ;;  %9330 = vmatpush3.bf16.msra.mxu0 %v10268_v7  ;;  %v6706_v7 = vpack.c.bf16 %v6673_v26, %v6672_v12  ;;  %v7007_v12 = vld [vmem:[#allocation2 + $0x63] sm:$0xff] }
 0x597   : > { %9331 = vmatprep.subr.bf16.mxu0 %v10269_v51 }
 0x59a   : > { %9332 = vmatpush3.bf16.msra.mxu0 %v10269_v51  ;;  %v6676_v51 = vld [vmem:[#allocation2 + $0x6a] sm:$0xff] }
 0x59b   : > { %9333 = vmatprep.subr.bf16.mxu0 %v10270_v35 }
 0x59d   : > { %9298 = vmatmul.mubr.bf16.gmra.mrb[32].mxu0 %v12260_v34 }
 0x59e   : > { %9301 = vmatprep.mubr.bf16.mxu0 %v12265_v39  ;;  %9334 = vmatpush3.bf16.msra.mxu0 %v10270_v35  ;;  %v6708_v35 = vpack.c.bf16 %v6677_v23, %v6676_v51  ;;  %v7011_v23 = vld [vmem:[#allocation2 + $0x83] sm:$0xff] }
 0x59f   : > { %9335 = vmatprep.subr.bf16.mxu0 %v10271_v38 }
 0x5a2   : > { %9336 = vmatpush3.bf16.msra.mxu0 %v10271_v38  ;;  %v6680_v38 = vld [vmem:[#allocation2 + $0x8a] sm:$0xff] }
 0x5a3   : > { %9373 = vmatprep.subr.bf16.mxu0 %v10272_v49 }
 0x5a5   : > { %9302 = vmatmul.mubr.bf16.gmra.mrb[36].mxu0 %v6049_v57 }
 0x5a6   : > { %9305 = vmatprep.mubr.bf16.mxu0 %v12272_v31 }
 0x5ad   : > { %9306 = vmatmul.mubr.bf16.gmra.mrb[40].mxu0 %v6051_v21 }
 0x5ae   : > { %9309 = vmatprep.mubr.bf16.mxu0 %v6052_v36 }
 0x5b5   : > { %9310 = vmatmul.mubr.bf16.gmra.mrb[44].mxu0 %v6053_v59 }
 0x5b6   : > { %9313 = vmatprep.mubr.bf16.mxu0 %v6054_v17 }
 0x5bd   : > { %9314 = vmatmul.mubr.bf16.gmra.mrb[48].mxu0 %v6055_v1 }
 0x5be   : > { %9317 = vmatprep.mubr.bf16.mxu0 %v6056_v55 }
 0x5c5   : > { %9318 = vmatmul.mubr.bf16.gmra.mrb[52].mxu0 %v6057_v50 }
 0x5c6   : > { %9337 = vmatprep.mubr.bf16.mxu0 %v12224_v54  ;;  %v6371_v54 = vld [vmem:[#allocation2 + $0x141] sm:$0xff] }
 0x5c7   : > { %v6389_v5 = vpack.c.bf16 %v6371_v54, %v6370_v63  ;;  %v7001_v63 = vld [vmem:[#allocation2 + $0x33] sm:$0xff]  ;;  %v7000_v54 = vld [vmem:[#allocation2 + $0x2b] sm:$0xff] }
 0x5cd   : > { %9338 = vmatmul.mubr.bf16.vlgmr.msra.gmra.mrb[20].mxu0 %v12229_v58  ;;  %v6669_v58 = vld [vmem:[#allocation2 + $0x32] sm:$0xff] }
 0x5ce   : > { %9374 = vmatpush3.bf16.msra.mxu0 %v10272_v49  ;;  %9341 = vmatprep.mubr.bf16.mxu0 %v12236_v2  ;;  %v6704_v19 = vpack.c.bf16 %v6669_v58, %v6668_v3  ;;  %v6705_v2 = vpack.c.bf16 %v6671_v44, %v6670_v9  ;;  %v6710_v49 = vpack.c.bf16 %v6681_v20, %v6680_v38  ;;  %v7002_v58 = vld [vmem:[#allocation2 + $0x3b] sm:$0xff]  ;;  %v7003_v3 = vld [vmem:[#allocation2 + $0x43] sm:$0xff]  ;;  %v7004_v44 = vld [vmem:[#allocation2 + $0x4b] sm:$0xff] }
 0x5cf   : > { %9375 = vmatprep.subr.bf16.mxu0 %v10273_v60  ;;  %v7037_v9 = vpack.c.bf16 %v7003_v3, %v7002_v58 }
 0x5d2   : > { %9376 = vmatpush3.bf16.msra.mxu0 %v10273_v60  ;;  %v6699_v60 = vld [vmem:[#allocation2 + $0x122] sm:$0xff] }
 0x5d3   : > { %9377 = vmatprep.subr.bf16.mxu0 %v10274_v30 }
 0x5d5   : > { %9342 = vmatmul.mubr.bf16.gmra.mrb[24].mxu0 %v12241_v28  ;;  %v10281_v28 = vld [vmem:[%s12414_s3 + $0x208] sm:$0xff]  }
 0x5d6   : > { %9345 = vmatprep.mubr.bf16.mxu0 %v12248_v8  ;;  %9378 = vmatpush3.bf16.msra.mxu0 %v10274_v30  ;;  %v6707_v8 = vpack.c.bf16 %v6675_v25, %v6674_v48  ;;  %v6700_v30 = vld [vmem:[#allocation2 + $0x12a] sm:$0xff]  ;;  %v7010_v25 = vld [vmem:[#allocation2 + $0x7b] sm:$0xff] }
 0x5d7   : > { %9379 = vmatprep.subr.bf16.mxu0 %v10275_v4  ;;  %v7041_v51 = vpack.c.bf16 %v7011_v23, %v7010_v25 }
 0x5da   : > { %9380 = vmatpush3.bf16.msra.mxu0 %v10275_v4  ;;  %v6701_v4 = vld [vmem:[#allocation2 + $0x132] sm:$0xff] }
 0x5db   : > { %9381 = vmatprep.subr.bf16.mxu0 %v10276_v13 }
 0x5dd   : > { %9346 = vmatmul.mubr.bf16.gmra.mrb[28].mxu0 %v12253_v52  ;;  %v10283_v52 = vld [vmem:[%s12414_s3 + $0x218] sm:$0xff]  }
 0x5de   : > { %9349 = vmatprep.mubr.bf16.mxu0 %v12260_v34  ;;  %9382 = vmatpush3.bf16.msra.mxu0 %v10276_v13  ;;  %v6709_v34 = vpack.c.bf16 %v6679_v18, %v6678_v15  ;;  %v7015_v15 = vld [vmem:[#allocation2 + $0xa3] sm:$0xff]  ;;  %v7017_v18 = vld [vmem:[#allocation2 + $0xb3] sm:$0xff] }
 0x5df   : > { %9383 = vmatprep.subr.bf16.mxu0 %v10277_v45 }
 0x5e2   : > { %9384 = vmatpush3.bf16.msra.mxu0 %v10277_v45  ;;  %v6720_v45 = vpack.c.bf16 %v6701_v4, %v6700_v30  ;;  %v12642_v4 = vld [vmem:[#allocation6_spill] sm:$0xff] }
 0x5e3   : > { %9385 = vmatprep.subr.bf16.mxu0 %v10278_v43 }
 0x5e5   : > { %9350 = vmatmul.mubr.bf16.gmra.mrb[32].mxu0 %v12265_v39  ;;  %v10285_v39 = vld [vmem:[%s12414_s3 + $0x228] sm:$0xff]  }
 0x5e6   : > { %9353 = vmatprep.mubr.bf16.mxu0 %v6049_v57  ;;  %9386 = vmatpush3.bf16.msra.mxu0 %v10278_v43  ;;  %v6711_v57 = vpack.c.bf16 %v6683_v27, %v6682_v62  ;;  %v6702_v43 = vld [vmem:[#allocation2 + $0x13a] sm:$0xff]  ;;  %v7020_v27 = vld [vmem:[#allocation2 + $0xcb] sm:$0xff] }
 0x5e7   : > { %9387 = vmatprep.subr.bf16.mxu0 %v10279_v14 }
 0x5ea   : > { %9388 = vmatpush3.bf16.msra.mxu0 %v10279_v14  ;;  %v6703_v14 = vld [vmem:[#allocation2 + $0x142] sm:$0xff] }
 0x5eb   : > { %9425 = vmatprep.subr.bf16.mxu0 %v10280_v53 }
 0x5ed   : > { %9354 = vmatmul.mubr.bf16.gmra.mrb[36].mxu0 %v12272_v31  ;;  %v6684_v31 = vld [vmem:[#allocation2 + $0xaa] sm:$0xff] }
 0x5ee   : > { %9357 = vmatprep.mubr.bf16.mxu0 %v6051_v21  ;;  %v6712_v47 = vpack.c.bf16 %v6685_v11, %v6684_v31  ;;  %v6689_v21 = vld [vmem:[#allocation2 + $0xd2] sm:$0xff]  ;;  %v7023_v31 = vld [vmem:[#allocation2 + $0xe3] sm:$0xff] }
 0x5ef   : > { %v6714_v61 = vpack.c.bf16 %v6689_v21, %v6688_v32  ;;  %v7026_v21 = vld [vmem:[#allocation2 + $0xfb] sm:$0xff]  ;;  %v7029_v32 = vld [vmem:[#allocation2 + $0x113] sm:$0xff] }
 0x5f5   : > { %9358 = vmatmul.mubr.bf16.gmra.mrb[40].mxu0 %v6052_v36  ;;  %v6713_v36 = vpack.c.bf16 %v6687_v56, %v6686_v42  ;;  %v7024_v42 = vld [vmem:[#allocation2 + $0xeb] sm:$0xff] }
 0x5f6   : > { %9361 = vmatprep.mubr.bf16.mxu0 %v6053_v59  ;;  %v6693_v59 = vld [vmem:[#allocation2 + $0xf2] sm:$0xff] }
 0x5f7   : > { %v6716_v0 = vpack.c.bf16 %v6693_v59, %v6692_v16  ;;  %v7030_v59 = vld [vmem:[#allocation2 + $0x11b] sm:$0xff]  ;;  %v7032_v16 = vld [vmem:[#allocation2 + $0x12b] sm:$0xff] }
 0x5fd   : > { %9362 = vmatmul.mubr.bf16.gmra.mrb[44].mxu0 %v6054_v17  ;;  %v6715_v17 = vpack.c.bf16 %v6691_v22, %v6690_v24  ;;  %v7028_v24 = vld [vmem:[#allocation2 + $0x10b] sm:$0xff] }
 0x5fe   : > { %9365 = vmatprep.mubr.bf16.mxu0 %v6055_v1  ;;  %v6697_v1 = vld [vmem:[#allocation2 + $0x112] sm:$0xff]  ;;  %v7050_v22 = vpack.c.bf16 %v7029_v32, %v7028_v24 }
 0x5ff   : > { %v6718_v41 = vpack.c.bf16 %v6697_v1, %v6696_v37  ;;  %v7034_v1 = vld [vmem:[#allocation2 + $0x13b] sm:$0xff] }
 0x605   : > { %9366 = vmatmul.mubr.bf16.gmra.mrb[48].mxu0 %v6056_v55  ;;  %v6717_v55 = vpack.c.bf16 %v6695_v10, %v6694_v29 }
 0x606   : > { %9369 = vmatprep.mubr.bf16.mxu0 %v6057_v50  ;;  %v6698_v50 = vld [vmem:[#allocation2 + $0x11a] sm:$0xff] }
 0x607   : > { %v6719_v13 = vpack.c.bf16 %v6699_v60, %v6698_v50  ;;  %v12641_v50 = vld [vmem:[#allocation8_spill] sm:$0xff] }
 0x60d   : > { %9370 = vmatmul.mubr.bf16.gmra.mrb[52].mxu0 %v6389_v5  ;;  %v7036_v5 = vpack.c.bf16 %v7001_v63, %v7000_v54 }
 0x60e   : > { %9389 = vmatprep.mubr.bf16.mxu0 %v6704_v19  ;;  %v7005_v19 = vld [vmem:[#allocation2 + $0x53] sm:$0xff] }
 0x60f   : > { %v7038_v26 = vpack.c.bf16 %v7005_v19, %v7004_v44  ;;  %v12645_v44 = vld [vmem:[#allocation16_spill] sm:$0xff] }
 0x615   : > { %9390 = vmatmul.mubr.bf16.vlgmr.msra.gmra.mrb[20].mxu0 %v6705_v2  ;;  %v7006_v2 = vld [vmem:[#allocation2 + $0x5b] sm:$0xff] }
 0x616   : > { %9426 = vmatpush3.bf16.msra.mxu0 %v10280_v53  ;;  %9393 = vmatprep.mubr.bf16.mxu0 %v6706_v7  ;;  %v6721_v53 = vpack.c.bf16 %v6703_v14, %v6702_v43  ;;  %v7039_v7 = vpack.c.bf16 %v7007_v12, %v7006_v2  ;;  %v12643_v14 = vld [vmem:[#allocation7_spill] sm:$0xff]  ;;  %v12646_v12 = vld [vmem:[#allocation12_spill] sm:$0xff] }
 0x617   : > { %9427 = vmatprep.subr.bf16.mxu0 %v10281_v28 }
 0x61a   : > { %9428 = vmatpush3.bf16.msra.mxu0 %v10281_v28  ;;  %v7009_v28 = vld [vmem:[#allocation2 + $0x73] sm:$0xff] }
 0x61b   : > { %9429 = vmatprep.subr.bf16.mxu0 %v10282_v40 }
 0x61d   : > { %9394 = vmatmul.mubr.bf16.gmra.mrb[24].mxu0 %v6707_v8  ;;  %v7013_v8 = vld [vmem:[#allocation2 + $0x93] sm:$0xff] }
 0x61e   : > { %9397 = vmatprep.mubr.bf16.mxu0 %v6708_v35  ;;  %9430 = vmatpush3.bf16.msra.mxu0 %v10282_v40  ;;  %v7008_v40 = vld [vmem:[#allocation2 + $0x6b] sm:$0xff] }
 0x61f   : > { %9431 = vmatprep.subr.bf16.mxu0 %v10283_v52  ;;  %v7040_v48 = vpack.c.bf16 %v7009_v28, %v7008_v40 }
 0x622   : > { %9432 = vmatpush3.bf16.msra.mxu0 %v10283_v52  ;;  %v7012_v52 = vld [vmem:[#allocation2 + $0x8b] sm:$0xff] }
 0x623   : > { %9433 = vmatprep.subr.bf16.mxu0 %v10284_v6  ;;  %v7042_v35 = vpack.c.bf16 %v7013_v8, %v7012_v52 }
 0x625   : > { %9398 = vmatmul.mubr.bf16.gmra.mrb[28].mxu0 %v6709_v34  ;;  %v7016_v34 = vld [vmem:[#allocation2 + $0xab] sm:$0xff] }
 0x626   : > { %9401 = vmatprep.mubr.bf16.mxu0 %v6710_v49  ;;  %9434 = vmatpush3.bf16.msra.mxu0 %v10284_v6  ;;  %v7014_v6 = vld [vmem:[#allocation2 + $0x9b] sm:$0xff]  ;;  %v7044_v38 = vpack.c.bf16 %v7017_v18, %v7016_v34  ;;  %v7019_v49 = vld [vmem:[#allocation2 + $0xc3] sm:$0xff] }
 0x627   : > { %9435 = vmatprep.subr.bf16.mxu0 %v10285_v39  ;;  %v7043_v20 = vpack.c.bf16 %v7015_v15, %v7014_v6  ;;  %v12649_v18 = vld [vmem:[#allocation24_spill] sm:$0xff] }
 0x62a   : > { %9436 = vmatpush3.bf16.msra.mxu0 %v10285_v39  ;;  %v7018_v39 = vld [vmem:[#allocation2 + $0xbb] sm:$0xff] }
 0x62b   : > { %9437 = vmatprep.subr.bf16.mxu0 %v10286_v33  ;;  %v7045_v62 = vpack.c.bf16 %v7019_v49, %v7018_v39 }
 0x62d   : > { %9402 = vmatmul.mubr.bf16.gmra.mrb[32].mxu0 %v6711_v57  ;;  %v7022_v57 = vld [vmem:[#allocation2 + $0xdb] sm:$0xff] }
 0x62e   : > { %9405 = vmatprep.mubr.bf16.mxu0 %v6712_v47  ;;  %9438 = vmatpush3.bf16.msra.mxu0 %v10286_v33  ;;  %v7021_v33 = vld [vmem:[#allocation2 + $0xd3] sm:$0xff]  ;;  %v7047_v47 = vpack.c.bf16 %v7023_v31, %v7022_v57 }
 0x62f   : > { %9439 = vmatprep.subr.bf16.mxu0 %v10287_v46  ;;  %v7046_v11 = vpack.c.bf16 %v7021_v33, %v7020_v27  ;;  %v12652_v31 = vld [vmem:[#allocation19_spill] sm:$0xff] }
 0x632   : > { %9440 = vmatpush3.bf16.msra.mxu0 %v10287_v46  ;;  %v7025_v46 = vld [vmem:[#allocation2 + $0xf3] sm:$0xff] }
 0x633   : > { %v7048_v56 = vpack.c.bf16 %v7025_v46, %v7024_v42 }
 0x635   : > { %9406 = vmatmul.mubr.bf16.gmra.mrb[36].mxu0 %v6713_v36  ;;  %v7027_v36 = vld [vmem:[#allocation2 + $0x103] sm:$0xff] }
 0x636   : > { %9409 = vmatprep.mubr.bf16.mxu0 %v6714_v61  ;;  %v7049_v61 = vpack.c.bf16 %v7027_v36, %v7026_v21  ;;  %v12653_v21 = vld [vmem:[#allocation32_spill] sm:$0xff] }
 0x63d   : > { %9410 = vmatmul.mubr.bf16.gmra.mrb[40].mxu0 %v6715_v17  ;;  %v7031_v17 = vld [vmem:[#allocation2 + $0x123] sm:$0xff] }
 0x63e   : > { %9413 = vmatprep.mubr.bf16.mxu0 %v6716_v0  ;;  %v7033_v0 = vld [vmem:[#allocation2 + $0x133] sm:$0xff]  ;;  %v7051_v29 = vpack.c.bf16 %v7031_v17, %v7030_v59 }
 0x63f   : > { %v7052_v10 = vpack.c.bf16 %v7033_v0, %v7032_v16  ;;  %v12655_v17 = vld [vmem:[#allocation31_spill] sm:$0xff] }
 0x645   : > { %9414 = vmatmul.mubr.bf16.gmra.mrb[44].mxu0 %v6717_v55  ;;  %v7035_v55 = vld [vmem:[#allocation2 + $0x143] sm:$0xff] }
 0x646   : > { %9417 = vmatprep.mubr.bf16.mxu0 %v6718_v41  ;;  %v7053_v37 = vpack.c.bf16 %v7035_v55, %v7034_v1 }
 0x64d   : > { %9418 = vmatmul.mubr.bf16.gmra.mrb[48].mxu0 %v6719_v13 }
 0x64e   : > { %9421 = vmatprep.mubr.bf16.mxu0 %v6720_v45 }
 0x655   : > { %9422 = vmatmul.mubr.bf16.gmra.mrb[52].mxu0 %v6721_v53 }
 0x656   : > { %9441 = vmatprep.mubr.bf16.mxu0 %v7036_v5  ;;  %v12644_v5 = vld [vmem:[#allocation5_spill] sm:$0xff] }
 0x65d   : > { %9442 = vmatmul.mubr.bf16.vlgmr.msra.gmra.mrb[20].mxu0 %v7037_v9 }
 0x65e   : > { %9445 = vmatprep.mubr.bf16.mxu0 %v7038_v26 }
 0x665   : > { %9446 = vmatmul.mubr.bf16.gmra.mrb[24].mxu0 %v7039_v7 }
 0x666   : > { %9449 = vmatprep.mubr.bf16.mxu0 %v7040_v48  ;;  %v12647_v48 = vld [vmem:[#allocation15_spill] sm:$0xff] }
 0x66d   : > { %9450 = vmatmul.mubr.bf16.gmra.mrb[28].mxu0 %v7041_v51  ;;  %v12648_v51 = vld [vmem:[#allocation11_spill] sm:$0xff] }
 0x66e   : > { %9453 = vmatprep.mubr.bf16.mxu0 %v7042_v35 }
 0x675   : > { %9454 = vmatmul.mubr.bf16.gmra.mrb[32].mxu0 %v7043_v20 }
 0x676   : > { %9457 = vmatprep.mubr.bf16.mxu0 %v7044_v38  ;;  %v12650_v38 = vld [vmem:[#allocation20_spill] sm:$0xff] }
 0x67d   : > { %9458 = vmatmul.mubr.bf16.gmra.mrb[36].mxu0 %v7045_v62  ;;  %v12651_v62 = vld [vmem:[#allocation23_spill] sm:$0xff] }
 0x67e   : > { %9461 = vmatprep.mubr.bf16.mxu0 %v7046_v11 }
 0x685   : > { %9462 = vmatmul.mubr.bf16.gmra.mrb[40].mxu0 %v7047_v47 }
 0x686   : > { %9465 = vmatprep.mubr.bf16.mxu0 %v7048_v56 }
 0x68d   : > { %9466 = vmatmul.mubr.bf16.gmra.mrb[44].mxu0 %v7049_v61  ;;  %v12654_v61 = vld [vmem:[#allocation28_spill] sm:$0xff] }
 0x68e   : > { %9469 = vmatprep.mubr.bf16.mxu0 %v7050_v22 }
 0x695   : > { %9470 = vmatmul.mubr.bf16.gmra.mrb[48].mxu0 %v7051_v29 }
 0x696   : > { %9473 = vmatprep.mubr.bf16.mxu0 %v7052_v10  ;;  %v12656_v10 = vld [vmem:[#allocation27_spill] sm:$0xff] }
 0x69d   : > { %9474 = vmatmul.mubr.bf16.gmra.mrb[52].mxu0 %v7053_v37 }
 0x730   : > { %v9443_v41 = vpop.f32.mrb[20].mxu0 }
 0x731   : > { %v7334_v60 = vadd.f32 %v9443_v41, %v12641_v50  ;;  %v7153_v30 = vpop.f32.mrb[21].mxu0  ;;  %v12657_v50 = vld [vmem:[#allocation10_spill] sm:$0xff] }
 0x732   : > { %v7332_v13 = vadd.f32 %v7153_v30, %v12642_v4  ;;  %v9444_v45 = vpop.f32.mrb[22].mxu0  ;;  %v12658_v4 = vld [vmem:[#allocation37_spill] sm:$0xff] }
 0x733   : > { %v7370_v43 = vmax.f32 %v7334_v60, 0.0  ;;  %v7335_v53 = vadd.f32 %v9444_v45, %v12643_v14  ;;  %v7156_v63 = vpop.f32.mrb[23].mxu0  ;;  %v12659_v14 = vld [vmem:[#allocation9_spill] sm:$0xff] }
 0x734   : > { %v7368_v54 = vmax.f32 %v7332_v13, 0.0  ;;  %v7333_v58 = vadd.f32 %v12644_v5, %v7156_v63  ;;  %v12660_v5 = vld [vmem:[#allocation36_spill] sm:$0xff] }
 0x735   : > { %7406 = vst [vmem:[%s12335_s17 + $0x10] sm:$0xff] %v7370_v43  ;;  %v7371_v3 = vmax.f32 %v7335_v53, 0.0 }
 0x736   : > { %7404 = vst [vmem:[%s12335_s17] sm:$0xff] %v7368_v54  ;;  %v7369_v19 = vmax.f32 %v7333_v58, 0.0 }
 0x737   : > { %7407 = vst [vmem:[%s12335_s17 + $0x18] sm:$0xff] %v7371_v3 }
 0x738   : > { %7405 = vst [vmem:[%s12335_s17 + $0x8] sm:$0xff] %v7369_v19  ;;  %v9447_v9 = vpop.f32.mrb[24].mxu0 }
 0x739   : > { %v7338_v26 = vadd.f32 %v9447_v9, %v12645_v44  ;;  %v7169_v2 = vpop.f32.mrb[25].mxu0  ;;  %v12661_v44 = vld [vmem:[#allocation18_spill] sm:$0xff] }
 0x73a   : > { %v7336_v28 = vadd.f32 %v7169_v2, %v12646_v12  ;;  %v9448_v7 = vpop.f32.mrb[26].mxu0  ;;  %v12662_v12 = vld [vmem:[#allocation14_spill] sm:$0xff] }
 0x73b   : > { %v7374_v40 = vmax.f32 %v7338_v26, 0.0  ;;  %v7339_v25 = vadd.f32 %v9448_v7, %v12647_v48  ;;  %v7172_v23 = vpop.f32.mrb[27].mxu0  ;;  %v12663_v48 = vld [vmem:[#allocation17_spill] sm:$0xff] }
 0x73c   : > { %v7372_v8 = vmax.f32 %v7336_v28, 0.0  ;;  %v7337_v52 = vadd.f32 %v12648_v51, %v7172_v23  ;;  %v12664_v51 = vld [vmem:[#allocation13_spill] sm:$0xff] }
 0x73d   : > { %7410 = vst [vmem:[%s12335_s17 + $0x30] sm:$0xff] %v7374_v40  ;;  %v7375_v35 = vmax.f32 %v7339_v25, 0.0 }
 0x73e   : > { %7408 = vst [vmem:[%s12335_s17 + $0x20] sm:$0xff] %v7372_v8  ;;  %v7373_v6 = vmax.f32 %v7337_v52, 0.0 }
 0x73f   : > { %7411 = vst [vmem:[%s12335_s17 + $0x38] sm:$0xff] %v7375_v35 }
 0x740   : > { %7409 = vst [vmem:[%s12335_s17 + $0x28] sm:$0xff] %v7373_v6  ;;  %v9451_v15 = vpop.f32.mrb[28].mxu0 }
 0x741   : > { %v7342_v20 = vadd.f32 %v9451_v15, %v12649_v18  ;;  %v7185_v34 = vpop.f32.mrb[29].mxu0  ;;  %v12665_v18 = vld [vmem:[#allocation26_spill] sm:$0xff] }
 0x742   : > { %v7340_v39 = vadd.f32 %v7185_v34, %v12650_v38  ;;  %v9452_v49 = vpop.f32.mrb[30].mxu0  ;;  %v12666_v38 = vld [vmem:[#allocation22_spill] sm:$0xff] }
 0x743   : > { %v7378_v33 = vmax.f32 %v7342_v20, 0.0  ;;  %v7343_v27 = vadd.f32 %v9452_v49, %v12651_v62  ;;  %v7188_v11 = vpop.f32.mrb[31].mxu0  ;;  %v12667_v62 = vld [vmem:[#allocation25_spill] sm:$0xff] }
 0x744   : > { %v7376_v57 = vmax.f32 %v7340_v39, 0.0  ;;  %v7341_v46 = vadd.f32 %v12652_v31, %v7188_v11  ;;  %v12668_v31 = vld [vmem:[#allocation21_spill] sm:$0xff] }
 0x745   : > { %7414 = vst [vmem:[%s12335_s17 + $0x50] sm:$0xff] %v7378_v33  ;;  %v7379_v47 = vmax.f32 %v7343_v27, 0.0 }
 0x746   : > { %7412 = vst [vmem:[%s12335_s17 + $0x40] sm:$0xff] %v7376_v57  ;;  %v7377_v42 = vmax.f32 %v7341_v46, 0.0 }
 0x747   : > { %7415 = vst [vmem:[%s12335_s17 + $0x58] sm:$0xff] %v7379_v47 }
 0x748   : > { %7413 = vst [vmem:[%s12335_s17 + $0x48] sm:$0xff] %v7377_v42  ;;  %v9455_v56 = vpop.f32.mrb[32].mxu0 }
 0x749   : > { %v7346_v36 = vadd.f32 %v9455_v56, %v12653_v21  ;;  %v7201_v32 = vpop.f32.mrb[33].mxu0  ;;  %v12669_v21 = vld [vmem:[#allocation34_spill] sm:$0xff] }
 0x74a   : > { %v7344_v24 = vadd.f32 %v7201_v32, %v12654_v61  ;;  %v9456_v22 = vpop.f32.mrb[34].mxu0  ;;  %v12670_v61 = vld [vmem:[#allocation30_spill] sm:$0xff] }
 0x74b   : > { %v7382_v59 = vmax.f32 %v7346_v36, 0.0  ;;  %v7347_v16 = vadd.f32 %v9456_v22, %v12655_v17  ;;  %v7204_v0 = vpop.f32.mrb[35].mxu0  ;;  %v12671_v17 = vld [vmem:[#allocation33_spill] sm:$0xff] }
 0x74c   : > { %v7380_v29 = vmax.f32 %v7344_v24, 0.0  ;;  %v7345_v1 = vadd.f32 %v12656_v10, %v7204_v0  ;;  %v12672_v10 = vld [vmem:[#allocation29_spill] sm:$0xff] }
 0x74d   : > { %7418 = vst [vmem:[%s12335_s17 + $0x70] sm:$0xff] %v7382_v59  ;;  %v7383_v55 = vmax.f32 %v7347_v16, 0.0 }
 0x74e   : > { %7416 = vst [vmem:[%s12335_s17 + $0x60] sm:$0xff] %v7380_v29  ;;  %v7381_v37 = vmax.f32 %v7345_v1, 0.0 }
 0x74f   : > { %7419 = vst [vmem:[%s12335_s17 + $0x78] sm:$0xff] %v7383_v55 }
 0x750   : > { %7417 = vst [vmem:[%s12335_s17 + $0x68] sm:$0xff] %v7381_v37  ;;  %v9459_v41 = vpop.f32.mrb[36].mxu0 }
 0x751   : > { %v7350_v60 = vadd.f32 %v9459_v41, %v12657_v50  ;;  %v7217_v30 = vpop.f32.mrb[37].mxu0  ;;  %v12673_v50 = vld [vmem:[#allocation42_spill] sm:$0xff] }
 0x752   : > { %v7348_v13 = vadd.f32 %v7217_v30, %v12658_v4  ;;  %v9460_v45 = vpop.f32.mrb[38].mxu0  ;;  %v12674_v4 = vld [vmem:[#allocation39_spill] sm:$0xff] }
 0x753   : > { %v7386_v43 = vmax.f32 %v7350_v60, 0.0  ;;  %v7351_v53 = vadd.f32 %v9460_v45, %v12659_v14  ;;  %v7220_v63 = vpop.f32.mrb[39].mxu0  ;;  %v12675_v14 = vld [vmem:[#allocation41_spill] sm:$0xff] }
 0x754   : > { %v7384_v54 = vmax.f32 %v7348_v13, 0.0  ;;  %v7349_v58 = vadd.f32 %v12660_v5, %v7220_v63  ;;  %v12676_v5 = vld [vmem:[#allocation38_spill] sm:$0xff] }
 0x755   : > { %7422 = vst [vmem:[%s12335_s17 + $0x90] sm:$0xff] %v7386_v43  ;;  %v7387_v3 = vmax.f32 %v7351_v53, 0.0 }
 0x756   : > { %7420 = vst [vmem:[%s12335_s17 + $0x80] sm:$0xff] %v7384_v54  ;;  %v7385_v19 = vmax.f32 %v7349_v58, 0.0 }
 0x757   : > { %7423 = vst [vmem:[%s12335_s17 + $0x98] sm:$0xff] %v7387_v3 }
 0x758   : > { %7421 = vst [vmem:[%s12335_s17 + $0x88] sm:$0xff] %v7385_v19  ;;  %v9463_v9 = vpop.f32.mrb[40].mxu0 }
 0x759   : > { %v7354_v26 = vadd.f32 %v9463_v9, %v12661_v44  ;;  %v7233_v2 = vpop.f32.mrb[41].mxu0 }
 0x75a   : > { %v7352_v28 = vadd.f32 %v7233_v2, %v12662_v12  ;;  %v9464_v7 = vpop.f32.mrb[42].mxu0 }
 0x75b   : > { %v7390_v40 = vmax.f32 %v7354_v26, 0.0  ;;  %v7355_v25 = vadd.f32 %v9464_v7, %v12663_v48  ;;  %v7236_v23 = vpop.f32.mrb[43].mxu0 }
 0x75c   : > { %v7388_v8 = vmax.f32 %v7352_v28, 0.0  ;;  %v7353_v52 = vadd.f32 %v12664_v51, %v7236_v23 }
 0x75d   : > { %7426 = vst [vmem:[%s12335_s17 + $0xb0] sm:$0xff] %v7390_v40  ;;  %v7391_v35 = vmax.f32 %v7355_v25, 0.0 }
 0x75e   : > { %7424 = vst [vmem:[%s12335_s17 + $0xa0] sm:$0xff] %v7388_v8  ;;  %v7389_v6 = vmax.f32 %v7353_v52, 0.0 }
 0x75f   : > { %7427 = vst [vmem:[%s12335_s17 + $0xb8] sm:$0xff] %v7391_v35 }
 0x760   : > { %7425 = vst [vmem:[%s12335_s17 + $0xa8] sm:$0xff] %v7389_v6  ;;  %v9467_v15 = vpop.f32.mrb[44].mxu0 }
 0x761   : > { %v7358_v20 = vadd.f32 %v9467_v15, %v12665_v18  ;;  %v7249_v34 = vpop.f32.mrb[45].mxu0 }
 0x762   : > { %v7356_v39 = vadd.f32 %v7249_v34, %v12666_v38  ;;  %v9468_v49 = vpop.f32.mrb[46].mxu0 }
 0x763   : > { %v7394_v33 = vmax.f32 %v7358_v20, 0.0  ;;  %v7359_v27 = vadd.f32 %v9468_v49, %v12667_v62  ;;  %v7252_v11 = vpop.f32.mrb[47].mxu0 }
 0x764   : > { %v7392_v57 = vmax.f32 %v7356_v39, 0.0  ;;  %v7357_v46 = vadd.f32 %v12668_v31, %v7252_v11 }
 0x765   : > { %7430 = vst [vmem:[%s12335_s17 + $0xd0] sm:$0xff] %v7394_v33  ;;  %v7395_v47 = vmax.f32 %v7359_v27, 0.0 }
 0x766   : > { %7428 = vst [vmem:[%s12335_s17 + $0xc0] sm:$0xff] %v7392_v57  ;;  %v7393_v42 = vmax.f32 %v7357_v46, 0.0 }
 0x767   : > { %7431 = vst [vmem:[%s12335_s17 + $0xd8] sm:$0xff] %v7395_v47 }
 0x768   : > { %7429 = vst [vmem:[%s12335_s17 + $0xc8] sm:$0xff] %v7393_v42  ;;  %v9471_v56 = vpop.f32.mrb[48].mxu0 }
 0x769   : > { %v7362_v36 = vadd.f32 %v9471_v56, %v12669_v21  ;;  %v7265_v32 = vpop.f32.mrb[49].mxu0 }
 0x76a   : > { %v7360_v24 = vadd.f32 %v7265_v32, %v12670_v61  ;;  %v9472_v22 = vpop.f32.mrb[50].mxu0 }
 0x76b   : > { %v7398_v59 = vmax.f32 %v7362_v36, 0.0  ;;  %v7363_v16 = vadd.f32 %v9472_v22, %v12671_v17  ;;  %v7268_v0 = vpop.f32.mrb[51].mxu0 }
 0x76c   : > { %v7396_v29 = vmax.f32 %v7360_v24, 0.0  ;;  %v7361_v1 = vadd.f32 %v12672_v10, %v7268_v0 }
 0x76d   : > { %7434 = vst [vmem:[%s12335_s17 + $0xf0] sm:$0xff] %v7398_v59  ;;  %v7399_v55 = vmax.f32 %v7363_v16, 0.0 }
 0x76e   : > { %7432 = vst [vmem:[%s12335_s17 + $0xe0] sm:$0xff] %v7396_v29  ;;  %v7397_v37 = vmax.f32 %v7361_v1, 0.0 }
 0x76f   : > { %7435 = vst [vmem:[%s12335_s17 + $0xf8] sm:$0xff] %v7399_v55 }
 0x770   : > { %7433 = vst [vmem:[%s12335_s17 + $0xe8] sm:$0xff] %v7397_v37  ;;  %v9475_v41 = vpop.f32.mrb[52].mxu0 }
 0x771   : > { %v7366_v60 = vadd.f32 %v9475_v41, %v12673_v50  ;;  %v7281_v30 = vpop.f32.mrb[53].mxu0 }
 0x772   : > { %v7364_v13 = vadd.f32 %v7281_v30, %v12674_v4  ;;  %v9476_v45 = vpop.f32.mrb[54].mxu0 }
 0x773   : > { %v7402_v43 = vmax.f32 %v7366_v60, 0.0  ;;  %v7367_v53 = vadd.f32 %v9476_v45, %v12675_v14  ;;  %v7284_v63 = vpop.f32.mrb[55].mxu0 }
 0x774   : > { %v7400_v54 = vmax.f32 %v7364_v13, 0.0  ;;  %v7365_v58 = vadd.f32 %v12676_v5, %v7284_v63 }
 0x775   : > { %7438 = vst [vmem:[%s12335_s17 + $0x110] sm:$0xff] %v7402_v43  ;;  %v7403_v3 = vmax.f32 %v7367_v53, 0.0 }
 0x776   : > { %7436 = vst [vmem:[%s12335_s17 + $0x100] sm:$0xff] %v7400_v54  ;;  %v7401_v19 = vmax.f32 %v7365_v58, 0.0 }
 0x777   : > { %7439 = vst [vmem:[%s12335_s17 + $0x118] sm:$0xff] %v7403_v3 }
 0x778   : > { %7437 = vst [vmem:[%s12335_s17 + $0x108] sm:$0xff] %v7401_v19 }
 0x779 PF: > { %s14_s15 = sadd.s32 1, %s10296_s15  }
 0x77a   : > { %p11_p4 = scmp.ge.s32.totalorder %s14_s15, 4  }
 0x77c   :  { %13 = sbr.rel (!%p11_p4) target bundleno = 1 (0x1), region = 82 }

</bundles_post_ra>
